<compile_context>
chip_gen: v7x
topology: tpu7x:2x2x1
jax: 0.10.0
libtpu: 0.0.40
codegen_flags: <defaults>
</compile_context>

<pallas_src>
import functools
import math

import numpy as np
import jax
import jax.numpy as jnp
from jax.experimental import pallas as pl
from jax.experimental.pallas import tpu as pltpu


# ----------------------------- conv geometry helpers -----------------------------
_K, _STRIDE, _PAD, _OUTPAD = 3, 2, 1, 1


def _conv_len(L):
    return (L + 2 * _PAD - _K) // _STRIDE + 1


def _convT_len(L):
    return (L - 1) * _STRIDE - 2 * _PAD + _K + _OUTPAD


def _conv_sel(Li, Lo):
    """Conv1d gather: S[j, o, i] = 1 iff i == stride*o + j - pad."""
    S = np.zeros((_K, Lo, Li), np.float32)
    for j in range(_K):
        for o in range(Lo):
            i = _STRIDE * o + j - _PAD
            if 0 <= i < Li:
                S[j, o, i] = 1.0
    return S


def _convT_sel(Li, Lo):
    """ConvTranspose1d scatter: T[j, o, i] = 1 iff o == stride*i + j - pad."""
    T = np.zeros((_K, Lo, Li), np.float32)
    for j in range(_K):
        for i in range(Li):
            o = _STRIDE * i + j - _PAD
            if 0 <= o < Lo:
                T[j, o, i] = 1.0
    return T


@functools.lru_cache(maxsize=None)
def _build_selectors(B, L0):
    """Precompute all position-selection matrices (block-diagonal over batch)."""
    L1, L2, L3 = _conv_len(L0), _conv_len(_conv_len(L0)), _conv_len(_conv_len(_conv_len(L0)))
    Ls1, Ls2 = _convT_len(L3), _convT_len(_convT_len(L3))
    Lout = _convT_len(Ls2)

    se1 = _conv_sel(L0, L1)
    se2 = _conv_sel(L1, L2)
    se3 = _conv_sel(L2, L3)
    td1 = _convT_sel(L3, Ls1)
    td2 = _convT_sel(Ls1, Ls2)
    td3 = _convT_sel(Ls2, Lout)
    # Skip branches: decoder input is cat(dec, F.pad(enc, (0, n))).  Multiplying the
    # scatter matrix by the zero-pad matrix == dropping its trailing columns.
    td2k = td2[:, :, :L2]   # acts directly on x2 (length L2)
    td3k = td3[:, :, :L1]   # acts directly on x1 (length L1)

    per_batch = dict(se1=se1, se2=se2, se3=se3,
                     sd1=td1, sd2=td2, sd2k=td2k, sd3=td3, sd3k=td3k)

    eye = np.eye(B, dtype=np.float32)

    def block_diag(S):
        return np.stack([np.kron(eye, S[j]) for j in range(S.shape[0])])

    return {k: jnp.asarray(block_diag(v), dtype=jnp.bfloat16)
            for k, v in per_batch.items()}


# ----------------------------------- kernel -----------------------------------
def _unet_kernel(x_ref,
                 se1_ref, we1_ref, be1_ref,
                 se2_ref, we2_ref, be2_ref,
                 se3_ref, we3_ref, be3_ref,
                 sd1_ref, ws1_ref, bs1_ref, wn1_ref, bn1_ref,
                 sd2_ref, sd2k_ref, ws2a_ref, ws2b_ref, bs2_ref,
                 wn2a_ref, wn2b_ref, bn2_ref,
                 sd3_ref, sd3k_ref, ws3a_ref, ws3b_ref, bs3_ref,
                 wn3a_ref, wn3b_ref, bn3_ref,
                 sig_ref, noi_ref):
    f32 = jnp.float32
    bf16 = jnp.bfloat16

    def lrelu(v):                                   # F.leaky_relu, slope 0.01
        return jnp.where(v > 0, v, 0.01 * v)

    def sigmoid(v):
        return 1.0 / (1.0 + jnp.exp(-v))

    def taps(x, sel_ref, w_ref):
        """sum_j sel[j] @ (x @ W[j]).  x:(Mi,Cin) f32, sel:(k,Mo,Mi) bf16,
        W:(k,Cin,Cout) bf16  ->  (Mo,Cout) f32."""
        k, cin, _ = w_ref.shape
        xb = None if cin == 1 else x.astype(bf16)
        acc = None
        for j in range(k):
            if cin == 1:                            # degenerate K=1: VPU outer product
                hb = (x * w_ref[j].astype(f32)).astype(bf16)
            else:
                hb = jnp.dot(xb, w_ref[j], preferred_element_type=f32).astype(bf16)
            t = jnp.dot(sel_ref[j], hb, preferred_element_type=f32)
            acc = t if acc is None else acc + t
        return acc

    def taps_cout1(x, sel_ref, w_ref):
        """Single-output-channel layer as a VPU weighted sum.
        x:(Mi,Cin) f32, sel:(k,Mo,Mi) bf16, W:(k,1,Cin) bf16  ->  (Mo,1) f32."""
        k = w_ref.shape[0]
        xb = x.astype(bf16)
        acc = None
        for j in range(k):
            g = jnp.dot(sel_ref[j], xb, preferred_element_type=f32)          # (Mo, Cin)
            h = jnp.sum(g * w_ref[j].astype(f32), axis=-1, keepdims=True)    # (Mo, 1)
            acc = h if acc is None else acc + h
        return acc

    x0 = x_ref[...].astype(f32)                                              # (B*L0, 1)

    # ---- encoder ----
    x1 = lrelu(taps(x0, se1_ref, we1_ref) + be1_ref[...])                    # (B*L1, 16)
    x2 = lrelu(taps(x1, se2_ref, we2_ref) + be2_ref[...])                    # (B*L2, 32)
    x3 = lrelu(taps(x2, se3_ref, we3_ref) + be3_ref[...])                    # (B*L3, latent)

    # ---- signal decoder (skip concats folded into split weights) ----
    s1 = lrelu(taps(x3, sd1_ref, ws1_ref) + bs1_ref[...])                    # (B*Ls1, 32)
    s2 = lrelu(taps(s1, sd2_ref, ws2a_ref)
               + taps(x2, sd2k_ref, ws2b_ref) + bs2_ref[...])                # (B*Ls2, 16)
    rec = sigmoid(taps_cout1(s2, sd3_ref, ws3a_ref)
                  + taps_cout1(x1, sd3k_ref, ws3b_ref) + bs3_ref[...])       # (B*Lout, 1)

    # ---- noise decoder ----
    n1 = lrelu(taps(x3, sd1_ref, wn1_ref) + bn1_ref[...])
    n2 = lrelu(taps(n1, sd2_ref, wn2a_ref)
               + taps(x2, sd2k_ref, wn2b_ref) + bn2_ref[...])
    noi = sigmoid(taps_cout1(n2, sd3_ref, wn3a_ref)
                  + taps_cout1(x1, sd3k_ref, wn3b_ref) + bn3_ref[...])

    sig_ref[...] = rec
    noi_ref[...] = noi


# ------------------------------- parameter handling -------------------------------
def init_params(key, input_channels=1, latent_dim=16):
    """Random parameters in native PyTorch layouts (Conv1d: (Cout,Cin,k);
    ConvTranspose1d: (Cin,Cout,k))."""
    ks = iter(jax.random.split(key, 18))

    def conv(cin, cout):
        bound = 1.0 / math.sqrt(cin * _K)
        w = jax.random.uniform(next(ks), (cout, cin, _K), jnp.float32, -bound, bound)
        b = jax.random.uniform(next(ks), (cout,), jnp.float32, -bound, bound)
        return w, b

    def convT(cin, cout):
        bound = 1.0 / math.sqrt(cin * _K)
        w = jax.random.uniform(next(ks), (cin, cout, _K), jnp.float32, -bound, bound)
        b = jax.random.uniform(next(ks), (cout,), jnp.float32, -bound, bound)
        return w, b

    p = {}
    p["enc1_w"], p["enc1_b"] = conv(input_channels, 16)
    p["enc2_w"], p["enc2_b"] = conv(16, 32)
    p["enc3_w"], p["enc3_b"] = conv(32, latent_dim)
    p["decSig1_w"], p["decSig1_b"] = convT(latent_dim, 32)
    p["decSig2_w"], p["decSig2_b"] = convT(64, 16)
    p["decSig3_w"], p["decSig3_b"] = convT(32, 1)
    p["decNoi1_w"], p["decNoi1_b"] = convT(latent_dim, 32)
    p["decNoi2_w"], p["decNoi2_b"] = convT(64, 16)
    p["decNoi3_w"], p["decNoi3_b"] = convT(32, 1)
    return p


def pack_params(p):
    """One-time (outside jit) conversion of PyTorch-layout weights into the
    per-tap kernel layout: (k, Cin, Cout) bf16, biases (1, Cout) f32."""
    bf16, f32 = jnp.bfloat16, jnp.float32

    def conv_w(w):       # (Cout, Cin, k) -> (k, Cin, Cout)
        return jnp.transpose(w, (2, 1, 0)).astype(bf16)

    def convT_w(w):      # (Cin, Cout, k) -> (k, Cin, Cout)
        return jnp.transpose(w, (2, 0, 1)).astype(bf16)

    def bias(b):
        return b.reshape(1, -1).astype(f32)

    q = dict(
        we1=conv_w(p["enc1_w"]), be1=bias(p["enc1_b"]),
        we2=conv_w(p["enc2_w"]), be2=bias(p["enc2_b"]),
        we3=conv_w(p["enc3_w"]), be3=bias(p["enc3_b"]),
        ws1=convT_w(p["decSig1_w"]), bs1=bias(p["decSig1_b"]),
        wn1=convT_w(p["decNoi1_w"]), bn1=bias(p["decNoi1_b"]),
    )
    # dec*2: in_channels 64 = [decoder branch 32 | padded x2 skip 32]
    ws2 = convT_w(p["decSig2_w"])
    q["ws2a"], q["ws2b"], q["bs2"] = ws2[:, :32, :], ws2[:, 32:, :], bias(p["decSig2_b"])
    wn2 = convT_w(p["decNoi2_w"])
    q["wn2a"], q["wn2b"], q["bn2"] = wn2[:, :32, :], wn2[:, 32:, :], bias(p["decNoi2_b"])
    # dec*3: in_channels 32 = [decoder branch 16 | padded x1 skip 16], out_channels 1.
    # Cout==1 layers are a VPU weighted sum, so store the weight as (k, 1, Cin).
    ws3 = convT_w(p["decSig3_w"])
    q["ws3a"] = jnp.transpose(ws3[:, :16, :], (0, 2, 1))
    q["ws3b"] = jnp.transpose(ws3[:, 16:, :], (0, 2, 1))
    q["bs3"] = bias(p["decSig3_b"])
    wn3 = convT_w(p["decNoi3_w"])
    q["wn3a"] = jnp.transpose(wn3[:, :16, :], (0, 2, 1))
    q["wn3b"] = jnp.transpose(wn3[:, 16:, :], (0, 2, 1))
    q["bn3"] = bias(p["decNoi3_b"])
    return q


# --------------------------------- forward wrapper ---------------------------------
def conv1dunet_forward(packed, x_ncl):
    """x_ncl: (B, 1, L) like PyTorch.  Returns (reconstructed, noise), each (B, Lout)."""
    B, Cin, L0 = x_ncl.shape
    if Cin != 1:
        raise ValueError("Conv1DUnet expects a single input channel")
    L1, L2, L3 = _conv_len(L0), _conv_len(_conv_len(L0)), _conv_len(_conv_len(_conv_len(L0)))
    Ls1, Ls2 = _convT_len(L3), _convT_len(_convT_len(L3))
    Lout = _convT_len(Ls2)
    if Ls1 != L2 + 1 or Ls2 != L1 + 2:
        raise ValueError("input length incompatible with Conv1DUnet skip connections")

    sels = _build_selectors(B, L0)
    x_flat = x_ncl.reshape(B * L0, 1).astype(jnp.float32)   # (B*L, 1), batch-major rows

    inputs = [
        x_flat,
        sels["se1"], packed["we1"], packed["be1"],
        sels["se2"], packed["we2"], packed["be2"],
        sels["se3"], packed["we3"], packed["be3"],
        sels["sd1"], packed["ws1"], packed["bs1"], packed["wn1"], packed["bn1"],
        sels["sd2"], sels["sd2k"], packed["ws2a"], packed["ws2b"], packed["bs2"],
        packed["wn2a"], packed["wn2b"], packed["bn2"],
        sels["sd3"], sels["sd3k"], packed["ws3a"], packed["ws3b"], packed["bs3"],
        packed["wn3a"], packed["wn3b"], packed["bn3"],
    ]

    def full_spec(a):
        nd = a.ndim
        return pl.BlockSpec(a.shape, lambda i, _nd=nd: (0,) * _nd)

    # advisory cost estimate so XLA schedules the (trivial) surrounding glue tightly
    def tap_flops(Mi, Cin_, Mo, Cout_):
        return _K * 2 * (Mi * Cin_ * Cout_ + Mo * Mi * Cout_)

    lat = packed["we3"].shape[2]
    flops = int(
        tap_flops(B * L0, 1, B * L1, 16)
        + tap_flops(B * L1, 16, B * L2, 32)
        + tap_flops(B * L2, 32, B * L3, lat)
        + 2 * (tap_flops(B * L3, lat, B * Ls1, 32)
               + tap_flops(B * Ls1, 32, B * Ls2, 16)
               + tap_flops(B * L2, 32, B * Ls2, 16)
               + tap_flops(B * Ls2, 16, B * Lout, 1)
               + tap_flops(B * L1, 16, B * Lout, 1)))
    bytes_accessed = int(sum(int(np.prod(a.shape)) * a.dtype.itemsize for a in inputs)
                         + 2 * B * Lout * 4)

    rec_flat, noi_flat = pl.pallas_call(
        _unet_kernel,
        out_shape=(jax.ShapeDtypeStruct((B * Lout, 1), jnp.float32),
                   jax.ShapeDtypeStruct((B * Lout, 1), jnp.float32)),
        grid=(1,),
        in_specs=[full_spec(a) for a in inputs],
        out_specs=(pl.BlockSpec((B * Lout, 1), lambda i: (0, 0)),
                   pl.BlockSpec((B * Lout, 1), lambda i: (0, 0))),
        compiler_params=pltpu.CompilerParams(dimension_semantics=("arbitrary",)),
        cost_estimate=pl.CostEstimate(flops=flops, transcendentals=int(2 * B * Lout),
                                      bytes_accessed=bytes_accessed),
    )(*inputs)

    return rec_flat.reshape(B, Lout), noi_flat.reshape(B, Lout)


# ------------------------- numpy reference (for verification) -------------------------
def _np_conv1d(x, w, b):
    Bn, Cin, L = x.shape
    Cout, _, k = w.shape
    xp = np.pad(x, ((0, 0), (0, 0), (_PAD, _PAD)))
    Lo = _conv_len(L)
    y = np.zeros((Bn, Cout, Lo), np.float32)
    for o in range(Lo):
        seg = xp[:, :, o * _STRIDE:o * _STRIDE + k]
        y[:, :, o] = np.einsum("bck,ock->bo", seg, w) + b
    return y


def _np_convT1d(x, w, b):
    Bn, Cin, L = x.shape
    _, Cout, k = w.shape
    Lo = _convT_len(L)
    y = np.zeros((Bn, Cout, Lo), np.float32)
    for i in range(L):
        for j in range(k):
            o = _STRIDE * i + j - _PAD
            if 0 <= o < Lo:
                y[:, :, o] += np.einsum("bc,cd->bd", x[:, :, i], w[:, :, j])
    return y + b[None, :, None]


def reference_forward(params, x):
    p = {k: np.asarray(v, np.float32) for k, v in params.items()}
    x = np.asarray(x, np.float32)
    lrelu = lambda v: np.where(v > 0, v, 0.01 * v)
    sig = lambda v: 1.0 / (1.0 + np.exp(-v))
    pad_last = lambda a, n: np.pad(a, ((0, 0), (0, 0), (0, n)))

    x1 = lrelu(_np_conv1d(x, p["enc1_w"], p["enc1_b"]))
    x2 = lrelu(_np_conv1d(x1, p["enc2_w"], p["enc2_b"]))
    x3 = lrelu(_np_conv1d(x2, p["enc3_w"], p["enc3_b"]))
    s1 = lrelu(_np_convT1d(x3, p["decSig1_w"], p["decSig1_b"]))
    s2 = lrelu(_np_convT1d(np.concatenate([s1, pad_last(x2, 1)], 1), p["decSig2_w"], p["decSig2_b"]))
    rec = sig(_np_convT1d(np.concatenate([s2, pad_last(x1, 2)], 1), p["decSig3_w"], p["decSig3_b"]))
    n1 = lrelu(_np_convT1d(x3, p["decNoi1_w"], p["decNoi1_b"]))
    n2 = lrelu(_np_convT1d(np.concatenate([n1, pad_last(x2, 1)], 1), p["decNoi2_w"], p["decNoi2_b"]))
    noi = sig(_np_convT1d(np.concatenate([n2, pad_last(x1, 2)], 1), p["decNoi3_w"], p["decNoi3_b"]))
    return rec.squeeze(), noi.squeeze()


# ---------------------------------------- demo ----------------------------------------
if __name__ == "__main__":
    B, L = 2, 28   # L % 8 == 4 so the U-Net skip concatenations line up (as in the module)

    key = jax.random.PRNGKey(0)
    pkey, xkey = jax.random.split(key)
    torch_layout_params = init_params(pkey)
    packed = pack_params(torch_layout_params)

    x = jax.random.normal(xkey, (B, 1, L), jnp.float32)   # PyTorch (N, C, L)

    fwd = jax.jit(conv1dunet_forward)
    rec, noi = jax.block_until_ready(fwd(packed, x))

    Lout = _convT_len(_convT_len(_convT_len(_conv_len(_conv_len(_conv_len(L))))))
    assert rec.shape == (B, Lout) and noi.shape == (B, Lout), (rec.shape, noi.shape)
    assert rec.dtype == jnp.float32 and noi.dtype == jnp.float32
    assert bool(jnp.all(jnp.isfinite(rec))) and bool(jnp.all(jnp.isfinite(noi)))

    rec_ref, noi_ref = reference_forward(torch_layout_params, x)
    if not (np.allclose(np.asarray(rec), rec_ref, atol=5e-2, rtol=5e-2)
            and np.allclose(np.asarray(noi), noi_ref, atol=5e-2, rtol=5e-2)):
        raise AssertionError("Pallas Conv1DUnet output mismatch vs numpy reference")

    print("KERNEL_OK")
</pallas_src>

<mosaic_0001>
module attributes {stable_mosaic.version = 11 : i64} {
  func.func @_unet_kernel(%arg0: i32, %arg1: memref<56x1xf32, #tpu.memory_space<vmem>>, %arg2: memref<3x28x56xbf16, #tpu.memory_space<vmem>>, %arg3: memref<3x1x16xbf16, #tpu.memory_space<vmem>>, %arg4: memref<1x16xf32, #tpu.memory_space<vmem>>, %arg5: memref<3x14x28xbf16, #tpu.memory_space<vmem>>, %arg6: memref<3x16x32xbf16, #tpu.memory_space<vmem>>, %arg7: memref<1x32xf32, #tpu.memory_space<vmem>>, %arg8: memref<3x8x14xbf16, #tpu.memory_space<vmem>>, %arg9: memref<3x32x16xbf16, #tpu.memory_space<vmem>>, %arg10: memref<1x16xf32, #tpu.memory_space<vmem>>, %arg11: memref<3x16x8xbf16, #tpu.memory_space<vmem>>, %arg12: memref<3x16x32xbf16, #tpu.memory_space<vmem>>, %arg13: memref<1x32xf32, #tpu.memory_space<vmem>>, %arg14: memref<3x16x32xbf16, #tpu.memory_space<vmem>>, %arg15: memref<1x32xf32, #tpu.memory_space<vmem>>, %arg16: memref<3x32x16xbf16, #tpu.memory_space<vmem>>, %arg17: memref<3x32x14xbf16, #tpu.memory_space<vmem>>, %arg18: memref<3x32x16xbf16, #tpu.memory_space<vmem>>, %arg19: memref<3x32x16xbf16, #tpu.memory_space<vmem>>, %arg20: memref<1x16xf32, #tpu.memory_space<vmem>>, %arg21: memref<3x32x16xbf16, #tpu.memory_space<vmem>>, %arg22: memref<3x32x16xbf16, #tpu.memory_space<vmem>>, %arg23: memref<1x16xf32, #tpu.memory_space<vmem>>, %arg24: memref<3x64x32xbf16, #tpu.memory_space<vmem>>, %arg25: memref<3x64x28xbf16, #tpu.memory_space<vmem>>, %arg26: memref<3x1x16xbf16, #tpu.memory_space<vmem>>, %arg27: memref<3x1x16xbf16, #tpu.memory_space<vmem>>, %arg28: memref<1x1xf32, #tpu.memory_space<vmem>>, %arg29: memref<3x1x16xbf16, #tpu.memory_space<vmem>>, %arg30: memref<3x1x16xbf16, #tpu.memory_space<vmem>>, %arg31: memref<1x1xf32, #tpu.memory_space<vmem>>, %arg32: memref<64x1xf32, #tpu.memory_space<vmem>>, %arg33: memref<64x1xf32, #tpu.memory_space<vmem>>) attributes {dimension_semantics = [#tpu.dimension_semantics<arbitrary>], iteration_bounds = array<i64: 1>, scalar_prefetch = 0 : i64, scratch_operands = 0 : i64, tpu.core_type = #tpu.core_type<tc>, window_params = [{pipeline_mode = #tpu.pipeline_mode<synchronous>, transform_indices = @transform_0, window_bounds = array<i64: 56, 1>}, {pipeline_mode = #tpu.pipeline_mode<synchronous>, transform_indices = @transform_1, window_bounds = array<i64: 3, 28, 56>}, {pipeline_mode = #tpu.pipeline_mode<synchronous>, transform_indices = @transform_2, window_bounds = array<i64: 3, 1, 16>}, {pipeline_mode = #tpu.pipeline_mode<synchronous>, transform_indices = @transform_3, window_bounds = array<i64: 1, 16>}, {pipeline_mode = #tpu.pipeline_mode<synchronous>, transform_indices = @transform_4, window_bounds = array<i64: 3, 14, 28>}, {pipeline_mode = #tpu.pipeline_mode<synchronous>, transform_indices = @transform_5, window_bounds = array<i64: 3, 16, 32>}, {pipeline_mode = #tpu.pipeline_mode<synchronous>, transform_indices = @transform_6, window_bounds = array<i64: 1, 32>}, {pipeline_mode = #tpu.pipeline_mode<synchronous>, transform_indices = @transform_7, window_bounds = array<i64: 3, 8, 14>}, {pipeline_mode = #tpu.pipeline_mode<synchronous>, transform_indices = @transform_8, window_bounds = array<i64: 3, 32, 16>}, {pipeline_mode = #tpu.pipeline_mode<synchronous>, transform_indices = @transform_9, window_bounds = array<i64: 1, 16>}, {pipeline_mode = #tpu.pipeline_mode<synchronous>, transform_indices = @transform_10, window_bounds = array<i64: 3, 16, 8>}, {pipeline_mode = #tpu.pipeline_mode<synchronous>, transform_indices = @transform_11, window_bounds = array<i64: 3, 16, 32>}, {pipeline_mode = #tpu.pipeline_mode<synchronous>, transform_indices = @transform_12, window_bounds = array<i64: 1, 32>}, {pipeline_mode = #tpu.pipeline_mode<synchronous>, transform_indices = @transform_13, window_bounds = array<i64: 3, 16, 32>}, {pipeline_mode = #tpu.pipeline_mode<synchronous>, transform_indices = @transform_14, window_bounds = array<i64: 1, 32>}, {pipeline_mode = #tpu.pipeline_mode<synchronous>, transform_indices = @transform_15, window_bounds = array<i64: 3, 32, 16>}, {pipeline_mode = #tpu.pipeline_mode<synchronous>, transform_indices = @transform_16, window_bounds = array<i64: 3, 32, 14>}, {pipeline_mode = #tpu.pipeline_mode<synchronous>, transform_indices = @transform_17, window_bounds = array<i64: 3, 32, 16>}, {pipeline_mode = #tpu.pipeline_mode<synchronous>, transform_indices = @transform_18, window_bounds = array<i64: 3, 32, 16>}, {pipeline_mode = #tpu.pipeline_mode<synchronous>, transform_indices = @transform_19, window_bounds = array<i64: 1, 16>}, {pipeline_mode = #tpu.pipeline_mode<synchronous>, transform_indices = @transform_20, window_bounds = array<i64: 3, 32, 16>}, {pipeline_mode = #tpu.pipeline_mode<synchronous>, transform_indices = @transform_21, window_bounds = array<i64: 3, 32, 16>}, {pipeline_mode = #tpu.pipeline_mode<synchronous>, transform_indices = @transform_22, window_bounds = array<i64: 1, 16>}, {pipeline_mode = #tpu.pipeline_mode<synchronous>, transform_indices = @transform_23, window_bounds = array<i64: 3, 64, 32>}, {pipeline_mode = #tpu.pipeline_mode<synchronous>, transform_indices = @transform_24, window_bounds = array<i64: 3, 64, 28>}, {pipeline_mode = #tpu.pipeline_mode<synchronous>, transform_indices = @transform_25, window_bounds = array<i64: 3, 1, 16>}, {pipeline_mode = #tpu.pipeline_mode<synchronous>, transform_indices = @transform_26, window_bounds = array<i64: 3, 1, 16>}, {pipeline_mode = #tpu.pipeline_mode<synchronous>, transform_indices = @transform_27, window_bounds = array<i64: 1, 1>}, {pipeline_mode = #tpu.pipeline_mode<synchronous>, transform_indices = @transform_28, window_bounds = array<i64: 3, 1, 16>}, {pipeline_mode = #tpu.pipeline_mode<synchronous>, transform_indices = @transform_29, window_bounds = array<i64: 3, 1, 16>}, {pipeline_mode = #tpu.pipeline_mode<synchronous>, transform_indices = @transform_30, window_bounds = array<i64: 1, 1>}, {pipeline_mode = #tpu.pipeline_mode<synchronous>, transform_indices = @transform_31, window_bounds = array<i64: 64, 1>}, {pipeline_mode = #tpu.pipeline_mode<synchronous>, transform_indices = @transform_32, window_bounds = array<i64: 64, 1>}]} {
    %c0 = arith.constant 0 : index
    %c0_0 = arith.constant 0 : index
    %0 = vector.load %arg1[%c0, %c0_0] : memref<56x1xf32, #tpu.memory_space<vmem>>, vector<56x1xf32>
    %c0_1 = arith.constant 0 : index
    %c0_2 = arith.constant 0 : index
    %c0_3 = arith.constant 0 : index
    %1 = vector.load %arg3[%c0_1, %c0_2, %c0_3] : memref<3x1x16xbf16, #tpu.memory_space<vmem>>, vector<1x1x16xbf16>
    %2 = vector.shape_cast %1 : vector<1x1x16xbf16> to vector<1x16xbf16>
    %3 = arith.extf %2 : vector<1x16xbf16> to vector<1x16xf32>
    %4 = vector.broadcast %0 : vector<56x1xf32> to vector<56x16xf32>
    %5 = vector.broadcast %3 : vector<1x16xf32> to vector<56x16xf32>
    %6 = arith.mulf %4, %5 : vector<56x16xf32>
    %7 = arith.truncf %6 : vector<56x16xf32> to vector<56x16xbf16>
    %c0_4 = arith.constant 0 : index
    %c0_5 = arith.constant 0 : index
    %c0_6 = arith.constant 0 : index
    %8 = vector.load %arg2[%c0_4, %c0_5, %c0_6] : memref<3x28x56xbf16, #tpu.memory_space<vmem>>, vector<1x28x56xbf16>
    %9 = vector.shape_cast %8 : vector<1x28x56xbf16> to vector<28x56xbf16>
    %cst = arith.constant dense<0.000000e+00> : vector<28x16xf32>
    %10 = tpu.matmul %9, %7, %cst {dimension_numbers = #tpu.dot_dimension_numbers<[1], [0], [0], [1], [0, 0, 1, 1], [], []>} : vector<28x56xbf16>, vector<56x16xbf16>, vector<28x16xf32> -> vector<28x16xf32>
    %c1 = arith.constant 1 : index
    %c0_7 = arith.constant 0 : index
    %c0_8 = arith.constant 0 : index
    %11 = vector.load %arg3[%c1, %c0_7, %c0_8] : memref<3x1x16xbf16, #tpu.memory_space<vmem>>, vector<1x1x16xbf16>
    %12 = vector.shape_cast %11 : vector<1x1x16xbf16> to vector<1x16xbf16>
    %13 = arith.extf %12 : vector<1x16xbf16> to vector<1x16xf32>
    %14 = vector.broadcast %0 : vector<56x1xf32> to vector<56x16xf32>
    %15 = vector.broadcast %13 : vector<1x16xf32> to vector<56x16xf32>
    %16 = arith.mulf %14, %15 : vector<56x16xf32>
    %17 = arith.truncf %16 : vector<56x16xf32> to vector<56x16xbf16>
    %c1_9 = arith.constant 1 : index
    %c0_10 = arith.constant 0 : index
    %c0_11 = arith.constant 0 : index
    %18 = vector.load %arg2[%c1_9, %c0_10, %c0_11] : memref<3x28x56xbf16, #tpu.memory_space<vmem>>, vector<1x28x56xbf16>
    %19 = vector.shape_cast %18 : vector<1x28x56xbf16> to vector<28x56xbf16>
    %cst_12 = arith.constant dense<0.000000e+00> : vector<28x16xf32>
    %20 = tpu.matmul %19, %17, %cst_12 {dimension_numbers = #tpu.dot_dimension_numbers<[1], [0], [0], [1], [0, 0, 1, 1], [], []>} : vector<28x56xbf16>, vector<56x16xbf16>, vector<28x16xf32> -> vector<28x16xf32>
    %21 = arith.addf %10, %20 : vector<28x16xf32>
    %c2 = arith.constant 2 : index
    %c0_13 = arith.constant 0 : index
    %c0_14 = arith.constant 0 : index
    %22 = vector.load %arg3[%c2, %c0_13, %c0_14] : memref<3x1x16xbf16, #tpu.memory_space<vmem>>, vector<1x1x16xbf16>
    %23 = vector.shape_cast %22 : vector<1x1x16xbf16> to vector<1x16xbf16>
    %24 = arith.extf %23 : vector<1x16xbf16> to vector<1x16xf32>
    %25 = vector.broadcast %0 : vector<56x1xf32> to vector<56x16xf32>
    %26 = vector.broadcast %24 : vector<1x16xf32> to vector<56x16xf32>
    %27 = arith.mulf %25, %26 : vector<56x16xf32>
    %28 = arith.truncf %27 : vector<56x16xf32> to vector<56x16xbf16>
    %c2_15 = arith.constant 2 : index
    %c0_16 = arith.constant 0 : index
    %c0_17 = arith.constant 0 : index
    %29 = vector.load %arg2[%c2_15, %c0_16, %c0_17] : memref<3x28x56xbf16, #tpu.memory_space<vmem>>, vector<1x28x56xbf16>
    %30 = vector.shape_cast %29 : vector<1x28x56xbf16> to vector<28x56xbf16>
    %cst_18 = arith.constant dense<0.000000e+00> : vector<28x16xf32>
    %31 = tpu.matmul %30, %28, %cst_18 {dimension_numbers = #tpu.dot_dimension_numbers<[1], [0], [0], [1], [0, 0, 1, 1], [], []>} : vector<28x56xbf16>, vector<56x16xbf16>, vector<28x16xf32> -> vector<28x16xf32>
    %32 = arith.addf %21, %31 : vector<28x16xf32>
    %c0_19 = arith.constant 0 : index
    %c0_20 = arith.constant 0 : index
    %33 = vector.load %arg4[%c0_19, %c0_20] : memref<1x16xf32, #tpu.memory_space<vmem>>, vector<1x16xf32>
    %34 = vector.broadcast %33 : vector<1x16xf32> to vector<28x16xf32>
    %35 = arith.addf %32, %34 : vector<28x16xf32>
    %cst_21 = arith.constant 0.000000e+00 : f32
    %36 = vector.broadcast %cst_21 : f32 to vector<28x16xf32>
    %37 = arith.cmpf ogt, %35, %36 : vector<28x16xf32>
    %cst_22 = arith.constant 0.00999999977 : f32
    %38 = vector.broadcast %cst_22 : f32 to vector<28x16xf32>
    %39 = arith.mulf %38, %35 : vector<28x16xf32>
    %40 = arith.select %37, %35, %39 : vector<28x16xi1>, vector<28x16xf32>
    %41 = arith.truncf %40 : vector<28x16xf32> to vector<28x16xbf16>
    %c0_23 = arith.constant 0 : index
    %c0_24 = arith.constant 0 : index
    %c0_25 = arith.constant 0 : index
    %42 = vector.load %arg6[%c0_23, %c0_24, %c0_25] : memref<3x16x32xbf16, #tpu.memory_space<vmem>>, vector<1x16x32xbf16>
    %43 = vector.shape_cast %42 : vector<1x16x32xbf16> to vector<16x32xbf16>
    %cst_26 = arith.constant dense<0.000000e+00> : vector<28x32xf32>
    %44 = tpu.matmul %41, %43, %cst_26 {dimension_numbers = #tpu.dot_dimension_numbers<[1], [0], [0], [1], [0, 0, 1, 1], [], []>} : vector<28x16xbf16>, vector<16x32xbf16>, vector<28x32xf32> -> vector<28x32xf32>
    %45 = arith.truncf %44 : vector<28x32xf32> to vector<28x32xbf16>
    %c0_27 = arith.constant 0 : index
    %c0_28 = arith.constant 0 : index
    %c0_29 = arith.constant 0 : index
    %46 = vector.load %arg5[%c0_27, %c0_28, %c0_29] : memref<3x14x28xbf16, #tpu.memory_space<vmem>>, vector<1x14x28xbf16>
    %47 = vector.shape_cast %46 : vector<1x14x28xbf16> to vector<14x28xbf16>
    %cst_30 = arith.constant dense<0.000000e+00> : vector<14x32xf32>
    %48 = tpu.matmul %47, %45, %cst_30 {dimension_numbers = #tpu.dot_dimension_numbers<[1], [0], [0], [1], [0, 0, 1, 1], [], []>} : vector<14x28xbf16>, vector<28x32xbf16>, vector<14x32xf32> -> vector<14x32xf32>
    %c1_31 = arith.constant 1 : index
    %c0_32 = arith.constant 0 : index
    %c0_33 = arith.constant 0 : index
    %49 = vector.load %arg6[%c1_31, %c0_32, %c0_33] : memref<3x16x32xbf16, #tpu.memory_space<vmem>>, vector<1x16x32xbf16>
    %50 = vector.shape_cast %49 : vector<1x16x32xbf16> to vector<16x32xbf16>
    %cst_34 = arith.constant dense<0.000000e+00> : vector<28x32xf32>
    %51 = tpu.matmul %41, %50, %cst_34 {dimension_numbers = #tpu.dot_dimension_numbers<[1], [0], [0], [1], [0, 0, 1, 1], [], []>} : vector<28x16xbf16>, vector<16x32xbf16>, vector<28x32xf32> -> vector<28x32xf32>
    %52 = arith.truncf %51 : vector<28x32xf32> to vector<28x32xbf16>
    %c1_35 = arith.constant 1 : index
    %c0_36 = arith.constant 0 : index
    %c0_37 = arith.constant 0 : index
    %53 = vector.load %arg5[%c1_35, %c0_36, %c0_37] : memref<3x14x28xbf16, #tpu.memory_space<vmem>>, vector<1x14x28xbf16>
    %54 = vector.shape_cast %53 : vector<1x14x28xbf16> to vector<14x28xbf16>
    %cst_38 = arith.constant dense<0.000000e+00> : vector<14x32xf32>
    %55 = tpu.matmul %54, %52, %cst_38 {dimension_numbers = #tpu.dot_dimension_numbers<[1], [0], [0], [1], [0, 0, 1, 1], [], []>} : vector<14x28xbf16>, vector<28x32xbf16>, vector<14x32xf32> -> vector<14x32xf32>
    %56 = arith.addf %48, %55 : vector<14x32xf32>
    %c2_39 = arith.constant 2 : index
    %c0_40 = arith.constant 0 : index
    %c0_41 = arith.constant 0 : index
    %57 = vector.load %arg6[%c2_39, %c0_40, %c0_41] : memref<3x16x32xbf16, #tpu.memory_space<vmem>>, vector<1x16x32xbf16>
    %58 = vector.shape_cast %57 : vector<1x16x32xbf16> to vector<16x32xbf16>
    %cst_42 = arith.constant dense<0.000000e+00> : vector<28x32xf32>
    %59 = tpu.matmul %41, %58, %cst_42 {dimension_numbers = #tpu.dot_dimension_numbers<[1], [0], [0], [1], [0, 0, 1, 1], [], []>} : vector<28x16xbf16>, vector<16x32xbf16>, vector<28x32xf32> -> vector<28x32xf32>
    %60 = arith.truncf %59 : vector<28x32xf32> to vector<28x32xbf16>
    %c2_43 = arith.constant 2 : index
    %c0_44 = arith.constant 0 : index
    %c0_45 = arith.constant 0 : index
    %61 = vector.load %arg5[%c2_43, %c0_44, %c0_45] : memref<3x14x28xbf16, #tpu.memory_space<vmem>>, vector<1x14x28xbf16>
    %62 = vector.shape_cast %61 : vector<1x14x28xbf16> to vector<14x28xbf16>
    %cst_46 = arith.constant dense<0.000000e+00> : vector<14x32xf32>
    %63 = tpu.matmul %62, %60, %cst_46 {dimension_numbers = #tpu.dot_dimension_numbers<[1], [0], [0], [1], [0, 0, 1, 1], [], []>} : vector<14x28xbf16>, vector<28x32xbf16>, vector<14x32xf32> -> vector<14x32xf32>
    %64 = arith.addf %56, %63 : vector<14x32xf32>
    %c0_47 = arith.constant 0 : index
    %c0_48 = arith.constant 0 : index
    %65 = vector.load %arg7[%c0_47, %c0_48] : memref<1x32xf32, #tpu.memory_space<vmem>>, vector<1x32xf32>
    %66 = vector.broadcast %65 : vector<1x32xf32> to vector<14x32xf32>
    %67 = arith.addf %64, %66 : vector<14x32xf32>
    %cst_49 = arith.constant 0.000000e+00 : f32
    %68 = vector.broadcast %cst_49 : f32 to vector<14x32xf32>
    %69 = arith.cmpf ogt, %67, %68 : vector<14x32xf32>
    %cst_50 = arith.constant 0.00999999977 : f32
    %70 = vector.broadcast %cst_50 : f32 to vector<14x32xf32>
    %71 = arith.mulf %70, %67 : vector<14x32xf32>
    %72 = arith.select %69, %67, %71 : vector<14x32xi1>, vector<14x32xf32>
    %73 = arith.truncf %72 : vector<14x32xf32> to vector<14x32xbf16>
    %c0_51 = arith.constant 0 : index
    %c0_52 = arith.constant 0 : index
    %c0_53 = arith.constant 0 : index
    %74 = vector.load %arg9[%c0_51, %c0_52, %c0_53] : memref<3x32x16xbf16, #tpu.memory_space<vmem>>, vector<1x32x16xbf16>
    %75 = vector.shape_cast %74 : vector<1x32x16xbf16> to vector<32x16xbf16>
    %cst_54 = arith.constant dense<0.000000e+00> : vector<14x16xf32>
    %76 = tpu.matmul %73, %75, %cst_54 {dimension_numbers = #tpu.dot_dimension_numbers<[1], [0], [0], [1], [0, 0, 1, 1], [], []>} : vector<14x32xbf16>, vector<32x16xbf16>, vector<14x16xf32> -> vector<14x16xf32>
    %77 = arith.truncf %76 : vector<14x16xf32> to vector<14x16xbf16>
    %c0_55 = arith.constant 0 : index
    %c0_56 = arith.constant 0 : index
    %c0_57 = arith.constant 0 : index
    %78 = vector.load %arg8[%c0_55, %c0_56, %c0_57] : memref<3x8x14xbf16, #tpu.memory_space<vmem>>, vector<1x8x14xbf16>
    %79 = vector.shape_cast %78 : vector<1x8x14xbf16> to vector<8x14xbf16>
    %cst_58 = arith.constant dense<0.000000e+00> : vector<8x16xf32>
    %80 = tpu.matmul %79, %77, %cst_58 {dimension_numbers = #tpu.dot_dimension_numbers<[1], [0], [0], [1], [0, 0, 1, 1], [], []>} : vector<8x14xbf16>, vector<14x16xbf16>, vector<8x16xf32> -> vector<8x16xf32>
    %c1_59 = arith.constant 1 : index
    %c0_60 = arith.constant 0 : index
    %c0_61 = arith.constant 0 : index
    %81 = vector.load %arg9[%c1_59, %c0_60, %c0_61] : memref<3x32x16xbf16, #tpu.memory_space<vmem>>, vector<1x32x16xbf16>
    %82 = vector.shape_cast %81 : vector<1x32x16xbf16> to vector<32x16xbf16>
    %cst_62 = arith.constant dense<0.000000e+00> : vector<14x16xf32>
    %83 = tpu.matmul %73, %82, %cst_62 {dimension_numbers = #tpu.dot_dimension_numbers<[1], [0], [0], [1], [0, 0, 1, 1], [], []>} : vector<14x32xbf16>, vector<32x16xbf16>, vector<14x16xf32> -> vector<14x16xf32>
    %84 = arith.truncf %83 : vector<14x16xf32> to vector<14x16xbf16>
    %c1_63 = arith.constant 1 : index
    %c0_64 = arith.constant 0 : index
    %c0_65 = arith.constant 0 : index
    %85 = vector.load %arg8[%c1_63, %c0_64, %c0_65] : memref<3x8x14xbf16, #tpu.memory_space<vmem>>, vector<1x8x14xbf16>
    %86 = vector.shape_cast %85 : vector<1x8x14xbf16> to vector<8x14xbf16>
    %cst_66 = arith.constant dense<0.000000e+00> : vector<8x16xf32>
    %87 = tpu.matmul %86, %84, %cst_66 {dimension_numbers = #tpu.dot_dimension_numbers<[1], [0], [0], [1], [0, 0, 1, 1], [], []>} : vector<8x14xbf16>, vector<14x16xbf16>, vector<8x16xf32> -> vector<8x16xf32>
    %88 = arith.addf %80, %87 : vector<8x16xf32>
    %c2_67 = arith.constant 2 : index
    %c0_68 = arith.constant 0 : index
    %c0_69 = arith.constant 0 : index
    %89 = vector.load %arg9[%c2_67, %c0_68, %c0_69] : memref<3x32x16xbf16, #tpu.memory_space<vmem>>, vector<1x32x16xbf16>
    %90 = vector.shape_cast %89 : vector<1x32x16xbf16> to vector<32x16xbf16>
    %cst_70 = arith.constant dense<0.000000e+00> : vector<14x16xf32>
    %91 = tpu.matmul %73, %90, %cst_70 {dimension_numbers = #tpu.dot_dimension_numbers<[1], [0], [0], [1], [0, 0, 1, 1], [], []>} : vector<14x32xbf16>, vector<32x16xbf16>, vector<14x16xf32> -> vector<14x16xf32>
    %92 = arith.truncf %91 : vector<14x16xf32> to vector<14x16xbf16>
    %c2_71 = arith.constant 2 : index
    %c0_72 = arith.constant 0 : index
    %c0_73 = arith.constant 0 : index
    %93 = vector.load %arg8[%c2_71, %c0_72, %c0_73] : memref<3x8x14xbf16, #tpu.memory_space<vmem>>, vector<1x8x14xbf16>
    %94 = vector.shape_cast %93 : vector<1x8x14xbf16> to vector<8x14xbf16>
    %cst_74 = arith.constant dense<0.000000e+00> : vector<8x16xf32>
    %95 = tpu.matmul %94, %92, %cst_74 {dimension_numbers = #tpu.dot_dimension_numbers<[1], [0], [0], [1], [0, 0, 1, 1], [], []>} : vector<8x14xbf16>, vector<14x16xbf16>, vector<8x16xf32> -> vector<8x16xf32>
    %96 = arith.addf %88, %95 : vector<8x16xf32>
    %c0_75 = arith.constant 0 : index
    %c0_76 = arith.constant 0 : index
    %97 = vector.load %arg10[%c0_75, %c0_76] : memref<1x16xf32, #tpu.memory_space<vmem>>, vector<1x16xf32>
    %98 = vector.broadcast %97 : vector<1x16xf32> to vector<8x16xf32>
    %99 = arith.addf %96, %98 : vector<8x16xf32>
    %cst_77 = arith.constant 0.000000e+00 : f32
    %100 = vector.broadcast %cst_77 : f32 to vector<8x16xf32>
    %101 = arith.cmpf ogt, %99, %100 : vector<8x16xf32>
    %cst_78 = arith.constant 0.00999999977 : f32
    %102 = vector.broadcast %cst_78 : f32 to vector<8x16xf32>
    %103 = arith.mulf %102, %99 : vector<8x16xf32>
    %104 = arith.select %101, %99, %103 : vector<8x16xi1>, vector<8x16xf32>
    %105 = arith.truncf %104 : vector<8x16xf32> to vector<8x16xbf16>
    %c0_79 = arith.constant 0 : index
    %c0_80 = arith.constant 0 : index
    %c0_81 = arith.constant 0 : index
    %106 = vector.load %arg12[%c0_79, %c0_80, %c0_81] : memref<3x16x32xbf16, #tpu.memory_space<vmem>>, vector<1x16x32xbf16>
    %107 = vector.shape_cast %106 : vector<1x16x32xbf16> to vector<16x32xbf16>
    %cst_82 = arith.constant dense<0.000000e+00> : vector<8x32xf32>
    %108 = tpu.matmul %105, %107, %cst_82 {dimension_numbers = #tpu.dot_dimension_numbers<[1], [0], [0], [1], [0, 0, 1, 1], [], []>} : vector<8x16xbf16>, vector<16x32xbf16>, vector<8x32xf32> -> vector<8x32xf32>
    %109 = arith.truncf %108 : vector<8x32xf32> to vector<8x32xbf16>
    %c0_83 = arith.constant 0 : index
    %c0_84 = arith.constant 0 : index
    %c0_85 = arith.constant 0 : index
    %110 = vector.load %arg11[%c0_83, %c0_84, %c0_85] : memref<3x16x8xbf16, #tpu.memory_space<vmem>>, vector<1x16x8xbf16>
    %111 = vector.shape_cast %110 : vector<1x16x8xbf16> to vector<16x8xbf16>
    %cst_86 = arith.constant dense<0.000000e+00> : vector<16x32xf32>
    %112 = tpu.matmul %111, %109, %cst_86 {dimension_numbers = #tpu.dot_dimension_numbers<[1], [0], [0], [1], [0, 0, 1, 1], [], []>} : vector<16x8xbf16>, vector<8x32xbf16>, vector<16x32xf32> -> vector<16x32xf32>
    %c1_87 = arith.constant 1 : index
    %c0_88 = arith.constant 0 : index
    %c0_89 = arith.constant 0 : index
    %113 = vector.load %arg12[%c1_87, %c0_88, %c0_89] : memref<3x16x32xbf16, #tpu.memory_space<vmem>>, vector<1x16x32xbf16>
    %114 = vector.shape_cast %113 : vector<1x16x32xbf16> to vector<16x32xbf16>
    %cst_90 = arith.constant dense<0.000000e+00> : vector<8x32xf32>
    %115 = tpu.matmul %105, %114, %cst_90 {dimension_numbers = #tpu.dot_dimension_numbers<[1], [0], [0], [1], [0, 0, 1, 1], [], []>} : vector<8x16xbf16>, vector<16x32xbf16>, vector<8x32xf32> -> vector<8x32xf32>
    %116 = arith.truncf %115 : vector<8x32xf32> to vector<8x32xbf16>
    %c1_91 = arith.constant 1 : index
    %c0_92 = arith.constant 0 : index
    %c0_93 = arith.constant 0 : index
    %117 = vector.load %arg11[%c1_91, %c0_92, %c0_93] : memref<3x16x8xbf16, #tpu.memory_space<vmem>>, vector<1x16x8xbf16>
    %118 = vector.shape_cast %117 : vector<1x16x8xbf16> to vector<16x8xbf16>
    %cst_94 = arith.constant dense<0.000000e+00> : vector<16x32xf32>
    %119 = tpu.matmul %118, %116, %cst_94 {dimension_numbers = #tpu.dot_dimension_numbers<[1], [0], [0], [1], [0, 0, 1, 1], [], []>} : vector<16x8xbf16>, vector<8x32xbf16>, vector<16x32xf32> -> vector<16x32xf32>
    %120 = arith.addf %112, %119 : vector<16x32xf32>
    %c2_95 = arith.constant 2 : index
    %c0_96 = arith.constant 0 : index
    %c0_97 = arith.constant 0 : index
    %121 = vector.load %arg12[%c2_95, %c0_96, %c0_97] : memref<3x16x32xbf16, #tpu.memory_space<vmem>>, vector<1x16x32xbf16>
    %122 = vector.shape_cast %121 : vector<1x16x32xbf16> to vector<16x32xbf16>
    %cst_98 = arith.constant dense<0.000000e+00> : vector<8x32xf32>
    %123 = tpu.matmul %105, %122, %cst_98 {dimension_numbers = #tpu.dot_dimension_numbers<[1], [0], [0], [1], [0, 0, 1, 1], [], []>} : vector<8x16xbf16>, vector<16x32xbf16>, vector<8x32xf32> -> vector<8x32xf32>
    %124 = arith.truncf %123 : vector<8x32xf32> to vector<8x32xbf16>
    %c2_99 = arith.constant 2 : index
    %c0_100 = arith.constant 0 : index
    %c0_101 = arith.constant 0 : index
    %125 = vector.load %arg11[%c2_99, %c0_100, %c0_101] : memref<3x16x8xbf16, #tpu.memory_space<vmem>>, vector<1x16x8xbf16>
    %126 = vector.shape_cast %125 : vector<1x16x8xbf16> to vector<16x8xbf16>
    %cst_102 = arith.constant dense<0.000000e+00> : vector<16x32xf32>
    %127 = tpu.matmul %126, %124, %cst_102 {dimension_numbers = #tpu.dot_dimension_numbers<[1], [0], [0], [1], [0, 0, 1, 1], [], []>} : vector<16x8xbf16>, vector<8x32xbf16>, vector<16x32xf32> -> vector<16x32xf32>
    %128 = arith.addf %120, %127 : vector<16x32xf32>
    %c0_103 = arith.constant 0 : index
    %c0_104 = arith.constant 0 : index
    %129 = vector.load %arg13[%c0_103, %c0_104] : memref<1x32xf32, #tpu.memory_space<vmem>>, vector<1x32xf32>
    %130 = vector.broadcast %129 : vector<1x32xf32> to vector<16x32xf32>
    %131 = arith.addf %128, %130 : vector<16x32xf32>
    %cst_105 = arith.constant 0.000000e+00 : f32
    %132 = vector.broadcast %cst_105 : f32 to vector<16x32xf32>
    %133 = arith.cmpf ogt, %131, %132 : vector<16x32xf32>
    %cst_106 = arith.constant 0.00999999977 : f32
    %134 = vector.broadcast %cst_106 : f32 to vector<16x32xf32>
    %135 = arith.mulf %134, %131 : vector<16x32xf32>
    %136 = arith.select %133, %131, %135 : vector<16x32xi1>, vector<16x32xf32>
    %137 = arith.truncf %136 : vector<16x32xf32> to vector<16x32xbf16>
    %c0_107 = arith.constant 0 : index
    %c0_108 = arith.constant 0 : index
    %c0_109 = arith.constant 0 : index
    %138 = vector.load %arg18[%c0_107, %c0_108, %c0_109] : memref<3x32x16xbf16, #tpu.memory_space<vmem>>, vector<1x32x16xbf16>
    %139 = vector.shape_cast %138 : vector<1x32x16xbf16> to vector<32x16xbf16>
    %cst_110 = arith.constant dense<0.000000e+00> : vector<16x16xf32>
    %140 = tpu.matmul %137, %139, %cst_110 {dimension_numbers = #tpu.dot_dimension_numbers<[1], [0], [0], [1], [0, 0, 1, 1], [], []>} : vector<16x32xbf16>, vector<32x16xbf16>, vector<16x16xf32> -> vector<16x16xf32>
    %141 = arith.truncf %140 : vector<16x16xf32> to vector<16x16xbf16>
    %c0_111 = arith.constant 0 : index
    %c0_112 = arith.constant 0 : index
    %c0_113 = arith.constant 0 : index
    %142 = vector.load %arg16[%c0_111, %c0_112, %c0_113] : memref<3x32x16xbf16, #tpu.memory_space<vmem>>, vector<1x32x16xbf16>
    %143 = vector.shape_cast %142 : vector<1x32x16xbf16> to vector<32x16xbf16>
    %cst_114 = arith.constant dense<0.000000e+00> : vector<32x16xf32>
    %144 = tpu.matmul %143, %141, %cst_114 {dimension_numbers = #tpu.dot_dimension_numbers<[1], [0], [0], [1], [0, 0, 1, 1], [], []>} : vector<32x16xbf16>, vector<16x16xbf16>, vector<32x16xf32> -> vector<32x16xf32>
    %c1_115 = arith.constant 1 : index
    %c0_116 = arith.constant 0 : index
    %c0_117 = arith.constant 0 : index
    %145 = vector.load %arg18[%c1_115, %c0_116, %c0_117] : memref<3x32x16xbf16, #tpu.memory_space<vmem>>, vector<1x32x16xbf16>
    %146 = vector.shape_cast %145 : vector<1x32x16xbf16> to vector<32x16xbf16>
    %cst_118 = arith.constant dense<0.000000e+00> : vector<16x16xf32>
    %147 = tpu.matmul %137, %146, %cst_118 {dimension_numbers = #tpu.dot_dimension_numbers<[1], [0], [0], [1], [0, 0, 1, 1], [], []>} : vector<16x32xbf16>, vector<32x16xbf16>, vector<16x16xf32> -> vector<16x16xf32>
    %148 = arith.truncf %147 : vector<16x16xf32> to vector<16x16xbf16>
    %c1_119 = arith.constant 1 : index
    %c0_120 = arith.constant 0 : index
    %c0_121 = arith.constant 0 : index
    %149 = vector.load %arg16[%c1_119, %c0_120, %c0_121] : memref<3x32x16xbf16, #tpu.memory_space<vmem>>, vector<1x32x16xbf16>
    %150 = vector.shape_cast %149 : vector<1x32x16xbf16> to vector<32x16xbf16>
    %cst_122 = arith.constant dense<0.000000e+00> : vector<32x16xf32>
    %151 = tpu.matmul %150, %148, %cst_122 {dimension_numbers = #tpu.dot_dimension_numbers<[1], [0], [0], [1], [0, 0, 1, 1], [], []>} : vector<32x16xbf16>, vector<16x16xbf16>, vector<32x16xf32> -> vector<32x16xf32>
    %152 = arith.addf %144, %151 : vector<32x16xf32>
    %c2_123 = arith.constant 2 : index
    %c0_124 = arith.constant 0 : index
    %c0_125 = arith.constant 0 : index
    %153 = vector.load %arg18[%c2_123, %c0_124, %c0_125] : memref<3x32x16xbf16, #tpu.memory_space<vmem>>, vector<1x32x16xbf16>
    %154 = vector.shape_cast %153 : vector<1x32x16xbf16> to vector<32x16xbf16>
    %cst_126 = arith.constant dense<0.000000e+00> : vector<16x16xf32>
    %155 = tpu.matmul %137, %154, %cst_126 {dimension_numbers = #tpu.dot_dimension_numbers<[1], [0], [0], [1], [0, 0, 1, 1], [], []>} : vector<16x32xbf16>, vector<32x16xbf16>, vector<16x16xf32> -> vector<16x16xf32>
    %156 = arith.truncf %155 : vector<16x16xf32> to vector<16x16xbf16>
    %c2_127 = arith.constant 2 : index
    %c0_128 = arith.constant 0 : index
    %c0_129 = arith.constant 0 : index
    %157 = vector.load %arg16[%c2_127, %c0_128, %c0_129] : memref<3x32x16xbf16, #tpu.memory_space<vmem>>, vector<1x32x16xbf16>
    %158 = vector.shape_cast %157 : vector<1x32x16xbf16> to vector<32x16xbf16>
    %cst_130 = arith.constant dense<0.000000e+00> : vector<32x16xf32>
    %159 = tpu.matmul %158, %156, %cst_130 {dimension_numbers = #tpu.dot_dimension_numbers<[1], [0], [0], [1], [0, 0, 1, 1], [], []>} : vector<32x16xbf16>, vector<16x16xbf16>, vector<32x16xf32> -> vector<32x16xf32>
    %160 = arith.addf %152, %159 : vector<32x16xf32>
    %161 = arith.truncf %72 : vector<14x32xf32> to vector<14x32xbf16>
    %c0_131 = arith.constant 0 : index
    %c0_132 = arith.constant 0 : index
    %c0_133 = arith.constant 0 : index
    %162 = vector.load %arg19[%c0_131, %c0_132, %c0_133] : memref<3x32x16xbf16, #tpu.memory_space<vmem>>, vector<1x32x16xbf16>
    %163 = vector.shape_cast %162 : vector<1x32x16xbf16> to vector<32x16xbf16>
    %cst_134 = arith.constant dense<0.000000e+00> : vector<14x16xf32>
    %164 = tpu.matmul %161, %163, %cst_134 {dimension_numbers = #tpu.dot_dimension_numbers<[1], [0], [0], [1], [0, 0, 1, 1], [], []>} : vector<14x32xbf16>, vector<32x16xbf16>, vector<14x16xf32> -> vector<14x16xf32>
    %165 = arith.truncf %164 : vector<14x16xf32> to vector<14x16xbf16>
    %c0_135 = arith.constant 0 : index
    %c0_136 = arith.constant 0 : index
    %c0_137 = arith.constant 0 : index
    %166 = vector.load %arg17[%c0_135, %c0_136, %c0_137] : memref<3x32x14xbf16, #tpu.memory_space<vmem>>, vector<1x32x14xbf16>
    %167 = vector.shape_cast %166 : vector<1x32x14xbf16> to vector<32x14xbf16>
    %cst_138 = arith.constant dense<0.000000e+00> : vector<32x16xf32>
    %168 = tpu.matmul %167, %165, %cst_138 {dimension_numbers = #tpu.dot_dimension_numbers<[1], [0], [0], [1], [0, 0, 1, 1], [], []>} : vector<32x14xbf16>, vector<14x16xbf16>, vector<32x16xf32> -> vector<32x16xf32>
    %c1_139 = arith.constant 1 : index
    %c0_140 = arith.constant 0 : index
    %c0_141 = arith.constant 0 : index
    %169 = vector.load %arg19[%c1_139, %c0_140, %c0_141] : memref<3x32x16xbf16, #tpu.memory_space<vmem>>, vector<1x32x16xbf16>
    %170 = vector.shape_cast %169 : vector<1x32x16xbf16> to vector<32x16xbf16>
    %cst_142 = arith.constant dense<0.000000e+00> : vector<14x16xf32>
    %171 = tpu.matmul %161, %170, %cst_142 {dimension_numbers = #tpu.dot_dimension_numbers<[1], [0], [0], [1], [0, 0, 1, 1], [], []>} : vector<14x32xbf16>, vector<32x16xbf16>, vector<14x16xf32> -> vector<14x16xf32>
    %172 = arith.truncf %171 : vector<14x16xf32> to vector<14x16xbf16>
    %c1_143 = arith.constant 1 : index
    %c0_144 = arith.constant 0 : index
    %c0_145 = arith.constant 0 : index
    %173 = vector.load %arg17[%c1_143, %c0_144, %c0_145] : memref<3x32x14xbf16, #tpu.memory_space<vmem>>, vector<1x32x14xbf16>
    %174 = vector.shape_cast %173 : vector<1x32x14xbf16> to vector<32x14xbf16>
    %cst_146 = arith.constant dense<0.000000e+00> : vector<32x16xf32>
    %175 = tpu.matmul %174, %172, %cst_146 {dimension_numbers = #tpu.dot_dimension_numbers<[1], [0], [0], [1], [0, 0, 1, 1], [], []>} : vector<32x14xbf16>, vector<14x16xbf16>, vector<32x16xf32> -> vector<32x16xf32>
    %176 = arith.addf %168, %175 : vector<32x16xf32>
    %c2_147 = arith.constant 2 : index
    %c0_148 = arith.constant 0 : index
    %c0_149 = arith.constant 0 : index
    %177 = vector.load %arg19[%c2_147, %c0_148, %c0_149] : memref<3x32x16xbf16, #tpu.memory_space<vmem>>, vector<1x32x16xbf16>
    %178 = vector.shape_cast %177 : vector<1x32x16xbf16> to vector<32x16xbf16>
    %cst_150 = arith.constant dense<0.000000e+00> : vector<14x16xf32>
    %179 = tpu.matmul %161, %178, %cst_150 {dimension_numbers = #tpu.dot_dimension_numbers<[1], [0], [0], [1], [0, 0, 1, 1], [], []>} : vector<14x32xbf16>, vector<32x16xbf16>, vector<14x16xf32> -> vector<14x16xf32>
    %180 = arith.truncf %179 : vector<14x16xf32> to vector<14x16xbf16>
    %c2_151 = arith.constant 2 : index
    %c0_152 = arith.constant 0 : index
    %c0_153 = arith.constant 0 : index
    %181 = vector.load %arg17[%c2_151, %c0_152, %c0_153] : memref<3x32x14xbf16, #tpu.memory_space<vmem>>, vector<1x32x14xbf16>
    %182 = vector.shape_cast %181 : vector<1x32x14xbf16> to vector<32x14xbf16>
    %cst_154 = arith.constant dense<0.000000e+00> : vector<32x16xf32>
    %183 = tpu.matmul %182, %180, %cst_154 {dimension_numbers = #tpu.dot_dimension_numbers<[1], [0], [0], [1], [0, 0, 1, 1], [], []>} : vector<32x14xbf16>, vector<14x16xbf16>, vector<32x16xf32> -> vector<32x16xf32>
    %184 = arith.addf %176, %183 : vector<32x16xf32>
    %185 = arith.addf %160, %184 : vector<32x16xf32>
    %c0_155 = arith.constant 0 : index
    %c0_156 = arith.constant 0 : index
    %186 = vector.load %arg20[%c0_155, %c0_156] : memref<1x16xf32, #tpu.memory_space<vmem>>, vector<1x16xf32>
    %187 = vector.broadcast %186 : vector<1x16xf32> to vector<32x16xf32>
    %188 = arith.addf %185, %187 : vector<32x16xf32>
    %cst_157 = arith.constant 0.000000e+00 : f32
    %189 = vector.broadcast %cst_157 : f32 to vector<32x16xf32>
    %190 = arith.cmpf ogt, %188, %189 : vector<32x16xf32>
    %cst_158 = arith.constant 0.00999999977 : f32
    %191 = vector.broadcast %cst_158 : f32 to vector<32x16xf32>
    %192 = arith.mulf %191, %188 : vector<32x16xf32>
    %193 = arith.select %190, %188, %192 : vector<32x16xi1>, vector<32x16xf32>
    %194 = arith.truncf %193 : vector<32x16xf32> to vector<32x16xbf16>
    %c0_159 = arith.constant 0 : index
    %c0_160 = arith.constant 0 : index
    %c0_161 = arith.constant 0 : index
    %195 = vector.load %arg24[%c0_159, %c0_160, %c0_161] : memref<3x64x32xbf16, #tpu.memory_space<vmem>>, vector<1x64x32xbf16>
    %196 = vector.shape_cast %195 : vector<1x64x32xbf16> to vector<64x32xbf16>
    %cst_162 = arith.constant dense<0.000000e+00> : vector<64x16xf32>
    %197 = tpu.matmul %196, %194, %cst_162 {dimension_numbers = #tpu.dot_dimension_numbers<[1], [0], [0], [1], [0, 0, 1, 1], [], []>} : vector<64x32xbf16>, vector<32x16xbf16>, vector<64x16xf32> -> vector<64x16xf32>
    %c0_163 = arith.constant 0 : index
    %c0_164 = arith.constant 0 : index
    %c0_165 = arith.constant 0 : index
    %198 = vector.load %arg26[%c0_163, %c0_164, %c0_165] : memref<3x1x16xbf16, #tpu.memory_space<vmem>>, vector<1x1x16xbf16>
    %199 = vector.shape_cast %198 : vector<1x1x16xbf16> to vector<1x16xbf16>
    %200 = arith.extf %199 : vector<1x16xbf16> to vector<1x16xf32>
    %201 = vector.broadcast %200 : vector<1x16xf32> to vector<64x16xf32>
    %202 = arith.mulf %197, %201 : vector<64x16xf32>
    %cst_166 = arith.constant dense<0.000000e+00> : vector<64xf32>
    %203 = vector.multi_reduction <add>, %202, %cst_166 [1] : vector<64x16xf32> to vector<64xf32>
    %204 = vector.shape_cast %203 : vector<64xf32> to vector<64x1xf32>
    %c1_167 = arith.constant 1 : index
    %c0_168 = arith.constant 0 : index
    %c0_169 = arith.constant 0 : index
    %205 = vector.load %arg24[%c1_167, %c0_168, %c0_169] : memref<3x64x32xbf16, #tpu.memory_space<vmem>>, vector<1x64x32xbf16>
    %206 = vector.shape_cast %205 : vector<1x64x32xbf16> to vector<64x32xbf16>
    %cst_170 = arith.constant dense<0.000000e+00> : vector<64x16xf32>
    %207 = tpu.matmul %206, %194, %cst_170 {dimension_numbers = #tpu.dot_dimension_numbers<[1], [0], [0], [1], [0, 0, 1, 1], [], []>} : vector<64x32xbf16>, vector<32x16xbf16>, vector<64x16xf32> -> vector<64x16xf32>
    %c1_171 = arith.constant 1 : index
    %c0_172 = arith.constant 0 : index
    %c0_173 = arith.constant 0 : index
    %208 = vector.load %arg26[%c1_171, %c0_172, %c0_173] : memref<3x1x16xbf16, #tpu.memory_space<vmem>>, vector<1x1x16xbf16>
    %209 = vector.shape_cast %208 : vector<1x1x16xbf16> to vector<1x16xbf16>
    %210 = arith.extf %209 : vector<1x16xbf16> to vector<1x16xf32>
    %211 = vector.broadcast %210 : vector<1x16xf32> to vector<64x16xf32>
    %212 = arith.mulf %207, %211 : vector<64x16xf32>
    %cst_174 = arith.constant dense<0.000000e+00> : vector<64xf32>
    %213 = vector.multi_reduction <add>, %212, %cst_174 [1] : vector<64x16xf32> to vector<64xf32>
    %214 = vector.shape_cast %213 : vector<64xf32> to vector<64x1xf32>
    %215 = arith.addf %204, %214 : vector<64x1xf32>
    %c2_175 = arith.constant 2 : index
    %c0_176 = arith.constant 0 : index
    %c0_177 = arith.constant 0 : index
    %216 = vector.load %arg24[%c2_175, %c0_176, %c0_177] : memref<3x64x32xbf16, #tpu.memory_space<vmem>>, vector<1x64x32xbf16>
    %217 = vector.shape_cast %216 : vector<1x64x32xbf16> to vector<64x32xbf16>
    %cst_178 = arith.constant dense<0.000000e+00> : vector<64x16xf32>
    %218 = tpu.matmul %217, %194, %cst_178 {dimension_numbers = #tpu.dot_dimension_numbers<[1], [0], [0], [1], [0, 0, 1, 1], [], []>} : vector<64x32xbf16>, vector<32x16xbf16>, vector<64x16xf32> -> vector<64x16xf32>
    %c2_179 = arith.constant 2 : index
    %c0_180 = arith.constant 0 : index
    %c0_181 = arith.constant 0 : index
    %219 = vector.load %arg26[%c2_179, %c0_180, %c0_181] : memref<3x1x16xbf16, #tpu.memory_space<vmem>>, vector<1x1x16xbf16>
    %220 = vector.shape_cast %219 : vector<1x1x16xbf16> to vector<1x16xbf16>
    %221 = arith.extf %220 : vector<1x16xbf16> to vector<1x16xf32>
    %222 = vector.broadcast %221 : vector<1x16xf32> to vector<64x16xf32>
    %223 = arith.mulf %218, %222 : vector<64x16xf32>
    %cst_182 = arith.constant dense<0.000000e+00> : vector<64xf32>
    %224 = vector.multi_reduction <add>, %223, %cst_182 [1] : vector<64x16xf32> to vector<64xf32>
    %225 = vector.shape_cast %224 : vector<64xf32> to vector<64x1xf32>
    %226 = arith.addf %215, %225 : vector<64x1xf32>
    %227 = arith.truncf %40 : vector<28x16xf32> to vector<28x16xbf16>
    %c0_183 = arith.constant 0 : index
    %c0_184 = arith.constant 0 : index
    %c0_185 = arith.constant 0 : index
    %228 = vector.load %arg25[%c0_183, %c0_184, %c0_185] : memref<3x64x28xbf16, #tpu.memory_space<vmem>>, vector<1x64x28xbf16>
    %229 = vector.shape_cast %228 : vector<1x64x28xbf16> to vector<64x28xbf16>
    %cst_186 = arith.constant dense<0.000000e+00> : vector<64x16xf32>
    %230 = tpu.matmul %229, %227, %cst_186 {dimension_numbers = #tpu.dot_dimension_numbers<[1], [0], [0], [1], [0, 0, 1, 1], [], []>} : vector<64x28xbf16>, vector<28x16xbf16>, vector<64x16xf32> -> vector<64x16xf32>
    %c0_187 = arith.constant 0 : index
    %c0_188 = arith.constant 0 : index
    %c0_189 = arith.constant 0 : index
    %231 = vector.load %arg27[%c0_187, %c0_188, %c0_189] : memref<3x1x16xbf16, #tpu.memory_space<vmem>>, vector<1x1x16xbf16>
    %232 = vector.shape_cast %231 : vector<1x1x16xbf16> to vector<1x16xbf16>
    %233 = arith.extf %232 : vector<1x16xbf16> to vector<1x16xf32>
    %234 = vector.broadcast %233 : vector<1x16xf32> to vector<64x16xf32>
    %235 = arith.mulf %230, %234 : vector<64x16xf32>
    %cst_190 = arith.constant dense<0.000000e+00> : vector<64xf32>
    %236 = vector.multi_reduction <add>, %235, %cst_190 [1] : vector<64x16xf32> to vector<64xf32>
    %237 = vector.shape_cast %236 : vector<64xf32> to vector<64x1xf32>
    %c1_191 = arith.constant 1 : index
    %c0_192 = arith.constant 0 : index
    %c0_193 = arith.constant 0 : index
    %238 = vector.load %arg25[%c1_191, %c0_192, %c0_193] : memref<3x64x28xbf16, #tpu.memory_space<vmem>>, vector<1x64x28xbf16>
    %239 = vector.shape_cast %238 : vector<1x64x28xbf16> to vector<64x28xbf16>
    %cst_194 = arith.constant dense<0.000000e+00> : vector<64x16xf32>
    %240 = tpu.matmul %239, %227, %cst_194 {dimension_numbers = #tpu.dot_dimension_numbers<[1], [0], [0], [1], [0, 0, 1, 1], [], []>} : vector<64x28xbf16>, vector<28x16xbf16>, vector<64x16xf32> -> vector<64x16xf32>
    %c1_195 = arith.constant 1 : index
    %c0_196 = arith.constant 0 : index
    %c0_197 = arith.constant 0 : index
    %241 = vector.load %arg27[%c1_195, %c0_196, %c0_197] : memref<3x1x16xbf16, #tpu.memory_space<vmem>>, vector<1x1x16xbf16>
    %242 = vector.shape_cast %241 : vector<1x1x16xbf16> to vector<1x16xbf16>
    %243 = arith.extf %242 : vector<1x16xbf16> to vector<1x16xf32>
    %244 = vector.broadcast %243 : vector<1x16xf32> to vector<64x16xf32>
    %245 = arith.mulf %240, %244 : vector<64x16xf32>
    %cst_198 = arith.constant dense<0.000000e+00> : vector<64xf32>
    %246 = vector.multi_reduction <add>, %245, %cst_198 [1] : vector<64x16xf32> to vector<64xf32>
    %247 = vector.shape_cast %246 : vector<64xf32> to vector<64x1xf32>
    %248 = arith.addf %237, %247 : vector<64x1xf32>
    %c2_199 = arith.constant 2 : index
    %c0_200 = arith.constant 0 : index
    %c0_201 = arith.constant 0 : index
    %249 = vector.load %arg25[%c2_199, %c0_200, %c0_201] : memref<3x64x28xbf16, #tpu.memory_space<vmem>>, vector<1x64x28xbf16>
    %250 = vector.shape_cast %249 : vector<1x64x28xbf16> to vector<64x28xbf16>
    %cst_202 = arith.constant dense<0.000000e+00> : vector<64x16xf32>
    %251 = tpu.matmul %250, %227, %cst_202 {dimension_numbers = #tpu.dot_dimension_numbers<[1], [0], [0], [1], [0, 0, 1, 1], [], []>} : vector<64x28xbf16>, vector<28x16xbf16>, vector<64x16xf32> -> vector<64x16xf32>
    %c2_203 = arith.constant 2 : index
    %c0_204 = arith.constant 0 : index
    %c0_205 = arith.constant 0 : index
    %252 = vector.load %arg27[%c2_203, %c0_204, %c0_205] : memref<3x1x16xbf16, #tpu.memory_space<vmem>>, vector<1x1x16xbf16>
    %253 = vector.shape_cast %252 : vector<1x1x16xbf16> to vector<1x16xbf16>
    %254 = arith.extf %253 : vector<1x16xbf16> to vector<1x16xf32>
    %255 = vector.broadcast %254 : vector<1x16xf32> to vector<64x16xf32>
    %256 = arith.mulf %251, %255 : vector<64x16xf32>
    %cst_206 = arith.constant dense<0.000000e+00> : vector<64xf32>
    %257 = vector.multi_reduction <add>, %256, %cst_206 [1] : vector<64x16xf32> to vector<64xf32>
    %258 = vector.shape_cast %257 : vector<64xf32> to vector<64x1xf32>
    %259 = arith.addf %248, %258 : vector<64x1xf32>
    %260 = arith.addf %226, %259 : vector<64x1xf32>
    %c0_207 = arith.constant 0 : index
    %c0_208 = arith.constant 0 : index
    %261 = vector.load %arg28[%c0_207, %c0_208] : memref<1x1xf32, #tpu.memory_space<vmem>>, vector<1x1xf32>
    %262 = vector.broadcast %261 : vector<1x1xf32> to vector<64x1xf32>
    %263 = arith.addf %260, %262 : vector<64x1xf32>
    %cst_209 = arith.constant 0.000000e+00 : f32
    %264 = vector.broadcast %cst_209 : f32 to vector<64x1xf32>
    %265 = arith.subf %264, %263 : vector<64x1xf32>
    %266 = math.exp %265 : vector<64x1xf32>
    %cst_210 = arith.constant 1.000000e+00 : f32
    %267 = vector.broadcast %cst_210 : f32 to vector<64x1xf32>
    %268 = arith.addf %267, %266 : vector<64x1xf32>
    %cst_211 = arith.constant 1.000000e+00 : f32
    %269 = vector.broadcast %cst_211 : f32 to vector<64x1xf32>
    %270 = arith.divf %269, %268 : vector<64x1xf32>
    %271 = arith.truncf %104 : vector<8x16xf32> to vector<8x16xbf16>
    %c0_212 = arith.constant 0 : index
    %c0_213 = arith.constant 0 : index
    %c0_214 = arith.constant 0 : index
    %272 = vector.load %arg14[%c0_212, %c0_213, %c0_214] : memref<3x16x32xbf16, #tpu.memory_space<vmem>>, vector<1x16x32xbf16>
    %273 = vector.shape_cast %272 : vector<1x16x32xbf16> to vector<16x32xbf16>
    %cst_215 = arith.constant dense<0.000000e+00> : vector<8x32xf32>
    %274 = tpu.matmul %271, %273, %cst_215 {dimension_numbers = #tpu.dot_dimension_numbers<[1], [0], [0], [1], [0, 0, 1, 1], [], []>} : vector<8x16xbf16>, vector<16x32xbf16>, vector<8x32xf32> -> vector<8x32xf32>
    %275 = arith.truncf %274 : vector<8x32xf32> to vector<8x32xbf16>
    %c0_216 = arith.constant 0 : index
    %c0_217 = arith.constant 0 : index
    %c0_218 = arith.constant 0 : index
    %276 = vector.load %arg11[%c0_216, %c0_217, %c0_218] : memref<3x16x8xbf16, #tpu.memory_space<vmem>>, vector<1x16x8xbf16>
    %277 = vector.shape_cast %276 : vector<1x16x8xbf16> to vector<16x8xbf16>
    %cst_219 = arith.constant dense<0.000000e+00> : vector<16x32xf32>
    %278 = tpu.matmul %277, %275, %cst_219 {dimension_numbers = #tpu.dot_dimension_numbers<[1], [0], [0], [1], [0, 0, 1, 1], [], []>} : vector<16x8xbf16>, vector<8x32xbf16>, vector<16x32xf32> -> vector<16x32xf32>
    %c1_220 = arith.constant 1 : index
    %c0_221 = arith.constant 0 : index
    %c0_222 = arith.constant 0 : index
    %279 = vector.load %arg14[%c1_220, %c0_221, %c0_222] : memref<3x16x32xbf16, #tpu.memory_space<vmem>>, vector<1x16x32xbf16>
    %280 = vector.shape_cast %279 : vector<1x16x32xbf16> to vector<16x32xbf16>
    %cst_223 = arith.constant dense<0.000000e+00> : vector<8x32xf32>
    %281 = tpu.matmul %271, %280, %cst_223 {dimension_numbers = #tpu.dot_dimension_numbers<[1], [0], [0], [1], [0, 0, 1, 1], [], []>} : vector<8x16xbf16>, vector<16x32xbf16>, vector<8x32xf32> -> vector<8x32xf32>
    %282 = arith.truncf %281 : vector<8x32xf32> to vector<8x32xbf16>
    %c1_224 = arith.constant 1 : index
    %c0_225 = arith.constant 0 : index
    %c0_226 = arith.constant 0 : index
    %283 = vector.load %arg11[%c1_224, %c0_225, %c0_226] : memref<3x16x8xbf16, #tpu.memory_space<vmem>>, vector<1x16x8xbf16>
    %284 = vector.shape_cast %283 : vector<1x16x8xbf16> to vector<16x8xbf16>
    %cst_227 = arith.constant dense<0.000000e+00> : vector<16x32xf32>
    %285 = tpu.matmul %284, %282, %cst_227 {dimension_numbers = #tpu.dot_dimension_numbers<[1], [0], [0], [1], [0, 0, 1, 1], [], []>} : vector<16x8xbf16>, vector<8x32xbf16>, vector<16x32xf32> -> vector<16x32xf32>
    %286 = arith.addf %278, %285 : vector<16x32xf32>
    %c2_228 = arith.constant 2 : index
    %c0_229 = arith.constant 0 : index
    %c0_230 = arith.constant 0 : index
    %287 = vector.load %arg14[%c2_228, %c0_229, %c0_230] : memref<3x16x32xbf16, #tpu.memory_space<vmem>>, vector<1x16x32xbf16>
    %288 = vector.shape_cast %287 : vector<1x16x32xbf16> to vector<16x32xbf16>
    %cst_231 = arith.constant dense<0.000000e+00> : vector<8x32xf32>
    %289 = tpu.matmul %271, %288, %cst_231 {dimension_numbers = #tpu.dot_dimension_numbers<[1], [0], [0], [1], [0, 0, 1, 1], [], []>} : vector<8x16xbf16>, vector<16x32xbf16>, vector<8x32xf32> -> vector<8x32xf32>
    %290 = arith.truncf %289 : vector<8x32xf32> to vector<8x32xbf16>
    %c2_232 = arith.constant 2 : index
    %c0_233 = arith.constant 0 : index
    %c0_234 = arith.constant 0 : index
    %291 = vector.load %arg11[%c2_232, %c0_233, %c0_234] : memref<3x16x8xbf16, #tpu.memory_space<vmem>>, vector<1x16x8xbf16>
    %292 = vector.shape_cast %291 : vector<1x16x8xbf16> to vector<16x8xbf16>
    %cst_235 = arith.constant dense<0.000000e+00> : vector<16x32xf32>
    %293 = tpu.matmul %292, %290, %cst_235 {dimension_numbers = #tpu.dot_dimension_numbers<[1], [0], [0], [1], [0, 0, 1, 1], [], []>} : vector<16x8xbf16>, vector<8x32xbf16>, vector<16x32xf32> -> vector<16x32xf32>
    %294 = arith.addf %286, %293 : vector<16x32xf32>
    %c0_236 = arith.constant 0 : index
    %c0_237 = arith.constant 0 : index
    %295 = vector.load %arg15[%c0_236, %c0_237] : memref<1x32xf32, #tpu.memory_space<vmem>>, vector<1x32xf32>
    %296 = vector.broadcast %295 : vector<1x32xf32> to vector<16x32xf32>
    %297 = arith.addf %294, %296 : vector<16x32xf32>
    %cst_238 = arith.constant 0.000000e+00 : f32
    %298 = vector.broadcast %cst_238 : f32 to vector<16x32xf32>
    %299 = arith.cmpf ogt, %297, %298 : vector<16x32xf32>
    %cst_239 = arith.constant 0.00999999977 : f32
    %300 = vector.broadcast %cst_239 : f32 to vector<16x32xf32>
    %301 = arith.mulf %300, %297 : vector<16x32xf32>
    %302 = arith.select %299, %297, %301 : vector<16x32xi1>, vector<16x32xf32>
    %303 = arith.truncf %302 : vector<16x32xf32> to vector<16x32xbf16>
    %c0_240 = arith.constant 0 : index
    %c0_241 = arith.constant 0 : index
    %c0_242 = arith.constant 0 : index
    %304 = vector.load %arg21[%c0_240, %c0_241, %c0_242] : memref<3x32x16xbf16, #tpu.memory_space<vmem>>, vector<1x32x16xbf16>
    %305 = vector.shape_cast %304 : vector<1x32x16xbf16> to vector<32x16xbf16>
    %cst_243 = arith.constant dense<0.000000e+00> : vector<16x16xf32>
    %306 = tpu.matmul %303, %305, %cst_243 {dimension_numbers = #tpu.dot_dimension_numbers<[1], [0], [0], [1], [0, 0, 1, 1], [], []>} : vector<16x32xbf16>, vector<32x16xbf16>, vector<16x16xf32> -> vector<16x16xf32>
    %307 = arith.truncf %306 : vector<16x16xf32> to vector<16x16xbf16>
    %c0_244 = arith.constant 0 : index
    %c0_245 = arith.constant 0 : index
    %c0_246 = arith.constant 0 : index
    %308 = vector.load %arg16[%c0_244, %c0_245, %c0_246] : memref<3x32x16xbf16, #tpu.memory_space<vmem>>, vector<1x32x16xbf16>
    %309 = vector.shape_cast %308 : vector<1x32x16xbf16> to vector<32x16xbf16>
    %cst_247 = arith.constant dense<0.000000e+00> : vector<32x16xf32>
    %310 = tpu.matmul %309, %307, %cst_247 {dimension_numbers = #tpu.dot_dimension_numbers<[1], [0], [0], [1], [0, 0, 1, 1], [], []>} : vector<32x16xbf16>, vector<16x16xbf16>, vector<32x16xf32> -> vector<32x16xf32>
    %c1_248 = arith.constant 1 : index
    %c0_249 = arith.constant 0 : index
    %c0_250 = arith.constant 0 : index
    %311 = vector.load %arg21[%c1_248, %c0_249, %c0_250] : memref<3x32x16xbf16, #tpu.memory_space<vmem>>, vector<1x32x16xbf16>
    %312 = vector.shape_cast %311 : vector<1x32x16xbf16> to vector<32x16xbf16>
    %cst_251 = arith.constant dense<0.000000e+00> : vector<16x16xf32>
    %313 = tpu.matmul %303, %312, %cst_251 {dimension_numbers = #tpu.dot_dimension_numbers<[1], [0], [0], [1], [0, 0, 1, 1], [], []>} : vector<16x32xbf16>, vector<32x16xbf16>, vector<16x16xf32> -> vector<16x16xf32>
    %314 = arith.truncf %313 : vector<16x16xf32> to vector<16x16xbf16>
    %c1_252 = arith.constant 1 : index
    %c0_253 = arith.constant 0 : index
    %c0_254 = arith.constant 0 : index
    %315 = vector.load %arg16[%c1_252, %c0_253, %c0_254] : memref<3x32x16xbf16, #tpu.memory_space<vmem>>, vector<1x32x16xbf16>
    %316 = vector.shape_cast %315 : vector<1x32x16xbf16> to vector<32x16xbf16>
    %cst_255 = arith.constant dense<0.000000e+00> : vector<32x16xf32>
    %317 = tpu.matmul %316, %314, %cst_255 {dimension_numbers = #tpu.dot_dimension_numbers<[1], [0], [0], [1], [0, 0, 1, 1], [], []>} : vector<32x16xbf16>, vector<16x16xbf16>, vector<32x16xf32> -> vector<32x16xf32>
    %318 = arith.addf %310, %317 : vector<32x16xf32>
    %c2_256 = arith.constant 2 : index
    %c0_257 = arith.constant 0 : index
    %c0_258 = arith.constant 0 : index
    %319 = vector.load %arg21[%c2_256, %c0_257, %c0_258] : memref<3x32x16xbf16, #tpu.memory_space<vmem>>, vector<1x32x16xbf16>
    %320 = vector.shape_cast %319 : vector<1x32x16xbf16> to vector<32x16xbf16>
    %cst_259 = arith.constant dense<0.000000e+00> : vector<16x16xf32>
    %321 = tpu.matmul %303, %320, %cst_259 {dimension_numbers = #tpu.dot_dimension_numbers<[1], [0], [0], [1], [0, 0, 1, 1], [], []>} : vector<16x32xbf16>, vector<32x16xbf16>, vector<16x16xf32> -> vector<16x16xf32>
    %322 = arith.truncf %321 : vector<16x16xf32> to vector<16x16xbf16>
    %c2_260 = arith.constant 2 : index
    %c0_261 = arith.constant 0 : index
    %c0_262 = arith.constant 0 : index
    %323 = vector.load %arg16[%c2_260, %c0_261, %c0_262] : memref<3x32x16xbf16, #tpu.memory_space<vmem>>, vector<1x32x16xbf16>
    %324 = vector.shape_cast %323 : vector<1x32x16xbf16> to vector<32x16xbf16>
    %cst_263 = arith.constant dense<0.000000e+00> : vector<32x16xf32>
    %325 = tpu.matmul %324, %322, %cst_263 {dimension_numbers = #tpu.dot_dimension_numbers<[1], [0], [0], [1], [0, 0, 1, 1], [], []>} : vector<32x16xbf16>, vector<16x16xbf16>, vector<32x16xf32> -> vector<32x16xf32>
    %326 = arith.addf %318, %325 : vector<32x16xf32>
    %327 = arith.truncf %72 : vector<14x32xf32> to vector<14x32xbf16>
    %c0_264 = arith.constant 0 : index
    %c0_265 = arith.constant 0 : index
    %c0_266 = arith.constant 0 : index
    %328 = vector.load %arg22[%c0_264, %c0_265, %c0_266] : memref<3x32x16xbf16, #tpu.memory_space<vmem>>, vector<1x32x16xbf16>
    %329 = vector.shape_cast %328 : vector<1x32x16xbf16> to vector<32x16xbf16>
    %cst_267 = arith.constant dense<0.000000e+00> : vector<14x16xf32>
    %330 = tpu.matmul %327, %329, %cst_267 {dimension_numbers = #tpu.dot_dimension_numbers<[1], [0], [0], [1], [0, 0, 1, 1], [], []>} : vector<14x32xbf16>, vector<32x16xbf16>, vector<14x16xf32> -> vector<14x16xf32>
    %331 = arith.truncf %330 : vector<14x16xf32> to vector<14x16xbf16>
    %c0_268 = arith.constant 0 : index
    %c0_269 = arith.constant 0 : index
    %c0_270 = arith.constant 0 : index
    %332 = vector.load %arg17[%c0_268, %c0_269, %c0_270] : memref<3x32x14xbf16, #tpu.memory_space<vmem>>, vector<1x32x14xbf16>
    %333 = vector.shape_cast %332 : vector<1x32x14xbf16> to vector<32x14xbf16>
    %cst_271 = arith.constant dense<0.000000e+00> : vector<32x16xf32>
    %334 = tpu.matmul %333, %331, %cst_271 {dimension_numbers = #tpu.dot_dimension_numbers<[1], [0], [0], [1], [0, 0, 1, 1], [], []>} : vector<32x14xbf16>, vector<14x16xbf16>, vector<32x16xf32> -> vector<32x16xf32>
    %c1_272 = arith.constant 1 : index
    %c0_273 = arith.constant 0 : index
    %c0_274 = arith.constant 0 : index
    %335 = vector.load %arg22[%c1_272, %c0_273, %c0_274] : memref<3x32x16xbf16, #tpu.memory_space<vmem>>, vector<1x32x16xbf16>
    %336 = vector.shape_cast %335 : vector<1x32x16xbf16> to vector<32x16xbf16>
    %cst_275 = arith.constant dense<0.000000e+00> : vector<14x16xf32>
    %337 = tpu.matmul %327, %336, %cst_275 {dimension_numbers = #tpu.dot_dimension_numbers<[1], [0], [0], [1], [0, 0, 1, 1], [], []>} : vector<14x32xbf16>, vector<32x16xbf16>, vector<14x16xf32> -> vector<14x16xf32>
    %338 = arith.truncf %337 : vector<14x16xf32> to vector<14x16xbf16>
    %c1_276 = arith.constant 1 : index
    %c0_277 = arith.constant 0 : index
    %c0_278 = arith.constant 0 : index
    %339 = vector.load %arg17[%c1_276, %c0_277, %c0_278] : memref<3x32x14xbf16, #tpu.memory_space<vmem>>, vector<1x32x14xbf16>
    %340 = vector.shape_cast %339 : vector<1x32x14xbf16> to vector<32x14xbf16>
    %cst_279 = arith.constant dense<0.000000e+00> : vector<32x16xf32>
    %341 = tpu.matmul %340, %338, %cst_279 {dimension_numbers = #tpu.dot_dimension_numbers<[1], [0], [0], [1], [0, 0, 1, 1], [], []>} : vector<32x14xbf16>, vector<14x16xbf16>, vector<32x16xf32> -> vector<32x16xf32>
    %342 = arith.addf %334, %341 : vector<32x16xf32>
    %c2_280 = arith.constant 2 : index
    %c0_281 = arith.constant 0 : index
    %c0_282 = arith.constant 0 : index
    %343 = vector.load %arg22[%c2_280, %c0_281, %c0_282] : memref<3x32x16xbf16, #tpu.memory_space<vmem>>, vector<1x32x16xbf16>
    %344 = vector.shape_cast %343 : vector<1x32x16xbf16> to vector<32x16xbf16>
    %cst_283 = arith.constant dense<0.000000e+00> : vector<14x16xf32>
    %345 = tpu.matmul %327, %344, %cst_283 {dimension_numbers = #tpu.dot_dimension_numbers<[1], [0], [0], [1], [0, 0, 1, 1], [], []>} : vector<14x32xbf16>, vector<32x16xbf16>, vector<14x16xf32> -> vector<14x16xf32>
    %346 = arith.truncf %345 : vector<14x16xf32> to vector<14x16xbf16>
    %c2_284 = arith.constant 2 : index
    %c0_285 = arith.constant 0 : index
    %c0_286 = arith.constant 0 : index
    %347 = vector.load %arg17[%c2_284, %c0_285, %c0_286] : memref<3x32x14xbf16, #tpu.memory_space<vmem>>, vector<1x32x14xbf16>
    %348 = vector.shape_cast %347 : vector<1x32x14xbf16> to vector<32x14xbf16>
    %cst_287 = arith.constant dense<0.000000e+00> : vector<32x16xf32>
    %349 = tpu.matmul %348, %346, %cst_287 {dimension_numbers = #tpu.dot_dimension_numbers<[1], [0], [0], [1], [0, 0, 1, 1], [], []>} : vector<32x14xbf16>, vector<14x16xbf16>, vector<32x16xf32> -> vector<32x16xf32>
    %350 = arith.addf %342, %349 : vector<32x16xf32>
    %351 = arith.addf %326, %350 : vector<32x16xf32>
    %c0_288 = arith.constant 0 : index
    %c0_289 = arith.constant 0 : index
    %352 = vector.load %arg23[%c0_288, %c0_289] : memref<1x16xf32, #tpu.memory_space<vmem>>, vector<1x16xf32>
    %353 = vector.broadcast %352 : vector<1x16xf32> to vector<32x16xf32>
    %354 = arith.addf %351, %353 : vector<32x16xf32>
    %cst_290 = arith.constant 0.000000e+00 : f32
    %355 = vector.broadcast %cst_290 : f32 to vector<32x16xf32>
    %356 = arith.cmpf ogt, %354, %355 : vector<32x16xf32>
    %cst_291 = arith.constant 0.00999999977 : f32
    %357 = vector.broadcast %cst_291 : f32 to vector<32x16xf32>
    %358 = arith.mulf %357, %354 : vector<32x16xf32>
    %359 = arith.select %356, %354, %358 : vector<32x16xi1>, vector<32x16xf32>
    %360 = arith.truncf %359 : vector<32x16xf32> to vector<32x16xbf16>
    %c0_292 = arith.constant 0 : index
    %c0_293 = arith.constant 0 : index
    %c0_294 = arith.constant 0 : index
    %361 = vector.load %arg24[%c0_292, %c0_293, %c0_294] : memref<3x64x32xbf16, #tpu.memory_space<vmem>>, vector<1x64x32xbf16>
    %362 = vector.shape_cast %361 : vector<1x64x32xbf16> to vector<64x32xbf16>
    %cst_295 = arith.constant dense<0.000000e+00> : vector<64x16xf32>
    %363 = tpu.matmul %362, %360, %cst_295 {dimension_numbers = #tpu.dot_dimension_numbers<[1], [0], [0], [1], [0, 0, 1, 1], [], []>} : vector<64x32xbf16>, vector<32x16xbf16>, vector<64x16xf32> -> vector<64x16xf32>
    %c0_296 = arith.constant 0 : index
    %c0_297 = arith.constant 0 : index
    %c0_298 = arith.constant 0 : index
    %364 = vector.load %arg29[%c0_296, %c0_297, %c0_298] : memref<3x1x16xbf16, #tpu.memory_space<vmem>>, vector<1x1x16xbf16>
    %365 = vector.shape_cast %364 : vector<1x1x16xbf16> to vector<1x16xbf16>
    %366 = arith.extf %365 : vector<1x16xbf16> to vector<1x16xf32>
    %367 = vector.broadcast %366 : vector<1x16xf32> to vector<64x16xf32>
    %368 = arith.mulf %363, %367 : vector<64x16xf32>
    %cst_299 = arith.constant dense<0.000000e+00> : vector<64xf32>
    %369 = vector.multi_reduction <add>, %368, %cst_299 [1] : vector<64x16xf32> to vector<64xf32>
    %370 = vector.shape_cast %369 : vector<64xf32> to vector<64x1xf32>
    %c1_300 = arith.constant 1 : index
    %c0_301 = arith.constant 0 : index
    %c0_302 = arith.constant 0 : index
    %371 = vector.load %arg24[%c1_300, %c0_301, %c0_302] : memref<3x64x32xbf16, #tpu.memory_space<vmem>>, vector<1x64x32xbf16>
    %372 = vector.shape_cast %371 : vector<1x64x32xbf16> to vector<64x32xbf16>
    %cst_303 = arith.constant dense<0.000000e+00> : vector<64x16xf32>
    %373 = tpu.matmul %372, %360, %cst_303 {dimension_numbers = #tpu.dot_dimension_numbers<[1], [0], [0], [1], [0, 0, 1, 1], [], []>} : vector<64x32xbf16>, vector<32x16xbf16>, vector<64x16xf32> -> vector<64x16xf32>
    %c1_304 = arith.constant 1 : index
    %c0_305 = arith.constant 0 : index
    %c0_306 = arith.constant 0 : index
    %374 = vector.load %arg29[%c1_304, %c0_305, %c0_306] : memref<3x1x16xbf16, #tpu.memory_space<vmem>>, vector<1x1x16xbf16>
    %375 = vector.shape_cast %374 : vector<1x1x16xbf16> to vector<1x16xbf16>
    %376 = arith.extf %375 : vector<1x16xbf16> to vector<1x16xf32>
    %377 = vector.broadcast %376 : vector<1x16xf32> to vector<64x16xf32>
    %378 = arith.mulf %373, %377 : vector<64x16xf32>
    %cst_307 = arith.constant dense<0.000000e+00> : vector<64xf32>
    %379 = vector.multi_reduction <add>, %378, %cst_307 [1] : vector<64x16xf32> to vector<64xf32>
    %380 = vector.shape_cast %379 : vector<64xf32> to vector<64x1xf32>
    %381 = arith.addf %370, %380 : vector<64x1xf32>
    %c2_308 = arith.constant 2 : index
    %c0_309 = arith.constant 0 : index
    %c0_310 = arith.constant 0 : index
    %382 = vector.load %arg24[%c2_308, %c0_309, %c0_310] : memref<3x64x32xbf16, #tpu.memory_space<vmem>>, vector<1x64x32xbf16>
    %383 = vector.shape_cast %382 : vector<1x64x32xbf16> to vector<64x32xbf16>
    %cst_311 = arith.constant dense<0.000000e+00> : vector<64x16xf32>
    %384 = tpu.matmul %383, %360, %cst_311 {dimension_numbers = #tpu.dot_dimension_numbers<[1], [0], [0], [1], [0, 0, 1, 1], [], []>} : vector<64x32xbf16>, vector<32x16xbf16>, vector<64x16xf32> -> vector<64x16xf32>
    %c2_312 = arith.constant 2 : index
    %c0_313 = arith.constant 0 : index
    %c0_314 = arith.constant 0 : index
    %385 = vector.load %arg29[%c2_312, %c0_313, %c0_314] : memref<3x1x16xbf16, #tpu.memory_space<vmem>>, vector<1x1x16xbf16>
    %386 = vector.shape_cast %385 : vector<1x1x16xbf16> to vector<1x16xbf16>
    %387 = arith.extf %386 : vector<1x16xbf16> to vector<1x16xf32>
    %388 = vector.broadcast %387 : vector<1x16xf32> to vector<64x16xf32>
    %389 = arith.mulf %384, %388 : vector<64x16xf32>
    %cst_315 = arith.constant dense<0.000000e+00> : vector<64xf32>
    %390 = vector.multi_reduction <add>, %389, %cst_315 [1] : vector<64x16xf32> to vector<64xf32>
    %391 = vector.shape_cast %390 : vector<64xf32> to vector<64x1xf32>
    %392 = arith.addf %381, %391 : vector<64x1xf32>
    %393 = arith.truncf %40 : vector<28x16xf32> to vector<28x16xbf16>
    %c0_316 = arith.constant 0 : index
    %c0_317 = arith.constant 0 : index
    %c0_318 = arith.constant 0 : index
    %394 = vector.load %arg25[%c0_316, %c0_317, %c0_318] : memref<3x64x28xbf16, #tpu.memory_space<vmem>>, vector<1x64x28xbf16>
    %395 = vector.shape_cast %394 : vector<1x64x28xbf16> to vector<64x28xbf16>
    %cst_319 = arith.constant dense<0.000000e+00> : vector<64x16xf32>
    %396 = tpu.matmul %395, %393, %cst_319 {dimension_numbers = #tpu.dot_dimension_numbers<[1], [0], [0], [1], [0, 0, 1, 1], [], []>} : vector<64x28xbf16>, vector<28x16xbf16>, vector<64x16xf32> -> vector<64x16xf32>
    %c0_320 = arith.constant 0 : index
    %c0_321 = arith.constant 0 : index
    %c0_322 = arith.constant 0 : index
    %397 = vector.load %arg30[%c0_320, %c0_321, %c0_322] : memref<3x1x16xbf16, #tpu.memory_space<vmem>>, vector<1x1x16xbf16>
    %398 = vector.shape_cast %397 : vector<1x1x16xbf16> to vector<1x16xbf16>
    %399 = arith.extf %398 : vector<1x16xbf16> to vector<1x16xf32>
    %400 = vector.broadcast %399 : vector<1x16xf32> to vector<64x16xf32>
    %401 = arith.mulf %396, %400 : vector<64x16xf32>
    %cst_323 = arith.constant dense<0.000000e+00> : vector<64xf32>
    %402 = vector.multi_reduction <add>, %401, %cst_323 [1] : vector<64x16xf32> to vector<64xf32>
    %403 = vector.shape_cast %402 : vector<64xf32> to vector<64x1xf32>
    %c1_324 = arith.constant 1 : index
    %c0_325 = arith.constant 0 : index
    %c0_326 = arith.constant 0 : index
    %404 = vector.load %arg25[%c1_324, %c0_325, %c0_326] : memref<3x64x28xbf16, #tpu.memory_space<vmem>>, vector<1x64x28xbf16>
    %405 = vector.shape_cast %404 : vector<1x64x28xbf16> to vector<64x28xbf16>
    %cst_327 = arith.constant dense<0.000000e+00> : vector<64x16xf32>
    %406 = tpu.matmul %405, %393, %cst_327 {dimension_numbers = #tpu.dot_dimension_numbers<[1], [0], [0], [1], [0, 0, 1, 1], [], []>} : vector<64x28xbf16>, vector<28x16xbf16>, vector<64x16xf32> -> vector<64x16xf32>
    %c1_328 = arith.constant 1 : index
    %c0_329 = arith.constant 0 : index
    %c0_330 = arith.constant 0 : index
    %407 = vector.load %arg30[%c1_328, %c0_329, %c0_330] : memref<3x1x16xbf16, #tpu.memory_space<vmem>>, vector<1x1x16xbf16>
    %408 = vector.shape_cast %407 : vector<1x1x16xbf16> to vector<1x16xbf16>
    %409 = arith.extf %408 : vector<1x16xbf16> to vector<1x16xf32>
    %410 = vector.broadcast %409 : vector<1x16xf32> to vector<64x16xf32>
    %411 = arith.mulf %406, %410 : vector<64x16xf32>
    %cst_331 = arith.constant dense<0.000000e+00> : vector<64xf32>
    %412 = vector.multi_reduction <add>, %411, %cst_331 [1] : vector<64x16xf32> to vector<64xf32>
    %413 = vector.shape_cast %412 : vector<64xf32> to vector<64x1xf32>
    %414 = arith.addf %403, %413 : vector<64x1xf32>
    %c2_332 = arith.constant 2 : index
    %c0_333 = arith.constant 0 : index
    %c0_334 = arith.constant 0 : index
    %415 = vector.load %arg25[%c2_332, %c0_333, %c0_334] : memref<3x64x28xbf16, #tpu.memory_space<vmem>>, vector<1x64x28xbf16>
    %416 = vector.shape_cast %415 : vector<1x64x28xbf16> to vector<64x28xbf16>
    %cst_335 = arith.constant dense<0.000000e+00> : vector<64x16xf32>
    %417 = tpu.matmul %416, %393, %cst_335 {dimension_numbers = #tpu.dot_dimension_numbers<[1], [0], [0], [1], [0, 0, 1, 1], [], []>} : vector<64x28xbf16>, vector<28x16xbf16>, vector<64x16xf32> -> vector<64x16xf32>
    %c2_336 = arith.constant 2 : index
    %c0_337 = arith.constant 0 : index
    %c0_338 = arith.constant 0 : index
    %418 = vector.load %arg30[%c2_336, %c0_337, %c0_338] : memref<3x1x16xbf16, #tpu.memory_space<vmem>>, vector<1x1x16xbf16>
    %419 = vector.shape_cast %418 : vector<1x1x16xbf16> to vector<1x16xbf16>
    %420 = arith.extf %419 : vector<1x16xbf16> to vector<1x16xf32>
    %421 = vector.broadcast %420 : vector<1x16xf32> to vector<64x16xf32>
    %422 = arith.mulf %417, %421 : vector<64x16xf32>
    %cst_339 = arith.constant dense<0.000000e+00> : vector<64xf32>
    %423 = vector.multi_reduction <add>, %422, %cst_339 [1] : vector<64x16xf32> to vector<64xf32>
    %424 = vector.shape_cast %423 : vector<64xf32> to vector<64x1xf32>
    %425 = arith.addf %414, %424 : vector<64x1xf32>
    %426 = arith.addf %392, %425 : vector<64x1xf32>
    %c0_340 = arith.constant 0 : index
    %c0_341 = arith.constant 0 : index
    %427 = vector.load %arg31[%c0_340, %c0_341] : memref<1x1xf32, #tpu.memory_space<vmem>>, vector<1x1xf32>
    %428 = vector.broadcast %427 : vector<1x1xf32> to vector<64x1xf32>
    %429 = arith.addf %426, %428 : vector<64x1xf32>
    %cst_342 = arith.constant 0.000000e+00 : f32
    %430 = vector.broadcast %cst_342 : f32 to vector<64x1xf32>
    %431 = arith.subf %430, %429 : vector<64x1xf32>
    %432 = math.exp %431 : vector<64x1xf32>
    %cst_343 = arith.constant 1.000000e+00 : f32
    %433 = vector.broadcast %cst_343 : f32 to vector<64x1xf32>
    %434 = arith.addf %433, %432 : vector<64x1xf32>
    %cst_344 = arith.constant 1.000000e+00 : f32
    %435 = vector.broadcast %cst_344 : f32 to vector<64x1xf32>
    %436 = arith.divf %435, %434 : vector<64x1xf32>
    %c0_345 = arith.constant 0 : index
    %c0_346 = arith.constant 0 : index
    %437 = vector.load %arg32[%c0_345, %c0_346] : memref<64x1xf32, #tpu.memory_space<vmem>>, vector<64x1xf32>
    tpu.vector_store %arg32[%c0_345, %c0_346], %270 {strides = array<i32>} : memref<64x1xf32, #tpu.memory_space<vmem>>, vector<64x1xf32>,
    %c0_347 = arith.constant 0 : index
    %c0_348 = arith.constant 0 : index
    %438 = vector.load %arg33[%c0_347, %c0_348] : memref<64x1xf32, #tpu.memory_space<vmem>>, vector<64x1xf32>
    tpu.vector_store %arg33[%c0_347, %c0_348], %436 {strides = array<i32>} : memref<64x1xf32, #tpu.memory_space<vmem>>, vector<64x1xf32>,
    return
  }
  func.func @transform_0(%arg0: i32) -> (i32, i32) {
    %c0_i32 = arith.constant 0 : i32
    %c0_i32_0 = arith.constant 0 : i32
    %c0_i32_1 = arith.constant 0 : i32
    return %c0_i32, %c0_i32_0 : i32, i32
  }
  func.func @transform_1(%arg0: i32) -> (i32, i32, i32) {
    %c0_i32 = arith.constant 0 : i32
    %c0_i32_0 = arith.constant 0 : i32
    %c0_i32_1 = arith.constant 0 : i32
    %c0_i32_2 = arith.constant 0 : i32
    return %c0_i32, %c0_i32_0, %c0_i32_1 : i32, i32, i32
  }
  func.func @transform_2(%arg0: i32) -> (i32, i32, i32) {
    %c0_i32 = arith.constant 0 : i32
    %c0_i32_0 = arith.constant 0 : i32
    %c0_i32_1 = arith.constant 0 : i32
    %c0_i32_2 = arith.constant 0 : i32
    return %c0_i32, %c0_i32_0, %c0_i32_1 : i32, i32, i32
  }
  func.func @transform_3(%arg0: i32) -> (i32, i32) {
    %c0_i32 = arith.constant 0 : i32
    %c0_i32_0 = arith.constant 0 : i32
    %c0_i32_1 = arith.constant 0 : i32
    return %c0_i32, %c0_i32_0 : i32, i32
  }
  func.func @transform_4(%arg0: i32) -> (i32, i32, i32) {
    %c0_i32 = arith.constant 0 : i32
    %c0_i32_0 = arith.constant 0 : i32
    %c0_i32_1 = arith.constant 0 : i32
    %c0_i32_2 = arith.constant 0 : i32
    return %c0_i32, %c0_i32_0, %c0_i32_1 : i32, i32, i32
  }
  func.func @transform_5(%arg0: i32) -> (i32, i32, i32) {
    %c0_i32 = arith.constant 0 : i32
    %c0_i32_0 = arith.constant 0 : i32
    %c0_i32_1 = arith.constant 0 : i32
    %c0_i32_2 = arith.constant 0 : i32
    return %c0_i32, %c0_i32_0, %c0_i32_1 : i32, i32, i32
  }
  func.func @transform_6(%arg0: i32) -> (i32, i32) {
    %c0_i32 = arith.constant 0 : i32
    %c0_i32_0 = arith.constant 0 : i32
    %c0_i32_1 = arith.constant 0 : i32
    return %c0_i32, %c0_i32_0 : i32, i32
  }
  func.func @transform_7(%arg0: i32) -> (i32, i32, i32) {
    %c0_i32 = arith.constant 0 : i32
    %c0_i32_0 = arith.constant 0 : i32
    %c0_i32_1 = arith.constant 0 : i32
    %c0_i32_2 = arith.constant 0 : i32
    return %c0_i32, %c0_i32_0, %c0_i32_1 : i32, i32, i32
  }
  func.func @transform_8(%arg0: i32) -> (i32, i32, i32) {
    %c0_i32 = arith.constant 0 : i32
    %c0_i32_0 = arith.constant 0 : i32
    %c0_i32_1 = arith.constant 0 : i32
    %c0_i32_2 = arith.constant 0 : i32
    return %c0_i32, %c0_i32_0, %c0_i32_1 : i32, i32, i32
  }
  func.func @transform_9(%arg0: i32) -> (i32, i32) {
    %c0_i32 = arith.constant 0 : i32
    %c0_i32_0 = arith.constant 0 : i32
    %c0_i32_1 = arith.constant 0 : i32
    return %c0_i32, %c0_i32_0 : i32, i32
  }
  func.func @transform_10(%arg0: i32) -> (i32, i32, i32) {
    %c0_i32 = arith.constant 0 : i32
    %c0_i32_0 = arith.constant 0 : i32
    %c0_i32_1 = arith.constant 0 : i32
    %c0_i32_2 = arith.constant 0 : i32
    return %c0_i32, %c0_i32_0, %c0_i32_1 : i32, i32, i32
  }
  func.func @transform_11(%arg0: i32) -> (i32, i32, i32) {
    %c0_i32 = arith.constant 0 : i32
    %c0_i32_0 = arith.constant 0 : i32
    %c0_i32_1 = arith.constant 0 : i32
    %c0_i32_2 = arith.constant 0 : i32
    return %c0_i32, %c0_i32_0, %c0_i32_1 : i32, i32, i32
  }
  func.func @transform_12(%arg0: i32) -> (i32, i32) {
    %c0_i32 = arith.constant 0 : i32
    %c0_i32_0 = arith.constant 0 : i32
    %c0_i32_1 = arith.constant 0 : i32
    return %c0_i32, %c0_i32_0 : i32, i32
  }
  func.func @transform_13(%arg0: i32) -> (i32, i32, i32) {
    %c0_i32 = arith.constant 0 : i32
    %c0_i32_0 = arith.constant 0 : i32
    %c0_i32_1 = arith.constant 0 : i32
    %c0_i32_2 = arith.constant 0 : i32
    return %c0_i32, %c0_i32_0, %c0_i32_1 : i32, i32, i32
  }
  func.func @transform_14(%arg0: i32) -> (i32, i32) {
    %c0_i32 = arith.constant 0 : i32
    %c0_i32_0 = arith.constant 0 : i32
    %c0_i32_1 = arith.constant 0 : i32
    return %c0_i32, %c0_i32_0 : i32, i32
  }
  func.func @transform_15(%arg0: i32) -> (i32, i32, i32) {
    %c0_i32 = arith.constant 0 : i32
    %c0_i32_0 = arith.constant 0 : i32
    %c0_i32_1 = arith.constant 0 : i32
    %c0_i32_2 = arith.constant 0 : i32
    return %c0_i32, %c0_i32_0, %c0_i32_1 : i32, i32, i32
  }
  func.func @transform_16(%arg0: i32) -> (i32, i32, i32) {
    %c0_i32 = arith.constant 0 : i32
    %c0_i32_0 = arith.constant 0 : i32
    %c0_i32_1 = arith.constant 0 : i32
    %c0_i32_2 = arith.constant 0 : i32
    return %c0_i32, %c0_i32_0, %c0_i32_1 : i32, i32, i32
  }
  func.func @transform_17(%arg0: i32) -> (i32, i32, i32) {
    %c0_i32 = arith.constant 0 : i32
    %c0_i32_0 = arith.constant 0 : i32
    %c0_i32_1 = arith.constant 0 : i32
    %c0_i32_2 = arith.constant 0 : i32
    return %c0_i32, %c0_i32_0, %c0_i32_1 : i32, i32, i32
  }
  func.func @transform_18(%arg0: i32) -> (i32, i32, i32) {
    %c0_i32 = arith.constant 0 : i32
    %c0_i32_0 = arith.constant 0 : i32
    %c0_i32_1 = arith.constant 0 : i32
    %c0_i32_2 = arith.constant 0 : i32
    return %c0_i32, %c0_i32_0, %c0_i32_1 : i32, i32, i32
  }
  func.func @transform_19(%arg0: i32) -> (i32, i32) {
    %c0_i32 = arith.constant 0 : i32
    %c0_i32_0 = arith.constant 0 : i32
    %c0_i32_1 = arith.constant 0 : i32
    return %c0_i32, %c0_i32_0 : i32, i32
  }
  func.func @transform_20(%arg0: i32) -> (i32, i32, i32) {
    %c0_i32 = arith.constant 0 : i32
    %c0_i32_0 = arith.constant 0 : i32
    %c0_i32_1 = arith.constant 0 : i32
    %c0_i32_2 = arith.constant 0 : i32
    return %c0_i32, %c0_i32_0, %c0_i32_1 : i32, i32, i32
  }
  func.func @transform_21(%arg0: i32) -> (i32, i32, i32) {
    %c0_i32 = arith.constant 0 : i32
    %c0_i32_0 = arith.constant 0 : i32
    %c0_i32_1 = arith.constant 0 : i32
    %c0_i32_2 = arith.constant 0 : i32
    return %c0_i32, %c0_i32_0, %c0_i32_1 : i32, i32, i32
  }
  func.func @transform_22(%arg0: i32) -> (i32, i32) {
    %c0_i32 = arith.constant 0 : i32
    %c0_i32_0 = arith.constant 0 : i32
    %c0_i32_1 = arith.constant 0 : i32
    return %c0_i32, %c0_i32_0 : i32, i32
  }
  func.func @transform_23(%arg0: i32) -> (i32, i32, i32) {
    %c0_i32 = arith.constant 0 : i32
    %c0_i32_0 = arith.constant 0 : i32
    %c0_i32_1 = arith.constant 0 : i32
    %c0_i32_2 = arith.constant 0 : i32
    return %c0_i32, %c0_i32_0, %c0_i32_1 : i32, i32, i32
  }
  func.func @transform_24(%arg0: i32) -> (i32, i32, i32) {
    %c0_i32 = arith.constant 0 : i32
    %c0_i32_0 = arith.constant 0 : i32
    %c0_i32_1 = arith.constant 0 : i32
    %c0_i32_2 = arith.constant 0 : i32
    return %c0_i32, %c0_i32_0, %c0_i32_1 : i32, i32, i32
  }
  func.func @transform_25(%arg0: i32) -> (i32, i32, i32) {
    %c0_i32 = arith.constant 0 : i32
    %c0_i32_0 = arith.constant 0 : i32
    %c0_i32_1 = arith.constant 0 : i32
    %c0_i32_2 = arith.constant 0 : i32
    return %c0_i32, %c0_i32_0, %c0_i32_1 : i32, i32, i32
  }
  func.func @transform_26(%arg0: i32) -> (i32, i32, i32) {
    %c0_i32 = arith.constant 0 : i32
    %c0_i32_0 = arith.constant 0 : i32
    %c0_i32_1 = arith.constant 0 : i32
    %c0_i32_2 = arith.constant 0 : i32
    return %c0_i32, %c0_i32_0, %c0_i32_1 : i32, i32, i32
  }
  func.func @transform_27(%arg0: i32) -> (i32, i32) {
    %c0_i32 = arith.constant 0 : i32
    %c0_i32_0 = arith.constant 0 : i32
    %c0_i32_1 = arith.constant 0 : i32
    return %c0_i32, %c0_i32_0 : i32, i32
  }
  func.func @transform_28(%arg0: i32) -> (i32, i32, i32) {
    %c0_i32 = arith.constant 0 : i32
    %c0_i32_0 = arith.constant 0 : i32
    %c0_i32_1 = arith.constant 0 : i32
    %c0_i32_2 = arith.constant 0 : i32
    return %c0_i32, %c0_i32_0, %c0_i32_1 : i32, i32, i32
  }
  func.func @transform_29(%arg0: i32) -> (i32, i32, i32) {
    %c0_i32 = arith.constant 0 : i32
    %c0_i32_0 = arith.constant 0 : i32
    %c0_i32_1 = arith.constant 0 : i32
    %c0_i32_2 = arith.constant 0 : i32
    return %c0_i32, %c0_i32_0, %c0_i32_1 : i32, i32, i32
  }
  func.func @transform_30(%arg0: i32) -> (i32, i32) {
    %c0_i32 = arith.constant 0 : i32
    %c0_i32_0 = arith.constant 0 : i32
    %c0_i32_1 = arith.constant 0 : i32
    return %c0_i32, %c0_i32_0 : i32, i32
  }
  func.func @transform_31(%arg0: i32) -> (i32, i32) {
    %c0_i32 = arith.constant 0 : i32
    %c0_i32_0 = arith.constant 0 : i32
    %c0_i32_1 = arith.constant 0 : i32
    return %c0_i32, %c0_i32_0 : i32, i32
  }
  func.func @transform_32(%arg0: i32) -> (i32, i32) {
    %c0_i32 = arith.constant 0 : i32
    %c0_i32_0 = arith.constant 0 : i32
    %c0_i32_1 = arith.constant 0 : i32
    return %c0_i32, %c0_i32_0 : i32, i32
  }
}

</mosaic_0001>

<bundles_post_ra>
// kernel: conv1dunet_forward.1
= control target key start
LH: loop header
LB: loop body
LE: loop exit
PB: predicated region body
PF: predicated region fallthrough
CT: control target
= control target key end

     0   :  { %s6421_s6 = smov 1   ;;  %s6422_s10 = smov 2   ;;  %s7553_s0 = inlined_call_operand.smem [shape: u32[33], index: -1, kind: input, shape index: {}] }
   0x1   :  { %s6471_s5 = sld [smem:[%s7553_s0]]   ;;  %s6423_s14 = smov 3  }
   0x2   :  { %s6476_s9 = sld [smem:[%s7553_s0 + %s6421_s6]]   ;;  %s6424_s18 = smov 4  }
   0x3   :  { %s6481_s13 = sld [smem:[%s7553_s0 + %s6422_s10]]   ;;  %s6425_s22 = smov 5  }
   0x4   :  { %s6486_s17 = sld [smem:[%s7553_s0 + %s6423_s14]]   ;;  %s6426_s26 = smov 6  }
   0x5   :  { %s6491_s21 = sld [smem:[%s7553_s0 + %s6424_s18]]   ;;  %s6427_s30 = smov 7  }
   0x6   :  { %s6496_s25 = sld [smem:[%s7553_s0 + %s6425_s22]]   ;;  %s6428_s4 = smov 8  }
   0x7   :  { %s6501_s29 = sld [smem:[%s7553_s0 + %s6426_s26]]   ;;  %s6429_s10 = smov 9  }
   0x8   :  { %s6506_s3 = sld [smem:[%s7553_s0 + %s6427_s30]]   ;;  %s6430_s15 = smov 10  }
   0x9   :  { %s6511_s8 = sld [smem:[%s7553_s0 + %s6428_s4]]   ;;  %s6431_s20 = smov 11  }
   0xa   :  { %s6516_s14 = sld [smem:[%s7553_s0 + %s6429_s10]]   ;;  %s6432_s26 = smov 12  }
   0xb   :  { %s6521_s19 = sld [smem:[%s7553_s0 + %s6430_s15]]   ;;  %s6433_s1 = smov 13  }
   0xc   :  { %s6526_s24 = sld [smem:[%s7553_s0 + %s6431_s20]]   ;;  %s6434_s7 = smov 14  }
   0xd   :  { %s6531_s30 = sld [smem:[%s7553_s0 + %s6432_s26]]   ;;  %s6435_s15 = smov 15  }
   0xe   :  { %7569 = sst [smem:[#allocation19_spill]] %s6506_s3  ;;  %s6436_s22 = smov 16  }
   0xf   :  { %s6536_s6 = sld [smem:[%s7553_s0 + %s6433_s1]]   ;;  %s6437_s28 = smov 17  }
  0x10   :  { %s6541_s12 = sld [smem:[%s7553_s0 + %s6434_s7]]   ;;  %s6438_s7 = smov 18  }
  0x11   :  { %7570 = sst [smem:[#allocation20_spill]] %s6521_s19  ;;  %s6448_s23 = smov 28  }
  0x12   :  { %7571 = sst [smem:[#allocation21_spill]] %s6526_s24  ;;  %s6449_s1 = smov 29  }
  0x13   :  { %s6546_s20 = sld [smem:[%s7553_s0 + %s6435_s15]]   ;;  %s6439_s15 = smov 19  }
  0x14   :  { %s6551_s27 = sld [smem:[%s7553_s0 + %s6436_s22]]   ;;  %s6440_s22 = smov 20  }
  0x15   :  { %7572 = sst [smem:[#allocation22_spill]] %s6536_s6  ;;  %s6450_s10 = smov 31  }
  0x16   :  { %s6556_s4 = sld [smem:[%s7553_s0 + %s6437_s28]]   ;;  %s6441_s28 = smov 21  }
  0x17   :  { %s6561_s6 = sld [smem:[%s7553_s0 + %s6438_s7]]   ;;  %s6442_s7 = smov 22  }
  0x18   :  { %s6451_s16 = smov 32  }
  0x19   :  { %7573 = sst [smem:[#allocation23_spill]] %s6546_s20 }
  0x1a   :  { %7574 = sst [smem:[#allocation24_spill]] %s6551_s27 }
  0x1b   :  { %s6566_s20 = sld [smem:[%s7553_s0 + %s6439_s15]]   ;;  %s6443_s15 = smov 23  }
  0x1c   :  { %7575 = sst [smem:[#allocation25_spill]] %s6556_s4 }
  0x1d   :  { %7576 = sst [smem:[#allocation26_spill]] %s6561_s6 }
  0x1e   :  { %s6571_s27 = sld [smem:[%s7553_s0 + %s6440_s22]]   ;;  %s6444_s22 = smov 24  }
  0x1f   :  { %s6576_s4 = sld [smem:[%s7553_s0 + %s6441_s28]]   ;;  %s6445_s28 = smov 25  }
  0x20   :  { %s6581_s6 = sld [smem:[%s7553_s0 + %s6442_s7]]   ;;  %s6446_s7 = smov 26  }
  0x21   :  { %s6586_s19 = sld [smem:[%s7553_s0 + %s6443_s15]]   ;;  %s6447_s15 = smov 27  }
  0x22   :  { %s6601_s24 = sld [smem:[%s7553_s0 + %s6446_s7]]  }
  0x23   :  { %s6624_s3 = sld [smem:[%s7553_s0 + %s6451_s16]]  }
  0x24   :  { %7577 = sst [smem:[#allocation27_spill]] %s6571_s27 }
  0x25   :  { %7578 = sst [smem:[#allocation28_spill]] %s6576_s4 }
  0x26   :  { %s6591_s27 = sld [smem:[%s7553_s0 + %s6444_s22]]  }
  0x27   :  { %7579 = sst [smem:[#allocation29_spill]] %s6586_s19 }
  0x28   :  { %s6596_s4 = sld [smem:[%s7553_s0 + %s6445_s28]]  }
  0x29   :  { %7582 = sst [smem:[#allocation32_spill]] %s6601_s24 }
  0x2a   :  { %s4975_s19 = sld [smem:[%s7553_s0 + %s6447_s15]]  }
  0x2b   :  { %s6619_s24 = sld [smem:[%s7553_s0 + %s6450_s10]]  }
  0x2c   :  { %7580 = sst [smem:[#allocation30_spill]] %s6591_s27 }
  0x2d   :  { %s6609_s27 = sld [smem:[%s7553_s0 + %s6448_s23]]   ;;  %s6452_s23 = smov 30  }
  0x2e   :  { %7581 = sst [smem:[#allocation31_spill]] %s6596_s4 }
  0x2f   :  { %s6614_s4 = sld [smem:[%s7553_s0 + %s6449_s1]]  }
  0x30   :  { %v71_v0 = vstv %s4975_s19 }
  0x31   :  { %72 = vst [vmem:[#allocation2] sm:$0x1] %v71_v0 }
  0x33   :  { %7583 = sst [smem:[#allocation33_spill]] %s6609_s27 }
  0x34   :  { %s4978_s27 = sld [smem:[%s7553_s0 + %s6452_s23]]  }
  0x3a   :  { %v73_v1 = vstv %s4978_s27 }
  0x3b   :  { %74 = vst [vmem:[#allocation3] sm:$0x1] %v73_v1 }
  0x3c   :  { %75 = vsyncpa [#allocation5], 0 }
  0x3d   :  { %76 = vsyncpa [#allocation7], 0 }
  0x3e   :  { %77 = vsyncpa [#allocation10], 0 }
  0x3f   :  { %78 = vsyncpa [#allocation13], 0  ;;  %s6453_s1 = smov [#allocation6]   ;;  %s6454_s2 = smov [#allocation9]  }
  0x40   :  { %s105_s28 = sshll.u32 %s6453_s1, 4  ;;  %s133_s10 = sshll.u32 %s6454_s2, 4  ;;  %s106_s28 = int_to_ptr.vmem [resolvable:$true] %s105_s28  ;;  %s134_s10 = int_to_ptr.vmem [resolvable:$true] %s133_s10 }
  0x41   :  { %s6259_s7 = scalar_lea.hbm %s6501_s29, 16 }
  0x42   :  { %p6260_p0 = scmp.ne.s32.totalorder %s6501_s29, %s6259_s7  ;;  %p6263_p1 = scmp.lt.u32.totalorder %s6259_s7, %s6501_s29 }
  0x44   :  { %p6265_p2 = pnand %p6263_p1, %p6260_p0 }
  0x46   :  { %6268 = shalt.err (!%p6265_p2)
}
  0x47   :  { %s6269_s0 = scalar_lea.vmem %s106_s28, 16  ;;  %s6273_s19 = scalar_lea.vmem %s106_s28, 32 }
  0x48   :  { %p6270_p3 = scmp.ne.s32.totalorder %s106_s28, %s6269_s0  ;;  %p6274_p4 = scmp.lt.s32.totalorder %s106_s28, %s106_s28 }
  0x49   :  { %p6275_p5 = scmp.lt.s32.totalorder %s6273_s19, %s6269_s0 }
  0x4b   :  { %p6276_p6 = por %p6275_p5, %p6274_p4 }
  0x4d   :  { %p6277_p7 = pnand %p6276_p6, %p6270_p3 }
  0x4f   :  { %6280 = shalt.err (!%p6277_p7)
}
  0x50   :  { %108 = dma.hbm_to_vmem [thread:$0]  %s6501_s29, 16, %s106_s28, [#allocation7]  }
  0x51   :  { %s6281_s27 = scalar_lea.hbm %s6531_s30, 16 }
  0x52   :  { %p6282_p8 = scmp.ne.s32.totalorder %s6531_s30, %s6281_s27  ;;  %p6285_p9 = scmp.lt.u32.totalorder %s6281_s27, %s6531_s30 }
  0x54   :  { %p6287_p10 = pnand %p6285_p9, %p6282_p8 }
  0x56   :  { %6290 = shalt.err (!%p6287_p10)
}
  0x57   :  { %s6291_s11 = scalar_lea.vmem %s134_s10, 16  ;;  %s6295_s16 = scalar_lea.vmem %s134_s10, 32 }
  0x58   :  { %p6292_p11 = scmp.ne.s32.totalorder %s134_s10, %s6291_s11  ;;  %p6296_p12 = scmp.lt.s32.totalorder %s134_s10, %s134_s10 }
  0x59   :  { %p6297_p13 = scmp.lt.s32.totalorder %s6295_s16, %s6291_s11 }
  0x5b   :  { %p6298_p0 = por %p6297_p13, %p6296_p12 }
  0x5d   :  { %p6299_p1 = pnand %p6298_p0, %p6292_p11 }
  0x5f   :  { %6302 = shalt.err (!%p6299_p1)
}
  0x60   :  { %136 = dma.hbm_to_vmem [thread:$0]  %s6531_s30, 16, %s134_s10, [#allocation10]  }
  0x61   :  { %s6455_s15 = smov [#allocation12]   ;;  %s6456_s18 = smov [#allocation4]  }
  0x62   :  { %s163_s29 = sshll.u32 %s6455_s15, 4  ;;  %s91_s23 = sshll.u32 %s6456_s18, 4  ;;  %s164_s29 = int_to_ptr.vmem [resolvable:$true] %s163_s29  ;;  %s92_s23 = int_to_ptr.vmem [resolvable:$true] %s91_s23 }
  0x63   :  { %s6303_s22 = scalar_lea.hbm %s6566_s20, 16 }
  0x64   :  { %p6304_p2 = scmp.ne.s32.totalorder %s6566_s20, %s6303_s22  ;;  %p6307_p3 = scmp.lt.u32.totalorder %s6303_s22, %s6566_s20 }
  0x66   :  { %p6309_p4 = pnand %p6307_p3, %p6304_p2 }
  0x68   :  { %6312 = shalt.err (!%p6309_p4)
}
  0x69   :  { %s6313_s26 = scalar_lea.vmem %s164_s29, 16  ;;  %s6317_s1 = scalar_lea.vmem %s164_s29, 32 }
  0x6a   :  { %p6314_p5 = scmp.ne.s32.totalorder %s164_s29, %s6313_s26  ;;  %p6318_p6 = scmp.lt.s32.totalorder %s164_s29, %s164_s29 }
  0x6b   :  { %p6319_p7 = scmp.lt.s32.totalorder %s6317_s1, %s6313_s26 }
  0x6d   :  { %p6320_p8 = por %p6319_p7, %p6318_p6 }
  0x6f   :  { %p6321_p9 = pnand %p6320_p8, %p6314_p5 }
  0x71   :  { %6324 = shalt.err (!%p6321_p9)
}
  0x72   :  { %166 = dma.hbm_to_vmem [thread:$0]  %s6566_s20, 16, %s164_s29, [#allocation13]  }
  0x73   :  { %s6325_s30 = scalar_lea.hbm %s6486_s17, 16 }
  0x74   :  { %p6326_p10 = scmp.ne.s32.totalorder %s6486_s17, %s6325_s30  ;;  %p6329_p11 = scmp.lt.u32.totalorder %s6325_s30, %s6486_s17 }
  0x76   :  { %p6331_p12 = pnand %p6329_p11, %p6326_p10 }
  0x78   :  { %6334 = shalt.err (!%p6331_p12)
}
  0x79   :  { %s6335_s28 = scalar_lea.vmem %s92_s23, 16  ;;  %s6339_s2 = scalar_lea.vmem %s92_s23, 32 }
  0x7a   :  { %p6336_p13 = scmp.ne.s32.totalorder %s92_s23, %s6335_s28  ;;  %p6340_p0 = scmp.lt.s32.totalorder %s92_s23, %s92_s23 }
  0x7b   :  { %p6341_p1 = scmp.lt.s32.totalorder %s6339_s2, %s6335_s28 }
  0x7d   :  { %p6342_p2 = por %p6341_p1, %p6340_p0 }
  0x7f   :  { %p6343_p3 = pnand %p6342_p2, %p6336_p13 }
  0x81   :  { %6346 = shalt.err (!%p6343_p3)
}
  0x82   :  { %94 = dma.hbm_to_vmem [thread:$0]  %s6486_s17, 16, %s92_s23, [#allocation5]  }
  0x83   :  { %s6457_s10 = smov [#allocation8]   ;;  %s6458_s7 = smov [#allocation11]  }
  0x84   :  { %s119_s20 = sshll.u32 %s6457_s10, 4  ;;  %s145_s0 = sshll.u32 %s6458_s7, 4  ;;  %s120_s20 = int_to_ptr.vmem [resolvable:$true] %s119_s20  ;;  %s146_s0 = int_to_ptr.vmem [resolvable:$true] %s145_s0 }
  0x85   :  { %s6347_s19 = scalar_lea.hbm %s6516_s14, 16 }
  0x86   :  { %p6348_p4 = scmp.ne.s32.totalorder %s6516_s14, %s6347_s19  ;;  %p6351_p5 = scmp.lt.u32.totalorder %s6347_s19, %s6516_s14 }
  0x88   :  { %p6353_p6 = pnand %p6351_p5, %p6348_p4 }
  0x8a   :  { %6356 = shalt.err (!%p6353_p6)
}
  0x8b   :  { %s6357_s27 = scalar_lea.vmem %s120_s20, 16  ;;  %s6361_s11 = scalar_lea.vmem %s120_s20, 32 }
  0x8c   :  { %p6358_p7 = scmp.ne.s32.totalorder %s120_s20, %s6357_s27  ;;  %p6362_p8 = scmp.lt.s32.totalorder %s120_s20, %s120_s20 }
  0x8d   :  { %p6363_p9 = scmp.lt.s32.totalorder %s6361_s11, %s6357_s27 }
  0x8f   :  { %p6364_p10 = por %p6363_p9, %p6362_p8 }
  0x91   :  { %p6365_p11 = pnand %p6364_p10, %p6358_p7 }
  0x93   :  { %6368 = shalt.err (!%p6365_p11)
}
  0x94   :  { %122 = dma.hbm_to_vmem [thread:$0]  %s6516_s14, 16, %s120_s20, [#allocation7]  }
  0x95   :  { %s6369_s17 = scalar_lea.hbm %s6541_s12, 16 }
  0x96   :  { %p6370_p12 = scmp.ne.s32.totalorder %s6541_s12, %s6369_s17  ;;  %p6373_p13 = scmp.lt.u32.totalorder %s6369_s17, %s6541_s12 }
  0x98   :  { %p6375_p0 = pnand %p6373_p13, %p6370_p12 }
  0x9a   :  { %6378 = shalt.err (!%p6375_p0)
}
  0x9b   :  { %s6379_s16 = scalar_lea.vmem %s146_s0, 16  ;;  %s6383_s15 = scalar_lea.vmem %s146_s0, 32 }
  0x9c   :  { %p6380_p1 = scmp.ne.s32.totalorder %s146_s0, %s6379_s16  ;;  %p6384_p2 = scmp.lt.s32.totalorder %s146_s0, %s146_s0 }
  0x9d   :  { %p6385_p3 = scmp.lt.s32.totalorder %s6383_s15, %s6379_s16 }
  0x9f   :  { %p6386_p4 = por %p6385_p3, %p6384_p2 }
  0xa1   :  { %p6387_p5 = pnand %p6386_p4, %p6380_p1 }
  0xa3   :  { %6390 = shalt.err (!%p6387_p5)
}
  0xa4   :  { %148 = dma.hbm_to_vmem [thread:$0]  %s6541_s12, 16, %s146_s0, [#allocation10]  }
  0xa5   :  { %s6459_s29 = smov [#allocation14]   ;;  %s6391_s18 = scalar_lea.hbm %s6581_s6, 16 }
  0xa6   :  { %s177_s14 = sshll.u32 %s6459_s29, 4  ;;  %p6392_p6 = scmp.ne.s32.totalorder %s6581_s6, %s6391_s18  ;;  %s178_s14 = int_to_ptr.vmem [resolvable:$true] %s177_s14 }
  0xa7   :  { %p6395_p7 = scmp.lt.u32.totalorder %s6391_s18, %s6581_s6 }
  0xa9   :  { %p6397_p8 = pnand %p6395_p7, %p6392_p6 }
  0xab   :  { %6400 = shalt.err (!%p6397_p8)
}
  0xac   :  { %s6401_s23 = scalar_lea.vmem %s178_s14, 16  ;;  %s6405_s22 = scalar_lea.vmem %s178_s14, 32 }
  0xad   :  { %p6402_p9 = scmp.ne.s32.totalorder %s178_s14, %s6401_s23  ;;  %p6406_p10 = scmp.lt.s32.totalorder %s178_s14, %s178_s14 }
  0xae   :  { %p6407_p11 = scmp.lt.s32.totalorder %s6405_s22, %s6401_s23 }
  0xb0   :  { %p6408_p12 = por %p6407_p11, %p6406_p10 }
  0xb2   :  { %p6409_p13 = pnand %p6408_p12, %p6402_p9 }
  0xb4   :  { %6412 = shalt.err (!%p6409_p13)
}
  0xb5   :  { %180 = dma.hbm_to_vmem [thread:$0]  %s6581_s6, 16, %s178_s14, [#allocation13]  }
  0xb6   :  { %6413 = dma.done.wait [#allocation5], 16  }
  0xb7   :  { %6414 = vsyncadd [#allocation5], 4294967280 }
  0xb8   :  { %6415 = dma.done.wait [#allocation7], 32  }
  0xb9   :  { %6416 = vsyncadd [#allocation7], 4294967264 }
  0xba   :  { %6417 = dma.done.wait [#allocation10], 32  }
  0xbb   :  { %6418 = vsyncadd [#allocation10], 4294967264 }
  0xbc   :  { %6419 = dma.done.wait [#allocation13], 32  }
  0xbd   :  { %6420 = vsyncadd [#allocation13], 4294967264  ;;  %v6460_v2 = vmov 0   ;;  %v221_v3 = vld [vmem:[%s6471_s5 + $0x10] sm:$0xff]  ;;  %v219_v4 = vld [vmem:[%s6471_s5] sm:$0xff]  ;;  %vm315_vm0 = vcmask 457728   ;;  %v263_v11 = vlaneseq }
  0xbe   :  { %6082 = vset.pattern.permute.xlu1 %v6460_v2  ;;  %6081 = vset.pattern.permute.xlu0 %v6460_v2  ;;  %v222_v5 = vld [vmem:[%s6471_s5 + $0x18] sm:$0xff]  ;;  %v220_v6 = vld [vmem:[%s6471_s5 + $0x8] sm:$0xff]  ;;  %v223_v8 = vld [vmem:[%s6471_s5 + $0x20] sm:$0xff]  ;;  %vm322_vm1 = vcmask 1043456   ;;  %vm571_vm6 = vcmask 130048   ;;  %vm6462_vm7 = vmmov 0  }
  0xbf   :  { %240 = vperm.xlu1 %6082, %v221_v3   ;;  %230 = vperm.xlu0 %6081, %v219_v4   ;;  %v224_v7 = vld [vmem:[%s6471_s5 + $0x28] sm:$0xff]  ;;  %v225_v9 = vld [vmem:[%s6471_s5 + $0x30] sm:$0xff]  ;;  %v264_v12 = vshrl.u32 %v263_v11, 7  ;;  %v4981_v13 = vld [vmem:[%s6481_s13 + $0x1] sm:$0x1]  ;;  %vm703_vm8 = vcmask 1045504  }
  0xc0   :  { %v6083_v10 = vld [vmem:[%s6476_s9 + $0x10] sm:$0xff]   ;;  %v284_v15 = vunpack.c.l.bf16 %v4981_v13  ;;  %v226_v28 = vld [vmem:[%s6481_s13] sm:$0x1]  ;;  %v6084_v44 = vld [vmem:[%s6476_s9 + $0x18] sm:$0x3f]   ;;  %vm699_vm9 = vcmask 228352  }
  0xc1   :  { %5519 = vmatprep.mubr.msk.bf16.mxu0 %vm315_vm0, %v6083_v10  ;;  %v6667_v14 = vsub.s32 0, %v264_v12  ;;  %v227_v32 = vunpack.c.l.bf16 %v226_v28  ;;  %v6085_v45 = vld [vmem:[%s6476_s9] sm:$0xff]   ;;  %v6086_v61 = vld [vmem:[%s6476_s9 + $0x8] sm:$0x3f]   ;;  %vm949_vm12 = vcmask 261120   ;;  %s7584_s5 = sld [smem:[#allocation19_spill]] }
  0xc2   :  { %v4994_v46 = vld [vmem:[%s6481_s13 + $0x2] sm:$0x1]  ;;  %vm1061_vm13 = vcmask 1046528   ;;  %vm1057_vm14 = vcmask 113664   ;;  %s7586_s13 = sld [smem:[#allocation20_spill]]  ;;  %s7590_s6 = sld [smem:[#allocation24_spill]] }
  0xc3   :  { %245 = vperm.xlu1 %6082, %v222_v5   ;;  %235 = vperm.xlu0 %6081, %v220_v6   ;;  %v288_v18 = vrot.slane %v284_v15, %v6667_v14  ;;  %v266_v36 = vrot.slane %v227_v32, %v6667_v14  ;;  %v445_v50 = vunpack.c.l.bf16 %v4994_v46  ;;  %v6087_v62 = vld [vmem:[%s6476_s9 + $0x20] sm:$0xff]   ;;  %v6088_v6 = vld [vmem:[%s6476_s9 + $0x28] sm:$0x3f]   ;;  %s7585_s9 = sld [smem:[#allocation21_spill]]  ;;  %s7592_s26 = sld [smem:[#allocation30_spill]] }
  0xc4   :  { %v6092_v46 = vld [vmem:[%s6491_s21] sm:$0x7f]   ;;  %s7591_s12 = sld [smem:[#allocation29_spill]]  ;;  %s7593_s1 = sld [smem:[#allocation22_spill]] }
  0xc5   :  { %v449_v53 = vrot.slane %v445_v50, %v6667_v14  ;;  %s7594_s30 = sld [smem:[#allocation31_spill]]  ;;  %s7595_s28 = sld [smem:[#allocation32_spill]] }
  0xc6   :  { %s7598_s2 = sld [smem:[#allocation33_spill]] }
  0xc7   :  { %255 = vperm.xlu1 %6082, %v224_v7   ;;  %250 = vperm.xlu0 %6081, %v223_v8   ;;  %v6089_v7 = vld [vmem:[%s6496_s25] sm:$0xff]   ;;  %v6090_v8 = vld [vmem:[%s6496_s25 + $0x8] sm:$0xff]  }
  0xc8   :  { %5547 = vmatprep.subr.bf16.mxu1 %v6089_v7 }
  0xc9   :  { %5548 = vmatpush3.bf16.msra.mxu1 %v6089_v7 }
  0xca   :  { %5553 = vmatprep.subr.bf16.mxu1 %v6090_v8 }
  0xcb   :  { %260 = vperm.xlu0 %6081, %v225_v9   ;;  %v5003_v9 = vld [vmem:[#allocation4] ss:$0 sm:$0xff] }
 0x13e   :  { %v241_v16 = vpop.permute.xlu1 %240  ;;  %v231_v17 = vpop.permute.xlu0 %230 }
 0x13f   :  { %v291_v21 = vmul.f32 %v288_v18, %v241_v16  ;;  %v289_v23 = vmul.f32 %v288_v18, %v231_v17  ;;  %v267_v39 = vmul.f32 %v266_v36, %v231_v17  ;;  %v269_v40 = vmul.f32 %v266_v36, %v241_v16 }
 0x140   :  { %v450_v56 = vmul.f32 %v449_v53, %v231_v17  ;;  %v452_v57 = vmul.f32 %v449_v53, %v241_v16 }
 0x142   :  { %v246_v19 = vpop.permute.xlu1 %245  ;;  %v236_v20 = vpop.permute.xlu0 %235 }
 0x143   :  { %v292_v22 = vmul.f32 %v288_v18, %v246_v19  ;;  %v290_v24 = vmul.f32 %v288_v18, %v236_v20  ;;  %v268_v37 = vmul.f32 %v266_v36, %v236_v20  ;;  %v270_v41 = vmul.f32 %v266_v36, %v246_v19 }
 0x144   :  { %v451_v54 = vmul.f32 %v449_v53, %v236_v20  ;;  %v453_v58 = vmul.f32 %v449_v53, %v246_v19 }
 0x145   :  { %v296_v27 = vpack.c.bf16 %v290_v24, %v289_v23  ;;  %v297_v31 = vpack.c.bf16 %v292_v22, %v291_v21  ;;  %v274_v43 = vpack.c.bf16 %v268_v37, %v267_v39  ;;  %v275_v49 = vpack.c.bf16 %v270_v41, %v269_v40 }
 0x146   :  { %v256_v25 = vpop.permute.xlu1 %255  ;;  %v251_v26 = vpop.permute.xlu0 %250  ;;  %v457_v60 = vpack.c.bf16 %v451_v54, %v450_v56  ;;  %v458_v1 = vpack.c.bf16 %v453_v58, %v452_v57 }
 0x147   :  { %v294_v29 = vmul.f32 %v288_v18, %v256_v25  ;;  %v293_v30 = vmul.f32 %v288_v18, %v251_v26  ;;  %5511 = vmatprep.subr.bf16.mxu0 %v296_v27  ;;  %v272_v47 = vmul.f32 %v266_v36, %v256_v25  ;;  %v271_v48 = vmul.f32 %v266_v36, %v251_v26 }
 0x148   :  { %5512 = vmatpush3.bf16.msra.mxu0 %v296_v27  ;;  %v455_v63 = vmul.f32 %v449_v53, %v256_v25  ;;  %v454_v0 = vmul.f32 %v449_v53, %v251_v26 }
 0x149   :  { %5513 = vmatprep.subr.bf16.mxu0 %v297_v31  ;;  %v298_v35 = vpack.c.bf16 %v294_v29, %v293_v30  ;;  %v276_v52 = vpack.c.bf16 %v272_v47, %v271_v48  ;;  %v6461_v29 = vmov 0.0  }
 0x14a   :  { %v261_v33 = vpop.permute.xlu0 %260  ;;  %v459_v3 = vpack.c.bf16 %v455_v63, %v454_v0  ;;  %v6094_v0 = vld [vmem:[%s6491_s21 + $0x10] sm:$0x7f]  }
 0x14b   :  { %v295_v34 = vmul.f32 %v288_v18, %v261_v33  ;;  %v273_v51 = vmul.f32 %v266_v36, %v261_v33  ;;  %v456_v2 = vmul.f32 %v449_v53, %v261_v33 }
 0x14c   :  { %5514 = vmatpush3.bf16.msra.mxu0 %v297_v31 }
 0x14d   :  { %5515 = vmatprep.subr.bf16.mxu0 %v298_v35  ;;  %v299_v38 = vpack.c.bf16 %v295_v34, %v295_v34  ;;  %v277_v55 = vpack.c.bf16 %v273_v51, %v273_v51  ;;  %v460_v4 = vpack.c.bf16 %v456_v2, %v456_v2  ;;  %v6096_v2 = vld [vmem:[%s6511_s8 + $0x10] sm:$0xff]  }
 0x14f   :  { %v324_v42 = vsel %vm322_vm1, %v299_v38, 0  ;;  %v392_v59 = vsel %vm322_vm1, %v277_v55, 0  ;;  %v483_v5 = vsel %vm322_vm1, %v460_v4, 0 }
 0x150   :  { %5516 = vmatpush3.bf16.msra.mxu0 %v298_v35 }
 0x151   :  { %6027 = vmatprep.subr.msk.bf16.mxu0 %vm322_vm1, %v299_v38 }
 0x154   :  { %5518 = vmatpush3.bf16.msra.mxu0 %v324_v42 }
 0x155   :  { %5523 = vmatprep.subr.bf16.mxu0 %v274_v43 }
 0x157   :  { %5520 = vmatmul.mubr.msk.bf16.vlgmr.msra.gmra.mrb[0].mxu0 %vm315_vm0, %v6084_v44  ;;  %v6093_v44 = vld [vmem:[%s6496_s25 + $0x10] sm:$0xff]   ;;  %s7588_s25 = sld [smem:[#allocation26_spill]] }
 0x158   :  { %5524 = vmatpush3.bf16.msra.mxu0 %v274_v43  ;;  %5531 = vmatprep.mubr.msk.bf16.mxu0 %vm315_vm0, %v6085_v45  ;;  %v6091_v43 = vld [vmem:[%s6491_s21 + $0x8] sm:$0x7f]   ;;  %s7587_s21 = sld [smem:[#allocation25_spill]] }
 0x159   :  { %5525 = vmatprep.subr.bf16.mxu0 %v275_v49 }
 0x15c   :  { %5526 = vmatpush3.bf16.msra.mxu0 %v275_v49 }
 0x15d   :  { %5527 = vmatprep.subr.bf16.mxu0 %v276_v52 }
 0x160   :  { %5528 = vmatpush3.bf16.msra.mxu0 %v276_v52 }
 0x161   :  { %6028 = vmatprep.subr.msk.bf16.mxu0 %vm322_vm1, %v277_v55 }
 0x164   :  { %5530 = vmatpush3.bf16.msra.mxu0 %v392_v59 }
 0x165   :  { %5535 = vmatprep.subr.bf16.mxu0 %v457_v60 }
 0x167   :  { %5532 = vmatmul.mubr.msk.bf16.vlgmr.msra.gmra.mrb[0].mxu0 %vm315_vm0, %v6086_v61 }
 0x168   :  { %5536 = vmatpush3.bf16.msra.mxu0 %v457_v60  ;;  %5543 = vmatprep.mubr.msk.bf16.mxu0 %vm315_vm0, %v6087_v62 }
 0x169   :  { %5537 = vmatprep.subr.bf16.mxu0 %v458_v1 }
 0x16c   :  { %5538 = vmatpush3.bf16.msra.mxu0 %v458_v1  ;;  %v6095_v1 = vld [vmem:[%s6511_s8] sm:$0xff]  }
 0x16d   :  { %5539 = vmatprep.subr.bf16.mxu0 %v459_v3 }
 0x170   :  { %5540 = vmatpush3.bf16.msra.mxu0 %v459_v3  ;;  %v6097_v3 = vld [vmem:[%s6511_s8 + $0x8] sm:$0xff]  }
 0x171   :  { %6029 = vmatprep.subr.msk.bf16.mxu0 %vm322_vm1, %v460_v4  ;;  %v6098_v4 = vld [vmem:[%s6511_s8 + $0x18] sm:$0xff]  }
 0x174   :  { %5542 = vmatpush3.bf16.msra.mxu0 %v483_v5 }
 0x175   :  { %5597 = vmatprep.subr.bf16.mxu0 %v6461_v29 }
 0x177   :  { %5544 = vmatmul.mubr.msk.bf16.vlgmr.msra.gmra.mrb[0].mxu0 %vm315_vm0, %v6088_v6  ;;  %v5027_v6 = vld [vmem:[#allocation6] ss:$0 sm:$0xff]  ;;  %vm1383_vm0 = vcmask 64512  }
 0x178   :  { %5601 = vmatprep.mubr.msk.bf16.mxu0 %vm6462_vm7, %v6461_v29  ;;  %5598 = vmatpush3.bf16.msra.mxu0 %v6096_v2 }
 0x179   :  { %5599 = vmatprep.subr.bf16.mxu0 %v6461_v29 }
 0x17c   :  { %5600 = vmatpush3.bf16.msra.mxu0 %v6098_v4 }
 0x17d   :  { %5611 = vmatprep.subr.bf16.mxu0 %v6461_v29 }
 0x24a   :  { %v5545_v10 = vpop.f32.mrb[0].mxu0 }
 0x24b   :  { %v547_v11 = vadd.f32 %v5545_v10, %v5003_v9  ;;  %v519_v12 = vpop.f32.mrb[1].mxu0 }
 0x24c   :  { %v545_v13 = vadd.f32 %v5003_v9, %v519_v12  ;;  %v5546_v15 = vpop.f32.mrb[2].mxu0 }
 0x24d   :  { %v555_v16 = vmul.f32 0.01, %v547_v11  ;;  %v548_v17 = vadd.f32 %v5546_v15, %v5003_v9  ;;  %v522_v18 = vpop.f32.mrb[3].mxu0  ;;  %vm551_vm2 = vcmp.gt.f32.partialorder %v547_v11, 0.0 }
 0x24e   :  { %v553_v19 = vmul.f32 0.01, %v545_v13  ;;  %v546_v20 = vadd.f32 %v5003_v9, %v522_v18  ;;  %vm549_vm3 = vcmp.gt.f32.partialorder %v545_v13, 0.0 }
 0x24f   :  { %vm552_vm4 = vcmp.gt.f32.partialorder %v548_v17, 0.0  ;;  %v556_v21 = vmul.f32 0.01, %v548_v17  ;;  %v559_v23 = vsel %vm551_vm2, %v547_v11, %v555_v16 }
 0x250   :  { %vm550_vm5 = vcmp.gt.f32.partialorder %v546_v20, 0.0  ;;  %v554_v22 = vmul.f32 0.01, %v546_v20  ;;  %v557_v25 = vsel %vm549_vm3, %v545_v13, %v553_v19 }
 0x251   :  { %v560_v24 = vsel %vm552_vm4, %v548_v17, %v556_v21 }
 0x252   :  { %v6692_v26 = vpack.c.bf16 %v560_v24, %v559_v23  ;;  %v558_v27 = vsel %vm550_vm5, %v546_v20, %v554_v22 }
 0x253   :  { %v6694_v28 = vpack.c.bf16 %v558_v27, %v557_v25 }
 0x255   :  { %5549 = vmatprep.mubr.msk.bf16.mxu1 %vm571_vm6, %v6694_v28 }
 0x256   :  { %5550 = vmatmul.mubr.msk.bf16.vlgmr.msra.gmra.mrb[0].mxu1 %vm571_vm6, %v6692_v26 }
 0x257   :  { %5555 = vmatprep.mubr.msk.bf16.mxu1 %vm571_vm6, %v6694_v28  ;;  %5554 = vmatpush3.bf16.msra.mxu1 %v6090_v8 }
 0x258   :  { %5559 = vmatprep.subr.bf16.mxu1 %v6461_v29 }
 0x25e   :  { %5556 = vmatmul.mubr.msk.bf16.vlgmr.msra.gmra.mrb[4].mxu1 %vm571_vm6, %v6692_v26 }
 0x25f   :  { %5563 = vmatprep.mubr.msk.bf16.mxu1 %vm6462_vm7, %v6461_v29 }
 0x329   :  { %v5551_v30 = vpop.f32.mrb[0].mxu1 }
 0x32a   :  { %v612_v31 = vpop.f32.mrb[1].mxu1 }
 0x32b   :  { %v5552_v32 = vpop.f32.mrb[2].mxu1 }
 0x32c   :  { %v628_v33 = vpack.c.bf16 %v5552_v32, %v5551_v30  ;;  %v615_v34 = vpop.f32.mrb[3].mxu1 }
 0x32d   :  { %v627_v35 = vpack.c.bf16 %v615_v34, %v612_v31 }
 0x32e   :  { %v757_v45 = vsel %vm703_vm8, %v628_v33, 0 }
 0x331   :  { %v5557_v36 = vpop.f32.mrb[4].mxu1 }
 0x332   :  { %v674_v37 = vpop.f32.mrb[5].mxu1 }
 0x333   :  { %v5558_v38 = vpop.f32.mrb[6].mxu1 }
 0x334   :  { %v690_v39 = vpack.c.bf16 %v5558_v38, %v5557_v36  ;;  %v677_v40 = vpop.f32.mrb[7].mxu1  ;;  %v995_v36 = vld [vmem:[%s7584_s5] sm:$0xf]  ;;  %v6100_v38 = vld [vmem:[%s6511_s8 + $0x28] sm:$0xff]  }
 0x335   :  { %v689_v41 = vpack.c.bf16 %v677_v40, %v674_v37  ;;  %v6099_v37 = vld [vmem:[%s6511_s8 + $0x20] sm:$0xff]   ;;  %s7589_s8 = sld [smem:[#allocation23_spill]] }
 0x336   :  { %v705_v42 = vsel %vm703_vm8, %v690_v39, 0 }
 0x337   :  { %5560 = vmatpush3.bf16.msra.mxu1 %v689_v41 }
 0x338   :  { %5561 = vmatprep.subr.bf16.mxu1 %v6461_v29 }
 0x33b   :  { %5562 = vmatpush3.bf16.msra.mxu1 %v705_v42 }
 0x33c   :  { %5567 = vmatprep.subr.bf16.mxu1 %v6461_v29 }
 0x33e   :  { %5564 = vmatmul.mubr.msk.bf16.vlgmr.msra.gmra.mrb[8].mxu1 %vm699_vm9, %v6091_v43 }
 0x33f   :  { %5568 = vmatpush3.bf16.msra.mxu1 %v627_v35  ;;  %5571 = vmatprep.mubr.msk.bf16.mxu1 %vm6462_vm7, %v6461_v29  ;;  %v5038_v35 = vld [vmem:[%s7584_s5 + $0x4] sm:$0xf] }
 0x340   :  { %5569 = vmatprep.subr.bf16.mxu1 %v6461_v29 }
 0x343   :  { %5570 = vmatpush3.bf16.msra.mxu1 %v757_v45 }
 0x344   :  { %5575 = vmatprep.subr.bf16.mxu1 %v6093_v44 }
 0x346   :  { %5572 = vmatmul.mubr.msk.bf16.vlgmr.msra.gmra.mrb[12].mxu1 %vm699_vm9, %v6092_v46 }
 0x347   :  { %5577 = vmatprep.mubr.msk.bf16.mxu1 %vm571_vm6, %v6694_v28  ;;  %5576 = vmatpush3.bf16.msra.mxu1 %v6093_v44 }
 0x348   :  { %5581 = vmatprep.subr.bf16.mxu1 %v6461_v29 }
 0x34e   :  { %5578 = vmatmul.mubr.msk.bf16.vlgmr.msra.gmra.mrb[16].mxu1 %vm571_vm6, %v6692_v26 }
 0x34f   :  { %5585 = vmatprep.mubr.msk.bf16.mxu1 %vm6462_vm7, %v6461_v29 }
 0x411   :  { %v741_v47 = vpop.f32.mrb[8].mxu1 }
 0x412   :  { %v5565_v48 = vpop.f32.mrb[9].mxu1 }
 0x413   :  { %v744_v49 = vpop.f32.mrb[10].mxu1 }
 0x414   :  { %v5566_v50 = vpop.f32.mrb[11].mxu1 }
 0x419   :  { %v793_v51 = vpop.f32.mrb[12].mxu1 }
 0x41a   :  { %v794_v52 = vadd.f32 %v793_v51, %v741_v47  ;;  %v5573_v53 = vpop.f32.mrb[13].mxu1 }
 0x41b   :  { %v796_v54 = vpop.f32.mrb[14].mxu1 }
 0x41c   :  { %v797_v55 = vadd.f32 %v796_v54, %v744_v49  ;;  %v5574_v56 = vpop.f32.mrb[15].mxu1  ;;  %v5048_v54 = vld [vmem:[%s7584_s5 + $0x8] sm:$0xf] }
 0x41d   :  { %v6102_v56 = vld [vmem:[%s7585_s9 + $0x8] sm:$0xff]  }
 0x421   :  { %v5579_v57 = vpop.f32.mrb[16].mxu1 }
 0x422   :  { %v843_v58 = vpop.f32.mrb[17].mxu1 }
 0x423   :  { %v5580_v59 = vpop.f32.mrb[18].mxu1 }
 0x424   :  { %v859_v60 = vpack.c.bf16 %v5580_v59, %v5579_v57  ;;  %v846_v61 = vpop.f32.mrb[19].mxu1 }
 0x425   :  { %v858_v62 = vpack.c.bf16 %v846_v61, %v843_v58  ;;  %v5050_v58 = vld [vmem:[#allocation8] ss:$0 sm:$0xff] }
 0x426   :  { %v872_v63 = vsel %vm703_vm8, %v859_v60, 0 }
 0x427   :  { %5582 = vmatpush3.bf16.msra.mxu1 %v858_v62 }
 0x428   :  { %5583 = vmatprep.subr.bf16.mxu1 %v6461_v29 }
 0x42b   :  { %5584 = vmatpush3.bf16.msra.mxu1 %v872_v63 }
 0x42c   :  { %5589 = vmatprep.subr.bf16.mxu1 %v6461_v29 }
 0x42e   :  { %5586 = vmatmul.mubr.msk.bf16.vlgmr.msra.gmra.mrb[20].mxu1 %vm699_vm9, %v6094_v0 }
 0x42f   :  { %5593 = vmatprep.mubr.msk.bf16.mxu1 %vm6462_vm7, %v6461_v29  ;;  %5590 = vmatpush3.bf16.msra.mxu1 %v6095_v1 }
 0x430   :  { %5591 = vmatprep.subr.bf16.mxu1 %v6461_v29 }
 0x433   :  { %5592 = vmatpush3.bf16.msra.mxu1 %v6097_v3 }
 0x434   :  { %5605 = vmatprep.subr.bf16.mxu1 %v6461_v29 }
 0x501   :  { %v908_v5 = vpop.f32.mrb[20].mxu1 }
 0x502   :  { %v915_v7 = vadd.f32 %v908_v5, %v794_v52  ;;  %v5587_v8 = vpop.f32.mrb[21].mxu1 }
 0x503   :  { %v911_v9 = vpop.f32.mrb[22].mxu1 }
 0x504   :  { %v924_v10 = vadd.f32 %v5027_v6, %v915_v7  ;;  %v916_v11 = vadd.f32 %v911_v9, %v797_v55  ;;  %v5588_v12 = vpop.f32.mrb[23].mxu1  ;;  %v6101_v55 = vld [vmem:[%s7585_s9] sm:$0xff]  }
 0x506   :  { %v928_v13 = vmul.f32 0.01, %v924_v10  ;;  %v925_v15 = vadd.f32 %v5027_v6, %v916_v11  ;;  %vm926_vm10 = vcmp.gt.f32.partialorder %v924_v10, 0.0 }
 0x508   :  { %vm927_vm11 = vcmp.gt.f32.partialorder %v925_v15, 0.0  ;;  %v929_v16 = vmul.f32 0.01, %v925_v15  ;;  %v930_v17 = vsel %vm926_vm10, %v924_v10, %v928_v13 }
 0x50a   :  { %v931_v18 = vsel %vm927_vm11, %v925_v15, %v929_v16  ;;  %v6797_v16 = vld [vmem:[%s7586_s13 + $0x8] sm:$0xff]  }
 0x50b   :  { %v6744_v19 = vpack.c.bf16 %v931_v18, %v930_v17  ;;  %v6800_v17 = vld [vmem:[%s7586_s13] sm:$0xff]   ;;  %v6105_v18 = vld [vmem:[%s7585_s9 + $0x10] sm:$0xff]  }
 0x50d   :  { %5594 = vmatmul.mubr.msk.bf16.vlgmr.msra.gmra.mrb[24].mxu1 %vm949_vm12, %v6744_v19  ;;  %5602 = vmatmul.mubr.msk.bf16.vlgmr.msra.gmra.mrb[4].mxu0 %vm949_vm12, %v6744_v19 }
 0x50e   :  { %5607 = vmatprep.mubr.msk.bf16.mxu1 %vm6462_vm7, %v6461_v29  ;;  %5613 = vmatprep.mubr.msk.bf16.mxu0 %vm6462_vm7, %v6461_v29 }
 0x5e0   :  { %v987_v20 = vpop.f32.mrb[24].mxu1  ;;  %v1047_v21 = vpop.f32.mrb[4].mxu0 }
 0x5e1   :  { %v5595_v22 = vpop.f32.mrb[25].mxu1  ;;  %v5603_v23 = vpop.f32.mrb[5].mxu0 }
 0x5e2   :  { %v990_v24 = vpop.f32.mrb[26].mxu1  ;;  %v1050_v25 = vpop.f32.mrb[6].mxu0 }
 0x5e3   :  { %v994_v27 = vpack.c.bf16 %v990_v24, %v987_v20  ;;  %v1054_v30 = vpack.c.bf16 %v1050_v25, %v1047_v21  ;;  %v5596_v31 = vpop.f32.mrb[27].mxu1  ;;  %v5604_v32 = vpop.f32.mrb[7].mxu0 }
 0x5e5   :  { %v1109_v33 = vsel %vm1061_vm13, %v994_v27, 0  ;;  %v1063_v34 = vsel %vm1061_vm13, %v1054_v30, 0 }
 0x5e6   :  { %5606 = vmatpush3.bf16.msra.mxu1 %v1063_v34  ;;  %5612 = vmatpush3.bf16.msra.mxu0 %v1109_v33 }
 0x5e7   :  { %5617 = vmatprep.subr.bf16.mxu1 %v6461_v29  ;;  %5625 = vmatprep.subr.bf16.mxu0 %v6461_v29 }
 0x5e9   :  { %5608 = vmatmul.mubr.msk.bf16.vlgmr.msra.gmra.mrb[28].mxu1 %vm1057_vm14, %v5038_v35  ;;  %5614 = vmatmul.mubr.msk.bf16.vlgmr.msra.gmra.mrb[8].mxu0 %vm1057_vm14, %v995_v36 }
 0x5ea   :  { %5618 = vmatpush3.bf16.msra.mxu1 %v6099_v37  ;;  %5621 = vmatprep.mubr.msk.bf16.mxu1 %vm6462_vm7, %v6461_v29 }
 0x5eb   :  { %5619 = vmatprep.subr.bf16.mxu1 %v6461_v29  ;;  %5627 = vmatprep.mubr.msk.bf16.mxu0 %vm6462_vm7, %v6461_v29 }
 0x5ee   :  { %5620 = vmatpush3.bf16.msra.mxu1 %v6100_v38 }
 0x5ef   :  { %5631 = vmatprep.subr.bf16.mxu1 %v6461_v29 }
 0x5f1   :  { %5622 = vmatmul.mubr.msk.bf16.vlgmr.msra.gmra.mrb[32].mxu1 %vm949_vm12, %v6744_v19 }
 0x5f2   :  { %5633 = vmatprep.mubr.msk.bf16.mxu1 %vm6462_vm7, %v6461_v29  ;;  %5632 = vmatpush3.bf16.msra.mxu1 %v6101_v55 }
 0x5f3   :  { %5643 = vmatprep.subr.bf16.mxu1 %v6461_v29 }
 0x6bc   :  { %v1099_v39 = vpop.f32.mrb[28].mxu1  ;;  %v1145_v40 = vpop.f32.mrb[8].mxu0 }
 0x6bd   :  { %v1146_v41 = vadd.f32 %v1145_v40, %v1099_v39  ;;  %v5609_v42 = vpop.f32.mrb[29].mxu1  ;;  %v5615_v43 = vpop.f32.mrb[9].mxu0  ;;  %v6106_v39 = vld [vmem:[%s7586_s13 + $0x10] sm:$0xff]   ;;  %v6107_v40 = vld [vmem:[%s7587_s21] sm:$0xff]  }
 0x6be   :  { %v1102_v44 = vpop.f32.mrb[30].mxu1  ;;  %v1148_v45 = vpop.f32.mrb[10].mxu0  ;;  %v6109_v42 = vld [vmem:[%s7587_s21 + $0x8] sm:$0xff]   ;;  %v6110_v43 = vld [vmem:[%s7587_s21 + $0x18] sm:$0xff]  }
 0x6bf   :  { %v5610_v46 = vpop.f32.mrb[31].mxu1  ;;  %v5616_v47 = vpop.f32.mrb[11].mxu0  ;;  %v5071_v45 = vld [vmem:[#allocation9] ss:$0 sm:$0xff] }
 0x6c4   :  { %v1202_v48 = vpop.f32.mrb[32].mxu1 }
 0x6c5   :  { %v5623_v49 = vpop.f32.mrb[33].mxu1 }
 0x6c6   :  { %v1205_v50 = vpop.f32.mrb[34].mxu1 }
 0x6c7   :  { %v1209_v51 = vpack.c.bf16 %v1205_v50, %v1202_v48  ;;  %v5624_v52 = vpop.f32.mrb[35].mxu1 }
 0x6c9   :  { %v1216_v53 = vsel %vm1061_vm13, %v1209_v51, 0 }
 0x6ca   :  { %5626 = vmatpush3.bf16.msra.mxu0 %v1216_v53 }
 0x6cb   :  { %5637 = vmatprep.subr.bf16.mxu0 %v6461_v29 }
 0x6cd   :  { %5628 = vmatmul.mubr.msk.bf16.vlgmr.msra.gmra.mrb[12].mxu0 %vm1057_vm14, %v5048_v54 }
 0x6ce   :  { %5639 = vmatprep.mubr.msk.bf16.mxu0 %vm6462_vm7, %v6461_v29  ;;  %5638 = vmatpush3.bf16.msra.mxu0 %v6102_v56 }
 0x6cf   :  { %5649 = vmatprep.subr.bf16.mxu0 %v6461_v29 }
 0x7a0   :  { %v1252_v57 = vpop.f32.mrb[12].mxu0 }
 0x7a1   :  { %v1258_v59 = vadd.f32 %v1252_v57, %v1146_v41  ;;  %v5629_v60 = vpop.f32.mrb[13].mxu0  ;;  %v6108_v41 = vld [vmem:[%s7587_s21 + $0x10] sm:$0xff]   ;;  %v6111_v57 = vld [vmem:[%s7587_s21 + $0x20] sm:$0xff]  }
 0x7a2   :  { %v1255_v61 = vpop.f32.mrb[14].mxu0  ;;  %v6113_v60 = vld [vmem:[%s7588_s25] sm:$0xff]  }
 0x7a3   :  { %v1266_v62 = vadd.f32 %v5050_v58, %v1258_v59  ;;  %v5630_v63 = vpop.f32.mrb[15].mxu0  ;;  %v6112_v59 = vld [vmem:[%s7587_s21 + $0x28] sm:$0xff]  }
 0x7a4   :  { %v6114_v61 = vld [vmem:[%s7588_s25 + $0x8] sm:$0xff]   ;;  %v6116_v63 = vld [vmem:[%s7588_s25 + $0x18] sm:$0xff]  }
 0x7a5   :  { %vm1267_vm15 = vcmp.gt.f32.partialorder %v1266_v62, 0.0  ;;  %v1268_v0 = vmul.f32 0.01, %v1266_v62 }
 0x7a7   :  { %v1269_v1 = vsel %vm1267_vm15, %v1266_v62, %v1268_v0  ;;  %v6115_v62 = vld [vmem:[%s7588_s25 + $0x10] sm:$0xff]   ;;  %v6117_v0 = vld [vmem:[%s7588_s25 + $0x20] sm:$0xff]  }
 0x7a8   :  { %v6784_v2 = vpack.c.bf16 %v1269_v1, %v1269_v1  ;;  %v6118_v1 = vld [vmem:[%s7588_s25 + $0x28] sm:$0xff]  }
 0x7aa   :  { %5634 = vmatmul.mubr.msk.bf16.vlgmr.msra.gmra.mrb[36].mxu1 %vm571_vm6, %v6784_v2  ;;  %5640 = vmatmul.mubr.msk.bf16.vlgmr.msra.gmra.mrb[16].mxu0 %vm571_vm6, %v6784_v2 }
 0x7ab   :  { %5645 = vmatprep.mubr.msk.bf16.mxu1 %vm6462_vm7, %v6461_v29  ;;  %5651 = vmatprep.mubr.msk.bf16.mxu0 %vm6462_vm7, %v6461_v29 }
 0x87d   :  { %v1316_v3 = vpop.f32.mrb[36].mxu1  ;;  %v1368_v4 = vpop.f32.mrb[16].mxu0 }
 0x87e   :  { %v1322_v5 = vpack.c.bf16 %v1316_v3, %v1316_v3  ;;  %v1374_v6 = vpack.c.bf16 %v1368_v4, %v1368_v4  ;;  %v5635_v7 = vpop.f32.mrb[37].mxu1  ;;  %v5641_v8 = vpop.f32.mrb[17].mxu0  ;;  %v6119_v3 = vld [vmem:[%s7589_s8 + $0x10] sm:$0xff]  }
 0x87f   :  { %v1319_v9 = vpop.f32.mrb[38].mxu1  ;;  %v1371_v10 = vpop.f32.mrb[18].mxu0 }
 0x880   :  { %v1440_v11 = vsel %vm322_vm1, %v1322_v5, 0  ;;  %v1388_v12 = vsel %vm322_vm1, %v1374_v6, 0  ;;  %v5636_v13 = vpop.f32.mrb[39].mxu1  ;;  %v5642_v15 = vpop.f32.mrb[19].mxu0 }
 0x881   :  { %5644 = vmatpush3.bf16.msra.mxu1 %v1388_v12  ;;  %5650 = vmatpush3.bf16.msra.mxu0 %v1440_v11  ;;  %v6120_v15 = vld [vmem:[%s7589_s8 + $0x18] sm:$0xff]  }
 0x882   :  { %5655 = vmatprep.subr.bf16.mxu1 %v6461_v29  ;;  %5661 = vmatprep.subr.bf16.mxu0 %v6461_v29 }
 0x884   :  { %5646 = vmatmul.mubr.msk.bf16.vlgmr.msra.gmra.mrb[40].mxu1 %vm1383_vm0, %v6797_v16  ;;  %5652 = vmatmul.mubr.msk.bf16.vlgmr.msra.gmra.mrb[20].mxu0 %vm1383_vm0, %v6800_v17 }
 0x885   :  { %5656 = vmatpush3.bf16.msra.mxu1 %v6105_v18  ;;  %5657 = vmatprep.mubr.msk.bf16.mxu1 %vm6462_vm7, %v6461_v29  ;;  %v6121_v18 = vld [vmem:[%s7589_s8] sm:$0xff]  }
 0x886   :  { %5663 = vmatprep.mubr.msk.bf16.mxu0 %vm6462_vm7, %v6461_v29  ;;  %5667 = vmatprep.subr.bf16.mxu1 %v6461_v29 }
 0x88c   :  { %5658 = vmatmul.mubr.msk.bf16.vlgmr.msra.gmra.mrb[44].mxu1 %vm571_vm6, %v6784_v2 }
 0x88d   :  { %5671 = vmatprep.mubr.msk.bf16.mxu1 %vm6462_vm7, %v6461_v29  ;;  %5668 = vmatpush3.bf16.msra.mxu1 %v6107_v40  ;;  %v6124_v40 = vld [vmem:[%s7589_s8 + $0x28] sm:$0xff]  }
 0x88e   :  { %5669 = vmatprep.subr.bf16.mxu1 %v6461_v29 }
 0x891   :  { %5670 = vmatpush3.bf16.msra.mxu1 %v6109_v42 }
 0x957   :  { %v1424_v20 = vpop.f32.mrb[40].mxu1  ;;  %v1476_v21 = vpop.f32.mrb[20].mxu0 }
 0x958   :  { %v1477_v22 = vadd.f32 %v1476_v21, %v1424_v20  ;;  %v5647_v23 = vpop.f32.mrb[41].mxu1  ;;  %v5653_v24 = vpop.f32.mrb[21].mxu0 }
 0x959   :  { %v1427_v25 = vpop.f32.mrb[42].mxu1  ;;  %v1479_v27 = vpop.f32.mrb[22].mxu0 }
 0x95a   :  { %v1480_v30 = vadd.f32 %v1479_v27, %v1427_v25  ;;  %v5648_v31 = vpop.f32.mrb[43].mxu1  ;;  %v5654_v32 = vpop.f32.mrb[23].mxu0 }
 0x95b   :  { %v6123_v32 = vld [vmem:[%s7589_s8 + $0x20] sm:$0xff]  }
 0x95f   :  { %v1526_v33 = vpop.f32.mrb[44].mxu1 }
 0x960   :  { %v1532_v34 = vpack.c.bf16 %v1526_v33, %v1526_v33  ;;  %v5659_v35 = vpop.f32.mrb[45].mxu1 }
 0x961   :  { %v1529_v36 = vpop.f32.mrb[46].mxu1 }
 0x962   :  { %v1545_v37 = vsel %vm322_vm1, %v1532_v34, 0  ;;  %v5660_v38 = vpop.f32.mrb[47].mxu1 }
 0x963   :  { %5662 = vmatpush3.bf16.msra.mxu0 %v1545_v37 }
 0x964   :  { %5675 = vmatprep.subr.bf16.mxu0 %v6461_v29 }
 0x966   :  { %5664 = vmatmul.mubr.msk.bf16.vlgmr.msra.gmra.mrb[24].mxu0 %vm1383_vm0, %v6106_v39 }
 0x967   :  { %5679 = vmatprep.mubr.msk.bf16.mxu0 %vm6462_vm7, %v6461_v29  ;;  %5676 = vmatpush3.bf16.msra.mxu0 %v6108_v41  ;;  %v6125_v41 = vld [vmem:[%s7590_s6 + $0x10] sm:$0xff]  }
 0x968   :  { %5677 = vmatprep.subr.bf16.mxu0 %v6461_v29 }
 0x96b   :  { %5678 = vmatpush3.bf16.msra.mxu0 %v6110_v43 }
 0x96c   :  { %5695 = vmatprep.subr.bf16.mxu0 %v6461_v29 }
 0xa39   :  { %v1581_v44 = vpop.f32.mrb[24].mxu0 }
 0xa3a   :  { %v1588_v46 = vadd.f32 %v1581_v44, %v1477_v22  ;;  %v5665_v47 = vpop.f32.mrb[25].mxu0 }
 0xa3b   :  { %v1584_v48 = vpop.f32.mrb[26].mxu0 }
 0xa3c   :  { %v1597_v49 = vadd.f32 %v5071_v45, %v1588_v46  ;;  %v1589_v50 = vadd.f32 %v1584_v48, %v1480_v30  ;;  %v5666_v51 = vpop.f32.mrb[27].mxu0  ;;  %v6122_v30 = vld [vmem:[%s7589_s8 + $0x8] sm:$0xff]   ;;  %v6126_v48 = vld [vmem:[%s7590_s6 + $0x18] sm:$0xff]  }
 0xa3d   :  { %v6128_v51 = vld [vmem:[%s7590_s6 + $0x8] sm:$0xff]  }
 0xa3e   :  { %v1601_v52 = vmul.f32 0.01, %v1597_v49  ;;  %v1598_v53 = vadd.f32 %v5071_v45, %v1589_v50  ;;  %vm1599_vm2 = vcmp.gt.f32.partialorder %v1597_v49, 0.0 }
 0xa40   :  { %vm1600_vm3 = vcmp.gt.f32.partialorder %v1598_v53, 0.0  ;;  %v1602_v54 = vmul.f32 0.01, %v1598_v53  ;;  %v1603_v55 = vsel %vm1599_vm2, %v1597_v49, %v1601_v52  ;;  %v6127_v49 = vld [vmem:[%s7590_s6] sm:$0xff]  }
 0xa41   :  { %v6129_v52 = vld [vmem:[%s7590_s6 + $0x20] sm:$0xff]  }
 0xa42   :  { %v1604_v56 = vsel %vm1600_vm3, %v1598_v53, %v1602_v54  ;;  %v6130_v54 = vld [vmem:[%s7590_s6 + $0x28] sm:$0xff]  }
 0xa43   :  { %v1605_v58 = vpack.c.bf16 %v1604_v56, %v1603_v55  ;;  %v6131_v55 = vld [vmem:[%s7591_s12] sm:$0xff]  }
 0xa44   :  { %v6132_v56 = vld [vmem:[%s7591_s12 + $0x20] sm:$0xff]  }
 0xa45   :  { %5672 = vmatmul.mubr.msk.bf16.vlgmr.msra.gmra.mrb[48].mxu1 %vm949_vm12, %v1605_v58  ;;  %5680 = vmatmul.mubr.msk.bf16.vlgmr.msra.gmra.mrb[28].mxu0 %vm949_vm12, %v1605_v58 }
 0xa46   :  { %5696 = vmatpush3.bf16.msra.mxu0 %v6111_v57  ;;  %5699 = vmatprep.mubr.msk.bf16.mxu0 %vm6462_vm7, %v6461_v29  ;;  %v5146_v57 = vld [vmem:[#allocation12] ss:$0 sm:$0xff] }
 0xa47   :  { %5697 = vmatprep.subr.bf16.mxu0 %v6461_v29  ;;  %5685 = vmatprep.mubr.msk.bf16.mxu1 %vm571_vm6, %v6119_v3 }
 0xa4a   :  { %5698 = vmatpush3.bf16.msra.mxu0 %v6112_v59 }
 0xa4b   :  { %5709 = vmatprep.subr.bf16.mxu0 %v6461_v29 }
 0xa4d   :  { %5700 = vmatmul.mubr.msk.bf16.vlgmr.msra.gmra.mrb[32].mxu0 %vm949_vm12, %v1605_v58 }
 0xa4e   :  { %5710 = vmatpush3.bf16.msra.mxu0 %v6113_v60  ;;  %5713 = vmatprep.mubr.msk.bf16.mxu0 %vm6462_vm7, %v6461_v29 }
 0xa4f   :  { %5711 = vmatprep.subr.bf16.mxu0 %v6461_v29 }
 0xa52   :  { %5712 = vmatpush3.bf16.msra.mxu0 %v6114_v61 }
 0xa53   :  { %5717 = vmatprep.subr.bf16.mxu0 %v6461_v29 }
 0xa55   :  { %5714 = vmatmul.mubr.msk.bf16.vlgmr.msra.gmra.mrb[36].mxu0 %vm949_vm12, %v6744_v19 }
 0xa56   :  { %5718 = vmatpush3.bf16.msra.mxu0 %v6115_v62  ;;  %5721 = vmatprep.mubr.msk.bf16.mxu0 %vm6462_vm7, %v6461_v29 }
 0xa57   :  { %5719 = vmatprep.subr.bf16.mxu0 %v6461_v29 }
 0xa5a   :  { %5720 = vmatpush3.bf16.msra.mxu0 %v6116_v63 }
 0xa5b   :  { %5737 = vmatprep.subr.bf16.mxu0 %v6461_v29 }
 0xa5d   :  { %5722 = vmatmul.mubr.msk.bf16.vlgmr.msra.gmra.mrb[40].mxu0 %vm949_vm12, %v6744_v19 }
 0xa5e   :  { %5738 = vmatpush3.bf16.msra.mxu0 %v6117_v0  ;;  %5741 = vmatprep.mubr.msk.bf16.mxu0 %vm6462_vm7, %v6461_v29 }
 0xa5f   :  { %5739 = vmatprep.subr.bf16.mxu0 %v6461_v29 }
 0xa62   :  { %5740 = vmatpush3.bf16.msra.mxu0 %v6118_v1 }
 0xa65   :  { %5742 = vmatmul.mubr.msk.bf16.vlgmr.msra.gmra.mrb[44].mxu0 %vm949_vm12, %v6744_v19 }
 0xa66   :  { %5755 = vmatprep.mubr.msk.bf16.mxu0 %vm949_vm12, %v6131_v55 }
 0xb18   :  { %v1659_v4 = vpop.f32.mrb[48].mxu1  ;;  %v1722_v5 = vpop.f32.mrb[28].mxu0 }
 0xb19   :  { %v5673_v6 = vpop.f32.mrb[49].mxu1  ;;  %v5681_v7 = vpop.f32.mrb[29].mxu0 }
 0xb1a   :  { %v1662_v8 = vpop.f32.mrb[50].mxu1  ;;  %v1725_v9 = vpop.f32.mrb[30].mxu0 }
 0xb1b   :  { %v1666_v10 = vpack.c.bf16 %v1662_v8, %v1659_v4  ;;  %v1729_v11 = vpack.c.bf16 %v1725_v9, %v1722_v5  ;;  %v5674_v12 = vpop.f32.mrb[51].mxu1  ;;  %v5682_v13 = vpop.f32.mrb[31].mxu0 }
 0xb1c   :  { %v6133_v13 = vld [vmem:[%s7591_s12 + $0x8] sm:$0xff]  }
 0xb1d   :  { %5683 = vmatprep.subr.bf16.mxu1 %v1729_v11 }
 0xb1e   :  { %5684 = vmatpush3.bf16.msra.mxu1 %v1729_v11 }
 0xb1f   :  { %5689 = vmatprep.subr.bf16.mxu1 %v1666_v10 }
 0xb20   :  { %v1916_v20 = vpop.f32.mrb[32].mxu0 }
 0xb21   :  { %5686 = vmatmul.mubr.msk.bf16.vlgmr.msra.gmra.mrb[52].mxu1 %vm571_vm6, %v6120_v15  ;;  %v5701_v21 = vpop.f32.mrb[33].mxu0  ;;  %v6134_v15 = vld [vmem:[%s7591_s12 + $0x28] sm:$0xff]  }
 0xb22   :  { %5690 = vmatpush3.bf16.msra.mxu1 %v1666_v10  ;;  %v1919_v22 = vpop.f32.mrb[34].mxu0  ;;  %5691 = vmatprep.mubr.msk.bf16.mxu1 %vm571_vm6, %v6121_v18  ;;  %v6135_v18 = vld [vmem:[%s7591_s12 + $0x10] sm:$0xff]   ;;  %v2914_v21 = vsel %vm703_vm8, %v6692_v26, 0 }
 0xb23   :  { %v1923_v23 = vpack.c.bf16 %v1919_v22, %v1916_v20  ;;  %v5702_v24 = vpop.f32.mrb[35].mxu0  ;;  %v6136_v20 = vld [vmem:[%s7591_s12 + $0x30] sm:$0xff]   ;;  %v6137_v22 = vld [vmem:[%s7591_s12 + $0x18] sm:$0xff]  }
 0xb24   :  { %v6139_v24 = vld [vmem:[%s7591_s12 + $0x40] sm:$0xff]  }
 0xb25   :  { %5703 = vmatprep.subr.bf16.mxu1 %v1923_v23 }
 0xb28   :  { %v2048_v25 = vpop.f32.mrb[36].mxu0 }
 0xb29   :  { %v5715_v27 = vpop.f32.mrb[37].mxu0 }
 0xb2a   :  { %v2051_v31 = vpop.f32.mrb[38].mxu0  ;;  %v6141_v27 = vld [vmem:[%s7591_s12 + $0x48] sm:$0xff]  }
 0xb2b   :  { %v2055_v33 = vpack.c.bf16 %v2051_v31, %v2048_v25  ;;  %v5716_v34 = vpop.f32.mrb[39].mxu0  ;;  %v6140_v25 = vld [vmem:[%s7592_s26] sm:$0xff]   ;;  %v6143_v31 = vld [vmem:[%s7591_s12 + $0x50] sm:$0xff]  }
 0xb2c   :  { %v6152_v34 = vld [vmem:[%s7592_s26 + $0x18] sm:$0xff]  }
 0xb2d   :  { %5692 = vmatmul.mubr.msk.bf16.vlgmr.msra.gmra.mrb[52].mxu1 %vm571_vm6, %v6122_v30  ;;  %v2209_v50 = vsel %vm1061_vm13, %v2055_v33, 0  ;;  %v6142_v30 = vld [vmem:[%s7592_s26 + $0x8] sm:$0xff]  }
 0xb2e   :  { %5704 = vmatpush3.bf16.msra.mxu1 %v1923_v23  ;;  %5705 = vmatprep.mubr.msk.bf16.mxu1 %vm571_vm6, %v6123_v32  ;;  %v6138_v23 = vld [vmem:[%s7591_s12 + $0x38] sm:$0xff]   ;;  %v6151_v32 = vld [vmem:[%s7592_s26 + $0x10] sm:$0xff]  }
 0xb30   :  { %v2111_v35 = vpop.f32.mrb[40].mxu0 }
 0xb31   :  { %v5723_v36 = vpop.f32.mrb[41].mxu0 }
 0xb32   :  { %v2114_v37 = vpop.f32.mrb[42].mxu0  ;;  %v6154_v36 = vld [vmem:[%s7592_s26 + $0x48] sm:$0xff]  }
 0xb33   :  { %v2118_v38 = vpack.c.bf16 %v2114_v37, %v2111_v35  ;;  %v5724_v39 = vpop.f32.mrb[43].mxu0  ;;  %v6153_v35 = vld [vmem:[%s7592_s26 + $0x40] sm:$0xff]   ;;  %v6147_v37 = vld [vmem:[%s7592_s26 + $0x30] sm:$0xff]  }
 0xb34   :  { %v6155_v39 = vld [vmem:[%s7592_s26 + $0x50] sm:$0xff]  }
 0xb35   :  { %6030 = vmatprep.subr.msk.bf16.mxu1 %vm1061_vm13, %v2118_v38  ;;  %v2141_v43 = vsel %vm1061_vm13, %v2118_v38, 0  ;;  %v6149_v38 = vld [vmem:[%s7593_s1] sm:$0xff]  }
 0xb38   :  { %v2311_v42 = vpop.f32.mrb[44].mxu0 }
 0xb39   :  { %5706 = vmatmul.mubr.msk.bf16.vlgmr.msra.gmra.mrb[52].mxu1 %vm571_vm6, %v6124_v40  ;;  %v5743_v44 = vpop.f32.mrb[45].mxu0  ;;  %v6148_v40 = vld [vmem:[%s7592_s26 + $0x38] sm:$0xff]  }
 0xb3a   :  { %5726 = vmatpush3.bf16.msra.mxu1 %v2141_v43  ;;  %v2314_v45 = vpop.f32.mrb[46].mxu0  ;;  %5727 = vmatprep.mubr.msk.bf16.mxu1 %vm1057_vm14, %v6125_v41  ;;  %v6156_v41 = vld [vmem:[%s7592_s26 + $0x58] sm:$0xff]   ;;  %v2530_v43 = vld [vmem:[%s7594_s30] sm:$0x1]  ;;  %v5171_v44 = vld [vmem:[%s7594_s30 + $0x1] sm:$0x1] }
 0xb3b   :  { %6031 = vmatprep.subr.msk.bf16.mxu1 %vm1061_vm13, %v2055_v33  ;;  %v2318_v46 = vpack.c.bf16 %v2314_v45, %v2311_v42  ;;  %v5744_v47 = vpop.f32.mrb[47].mxu0  ;;  %v6144_v33 = vld [vmem:[%s7591_s12 + $0x58] sm:$0xff]   ;;  %v6150_v42 = vld [vmem:[%s7593_s1 + $0x8] sm:$0xff]   ;;  %v2531_v45 = vunpack.c.l.bf16 %v2530_v43 }
 0xb3d   :  { %v2341_v53 = vsel %vm1061_vm13, %v2318_v46, 0  ;;  %v6976_v47 = vrot.slane %v2531_v45, %v6667_v14 }
 0xb45   :  { %5728 = vmatmul.mubr.msk.bf16.vlgmr.msra.gmra.mrb[52].mxu1 %vm1057_vm14, %v6126_v48 }
 0xb46   :  { %5732 = vmatpush3.bf16.msra.mxu1 %v2209_v50  ;;  %5733 = vmatprep.mubr.msk.bf16.mxu1 %vm1057_vm14, %v6127_v49 }
 0xb47   :  { %6032 = vmatprep.subr.msk.bf16.mxu1 %vm1061_vm13, %v2318_v46  ;;  %v2676_v46 = vunpack.c.l.bf16 %v5171_v44 }
 0xb49   :  { %v6979_v48 = vrot.slane %v2676_v46, %v6667_v14 }
 0xb51   :  { %5734 = vmatmul.mubr.msk.bf16.vlgmr.msra.gmra.mrb[52].mxu1 %vm1057_vm14, %v6128_v51 }
 0xb52   :  { %5746 = vmatpush3.bf16.msra.mxu1 %v2341_v53  ;;  %5747 = vmatprep.mubr.msk.bf16.mxu1 %vm1057_vm14, %v6129_v52 }
 0xb5d   :  { %5748 = vmatmul.mubr.msk.bf16.vlgmr.msra.gmra.mrb[52].mxu1 %vm1057_vm14, %v6130_v54 }
 0xb5e   :  { %5767 = vmatprep.mubr.msk.bf16.mxu1 %vm949_vm12, %v6132_v56 }
 0xc30   :  { %v5749_v58 = vpop.f32.mrb[52].mxu1 }
 0xc31   :  { %v2409_v59 = vadd.f32 %v5749_v58, %v5146_v57  ;;  %v2377_v60 = vpop.f32.mrb[53].mxu1 }
 0xc32   :  { %v2407_v61 = vadd.f32 %v5146_v57, %v2377_v60  ;;  %v5750_v62 = vpop.f32.mrb[54].mxu1 }
 0xc33   :  { %v2417_v63 = vmul.f32 0.01, %v2409_v59  ;;  %v2410_v0 = vadd.f32 %v5750_v62, %v5146_v57  ;;  %v2380_v1 = vpop.f32.mrb[55].mxu1  ;;  %vm2413_vm4 = vcmp.gt.f32.partialorder %v2409_v59, 0.0 }
 0xc34   :  { %v2415_v3 = vmul.f32 0.01, %v2407_v61  ;;  %v2408_v4 = vadd.f32 %v5146_v57, %v2380_v1  ;;  %vm2411_vm5 = vcmp.gt.f32.partialorder %v2407_v61, 0.0 }
 0xc35   :  { %vm2414_vm10 = vcmp.gt.f32.partialorder %v2410_v0, 0.0  ;;  %v2418_v5 = vmul.f32 0.01, %v2410_v0  ;;  %v2421_v7 = vsel %vm2413_vm4, %v2409_v59, %v2417_v63 }
 0xc36   :  { %vm2412_vm11 = vcmp.gt.f32.partialorder %v2408_v4, 0.0  ;;  %v2416_v6 = vmul.f32 0.01, %v2408_v4  ;;  %v2419_v9 = vsel %vm2411_vm5, %v2407_v61, %v2415_v3 }
 0xc37   :  { %v2422_v8 = vsel %vm2414_vm10, %v2410_v0, %v2418_v5 }
 0xc38   :  { %v2424_v10 = vpack.c.bf16 %v2422_v8, %v2421_v7  ;;  %v2420_v11 = vsel %vm2412_vm11, %v2408_v4, %v2416_v6 }
 0xc39   :  { %v2423_v12 = vpack.c.bf16 %v2420_v11, %v2419_v9 }
 0xc3b   :  { %5751 = vmatprep.subr.bf16.mxu0 %v2423_v12  ;;  %5763 = vmatprep.subr.bf16.mxu1 %v2423_v12 }
 0xc3c   :  { %5752 = vmatpush3.bf16.msra.mxu0 %v2423_v12  ;;  %5764 = vmatpush3.bf16.msra.mxu1 %v2423_v12 }
 0xc3d   :  { %5753 = vmatprep.subr.bf16.mxu0 %v2424_v10  ;;  %5765 = vmatprep.subr.bf16.mxu1 %v2424_v10 }
 0xc40   :  { %5754 = vmatpush3.bf16.msra.mxu0 %v2424_v10  ;;  %5766 = vmatpush3.bf16.msra.mxu1 %v2424_v10 }
 0xc41   :  { %5775 = vmatprep.subr.bf16.mxu0 %v2423_v12  ;;  %5787 = vmatprep.subr.bf16.mxu1 %v6694_v28 }
 0xc43   :  { %5756 = vmatmul.mubr.msk.bf16.vlgmr.msra.gmra.mrb[48].mxu0 %vm949_vm12, %v6133_v13  ;;  %5768 = vmatmul.mubr.msk.bf16.vlgmr.msra.gmra.mrb[56].mxu1 %vm949_vm12, %v6134_v15 }
 0xc44   :  { %5776 = vmatpush3.bf16.msra.mxu0 %v2423_v12  ;;  %5788 = vmatpush3.bf16.msra.mxu1 %v6694_v28 }
 0xc45   :  { %5777 = vmatprep.subr.bf16.mxu0 %v2424_v10  ;;  %6033 = vmatprep.subr.msk.bf16.mxu1 %vm703_vm8, %v6692_v26 }
 0xc46   :  { %5759 = vmatprep.mubr.msk.bf16.mxu0 %vm949_vm12, %v6135_v18  ;;  %5771 = vmatprep.mubr.msk.bf16.mxu1 %vm949_vm12, %v6136_v20 }
 0xc48   :  { %5778 = vmatpush3.bf16.msra.mxu0 %v2424_v10  ;;  %5790 = vmatpush3.bf16.msra.mxu1 %v2914_v21 }
 0xc49   :  { %5799 = vmatprep.subr.bf16.mxu0 %v6694_v28  ;;  %5811 = vmatprep.subr.bf16.mxu1 %v6694_v28 }
 0xc4b   :  { %5760 = vmatmul.mubr.msk.bf16.gmra.mrb[52].mxu0 %vm949_vm12, %v6137_v22  ;;  %5772 = vmatmul.mubr.msk.bf16.gmra.mrb[60].mxu1 %vm949_vm12, %v6138_v23 }
 0xc4c   :  { %5779 = vmatprep.mubr.msk.bf16.mxu0 %vm949_vm12, %v6139_v24  ;;  %5791 = vmatprep.mubr.msk.bf16.mxu1 %vm699_vm9, %v6140_v25 }
 0xc53   :  { %5780 = vmatmul.mubr.msk.bf16.vlgmr.msra.gmra.mrb[56].mxu0 %vm949_vm12, %v6141_v27  ;;  %5792 = vmatmul.mubr.msk.bf16.vlgmr.msra.gmra.mrb[64].mxu1 %vm699_vm9, %v6142_v30 }
 0xc54   :  { %5800 = vmatpush3.bf16.msra.mxu0 %v6694_v28  ;;  %5812 = vmatpush3.bf16.msra.mxu1 %v6694_v28  ;;  %v6145_v28 = vld [vmem:[%s7592_s26 + $0x20] sm:$0xff]  }
 0xc55   :  { %6034 = vmatprep.subr.msk.bf16.mxu0 %vm703_vm8, %v6692_v26  ;;  %6035 = vmatprep.subr.msk.bf16.mxu1 %vm703_vm8, %v6692_v26  ;;  %v6146_v26 = vld [vmem:[%s7592_s26 + $0x28] sm:$0xff]   ;;  %vm4920_vm8 = vcmask 7168  }
 0xc56   :  { %5783 = vmatprep.mubr.msk.bf16.mxu0 %vm949_vm12, %v6143_v31  ;;  %5795 = vmatprep.mubr.msk.bf16.mxu1 %vm699_vm9, %v6151_v32 }
 0xc58   :  { %5802 = vmatpush3.bf16.msra.mxu0 %v2914_v21  ;;  %5814 = vmatpush3.bf16.msra.mxu1 %v2914_v21 }
 0xc59   :  { %5823 = vmatprep.subr.bf16.mxu0 %v6461_v29  ;;  %5835 = vmatprep.subr.bf16.mxu1 %v6461_v29 }
 0xc5b   :  { %5784 = vmatmul.mubr.msk.bf16.gmra.mrb[60].mxu0 %vm949_vm12, %v6144_v33  ;;  %5796 = vmatmul.mubr.msk.bf16.gmra.mrb[68].mxu1 %vm699_vm9, %v6152_v34 }
 0xc5c   :  { %5803 = vmatprep.mubr.msk.bf16.mxu0 %vm699_vm9, %v6145_v28  ;;  %5815 = vmatprep.mubr.msk.bf16.mxu1 %vm699_vm9, %v6153_v35 }
 0xc63   :  { %5804 = vmatmul.mubr.msk.bf16.vlgmr.msra.gmra.mrb[64].mxu0 %vm699_vm9, %v6146_v26  ;;  %5816 = vmatmul.mubr.msk.bf16.vlgmr.msra.gmra.mrb[72].mxu1 %vm699_vm9, %v6154_v36  ;;  %v5188_v36 = vld [vmem:[%s7594_s30 + $0x2] sm:$0x1] }
 0xc64   :  { %5807 = vmatprep.mubr.msk.bf16.mxu0 %vm699_vm9, %v6147_v37  ;;  %5824 = vmatpush3.bf16.msra.mxu0 %v6149_v38 }
 0xc65   :  { %5829 = vmatprep.subr.bf16.mxu0 %v6461_v29  ;;  %5819 = vmatprep.mubr.msk.bf16.mxu1 %vm699_vm9, %v6155_v39 }
 0xc6b   :  { %5808 = vmatmul.mubr.msk.bf16.gmra.mrb[68].mxu0 %vm699_vm9, %v6148_v40  ;;  %5820 = vmatmul.mubr.msk.bf16.gmra.mrb[76].mxu1 %vm699_vm9, %v6156_v41  ;;  %v2981_v40 = vld [vmem:[%s7595_s28] sm:$0x1] }
 0xc6c   :  { %5825 = vmatprep.mubr.msk.bf16.mxu0 %vm6462_vm7, %v6461_v29  ;;  %5837 = vmatprep.mubr.msk.bf16.mxu1 %vm6462_vm7, %v6461_v29 }
 0xc73   :  { %5826 = vmatmul.mubr.msk.bf16.vlgmr.msra.gmra.mrb[72].mxu0 %vm571_vm6, %v6784_v2 }
 0xc74   :  { %5830 = vmatpush3.bf16.msra.mxu0 %v6150_v42  ;;  %5831 = vmatprep.mubr.msk.bf16.mxu0 %vm6462_vm7, %v6461_v29  ;;  %v2829_v42 = vunpack.c.l.bf16 %v5188_v36 }
 0xc75   :  { %5841 = vmatprep.subr.bf16.mxu0 %v6461_v29 }
 0xc7b   :  { %5832 = vmatmul.mubr.msk.bf16.vlgmr.msra.gmra.mrb[76].mxu0 %vm571_vm6, %v6784_v2 }
 0xc7c   :  { %5843 = vmatprep.mubr.msk.bf16.mxu0 %vm6462_vm7, %v6461_v29 }
 0xd16   :  { %v5757_v49 = vpop.f32.mrb[48].mxu0  ;;  %v5769_v50 = vpop.f32.mrb[56].mxu1 }
 0xd17   :  { %v2538_v51 = vmul.f32 %v5757_v49, %v6976_v47  ;;  %v2499_v52 = vpop.f32.mrb[49].mxu0  ;;  %v2683_v53 = vmul.f32 %v5769_v50, %v6979_v48  ;;  %v2643_v54 = vpop.f32.mrb[57].mxu1  ;;  %v2982_v50 = vunpack.c.l.bf16 %v2981_v40 }
 0xd18   :  { %v2536_v55 = vmul.f32 %v6976_v47, %v2499_v52  ;;  %v5758_v56 = vpop.f32.mrb[50].mxu0  ;;  %v5770_v57 = vpop.f32.mrb[58].mxu1  ;;  %v2681_v63 = vmul.f32 %v6979_v48, %v2643_v54  ;;  %v4717_v54 = vld [vmem:[%s6614_s4] sm:$0x1] }
 0xd19   :  { %v2502_v58 = vpop.f32.mrb[51].mxu0  ;;  %v2550_v59 = vsel %vm571_vm6, %v2538_v51, 0.0  ;;  %v2646_v60 = vpop.f32.mrb[59].mxu1  ;;  %v2539_v61 = vmul.f32 %v5758_v56, %v6976_v47  ;;  %v2695_v0 = vsel %vm571_vm6, %v2683_v53, 0.0  ;;  %v2684_v1 = vmul.f32 %v5770_v57, %v6979_v48 }
 0xd1a   :  { %2551 = vadd.xlane.f32.xlu0 %v2550_v59  ;;  %v2544_v62 = vsel %vm571_vm6, %v2536_v55, 0.0  ;;  %v2689_v7 = vsel %vm571_vm6, %v2681_v63, 0.0  ;;  %v2682_v10 = vmul.f32 %v6979_v48, %v2646_v60  ;;  %v2537_v13 = vmul.f32 %v6976_v47, %v2502_v58 }
 0xd1b   :  { %2545 = vadd.xlane.f32.xlu1 %v2544_v62  ;;  %v2553_v4 = vsel %vm571_vm6, %v2539_v61, 0.0  ;;  %v2698_v11 = vsel %vm571_vm6, %v2684_v1, 0.0  ;;  %v4718_v61 = vunpack.c.l.bf16 %v4717_v54 }
 0xd1c   :  { %v2692_v20 = vsel %vm571_vm6, %v2682_v10, 0.0  ;;  %v2547_v22 = vsel %vm571_vm6, %v2537_v13, 0.0 }
 0xd1e   :  { %2696 = vadd.xlane.f32.xlu0 %v2695_v0  ;;  %v5761_v3 = vpop.f32.mrb[52].mxu0  ;;  %v5773_v5 = vpop.f32.mrb[60].mxu1 }
 0xd1f   :  { %2554 = vadd.xlane.f32.xlu1 %v2553_v4  ;;  %v2515_v6 = vpop.f32.mrb[53].mxu0  ;;  %v2659_v8 = vpop.f32.mrb[61].mxu1  ;;  %v2542_v21 = vmul.f32 %v5761_v3, %v6976_v47  ;;  %v2687_v30 = vmul.f32 %v5773_v5, %v6979_v48 }
 0xd20   :  { %v5762_v9 = vpop.f32.mrb[54].mxu0  ;;  %v5774_v12 = vpop.f32.mrb[62].mxu1  ;;  %v2540_v41 = vmul.f32 %v6976_v47, %v2515_v6  ;;  %v2685_v46 = vmul.f32 %v6979_v48, %v2659_v8  ;;  %v7059_v6 = vrot.slane %v4718_v61, %v6667_v14 }
 0xd21   :  { %v2518_v15 = vpop.f32.mrb[55].mxu0  ;;  %v2662_v18 = vpop.f32.mrb[63].mxu1  ;;  %v2543_v23 = vmul.f32 %v5762_v9, %v6976_v47  ;;  %v2688_v33 = vmul.f32 %v5774_v12, %v6979_v48  ;;  %v2562_v35 = vsel %vm571_vm6, %v2542_v21, 0.0  ;;  %v2707_v38 = vsel %vm571_vm6, %v2687_v30, 0.0 }
 0xd22   :  { %2690 = vadd.xlane.f32.xlu0 %v2689_v7  ;;  %v2541_v43 = vmul.f32 %v6976_v47, %v2518_v15  ;;  %v2686_v53 = vmul.f32 %v6979_v48, %v2662_v18  ;;  %v7035_v47 = vrot.slane %v2829_v42, %v6667_v14  ;;  %v2556_v57 = vsel %vm571_vm6, %v2540_v41, 0.0  ;;  %v5308_v7 = vld [vmem:[%s6614_s4 + $0x2] sm:$0x1] }
 0xd23   :  { %2699 = vadd.xlane.f32.xlu1 %v2698_v11  ;;  %v2565_v37 = vsel %vm571_vm6, %v2543_v23, 0.0  ;;  %v2710_v39 = vsel %vm571_vm6, %v2688_v33, 0.0  ;;  %v2701_v60 = vsel %vm571_vm6, %v2685_v46, 0.0  ;;  %v7045_v48 = vrot.slane %v2982_v50, %v6667_v14 }
 0xd24   :  { %v2559_v59 = vsel %vm571_vm6, %v2541_v43, 0.0  ;;  %v2704_v62 = vsel %vm571_vm6, %v2686_v53, 0.0 }
 0xd26   :  { %2548 = vadd.xlane.f32.xlu0 %v2547_v22  ;;  %v5781_v24 = vpop.f32.mrb[56].mxu0  ;;  %v6999_v25 = vpop.f32.mrb[64].mxu1 }
 0xd27   :  { %2693 = vadd.xlane.f32.xlu1 %v2692_v20  ;;  %v7001_v27 = vpop.f32.mrb[57].mxu0  ;;  %v7004_v31 = vpop.f32.mrb[65].mxu1  ;;  %v2836_v63 = vmul.f32 %v5781_v24, %v7035_v47  ;;  %v2989_v5 = vmul.f32 %v6999_v25, %v7045_v48  ;;  %v4804_v20 = vunpack.c.l.bf16 %v5308_v7  ;;  %v4725_v21 = vmul.f32 %v6999_v25, %v7059_v6 }
 0xd28   :  { %v5782_v32 = vpop.f32.mrb[58].mxu0  ;;  %v5794_v34 = vpop.f32.mrb[66].mxu1  ;;  %v2834_v40 = vmul.f32 %v7035_v47, %v7001_v27  ;;  %v2987_v46 = vmul.f32 %v7045_v48, %v7004_v31 }
 0xd29   :  { %v7007_v28 = vpop.f32.mrb[59].mxu0  ;;  %v7010_v26 = vpop.f32.mrb[67].mxu1  ;;  %v2837_v0 = vmul.f32 %v5782_v32, %v7035_v47  ;;  %v2990_v10 = vmul.f32 %v5794_v34, %v7045_v48  ;;  %v2848_v13 = vsel %vm571_vm6, %v2836_v63, 0.0  ;;  %v3001_v22 = vsel %vm571_vm6, %v2989_v5, 0.0 }
 0xd2a   :  { %2563 = vadd.xlane.f32.xlu0 %v2562_v35  ;;  %v4726_v23 = vmul.f32 %v5794_v34, %v7059_v6  ;;  %v7083_v32 = vrot.slane %v4804_v20, %v6667_v14  ;;  %v4737_v25 = vsel %vm571_vm6, %v4725_v21, 0.0  ;;  %v2835_v43 = vmul.f32 %v7035_v47, %v7007_v28 }
 0xd2b   :  { %2566 = vadd.xlane.f32.xlu1 %v2565_v37  ;;  %v2851_v18 = vsel %vm571_vm6, %v2837_v0, 0.0  ;;  %v3004_v24 = vsel %vm571_vm6, %v2990_v10, 0.0  ;;  %v2988_v53 = vmul.f32 %v7045_v48, %v7010_v26  ;;  %v2842_v27 = vsel %vm571_vm6, %v2834_v40, 0.0 }
 0xd2c   :  { %v4740_v34 = vsel %vm571_vm6, %v4726_v23, 0.0  ;;  %v4723_v28 = vmul.f32 %v7059_v6, %v7004_v31  ;;  %v2995_v61 = vsel %vm571_vm6, %v2987_v46, 0.0 }
 0xd2d   :  { %v2998_v0 = vsel %vm571_vm6, %v2988_v53, 0.0 }
 0xd2e   :  { %2708 = vadd.xlane.f32.xlu0 %v2707_v38  ;;  %v7019_v44 = vpop.f32.mrb[60].mxu0  ;;  %v7021_v45 = vpop.f32.mrb[68].mxu1  ;;  %v4731_v10 = vsel %vm571_vm6, %v4723_v28, 0.0 }
 0xd2f   :  { %2711 = vadd.xlane.f32.xlu1 %v2710_v39  ;;  %v7024_v49 = vpop.f32.mrb[61].mxu0  ;;  %v7026_v51 = vpop.f32.mrb[69].mxu1  ;;  %v4729_v40 = vmul.f32 %v7021_v45, %v7059_v6 }
 0xd30   :  { %v7028_v52 = vpop.f32.mrb[62].mxu0  ;;  %v7032_v55 = vpop.f32.mrb[70].mxu1 }
 0xd31   :  { %v7037_v56 = vpop.f32.mrb[63].mxu0  ;;  %v7040_v58 = vpop.f32.mrb[71].mxu1  ;;  %v4730_v46 = vmul.f32 %v7032_v55, %v7059_v6 }
 0xd32   :  { %2557 = vadd.xlane.f32.xlu0 %v2556_v57  ;;  %v2845_v57 = vsel %vm571_vm6, %v2835_v43, 0.0  ;;  %v2992_v28 = vmul.f32 %v7045_v48, %v7040_v58 }
 0xd33   :  { %2560 = vadd.xlane.f32.xlu1 %v2559_v59 }
 0xd36   :  { %2702 = vadd.xlane.f32.xlu0 %v2701_v60  ;;  %v7050_v1 = vpop.f32.mrb[64].mxu0  ;;  %v7052_v3 = vpop.f32.mrb[72].mxu1 }
 0xd37   :  { %v7054_v4 = vpop.f32.mrb[65].mxu0  ;;  %2705 = vadd.xlane.f32.xlu1 %v2704_v62  ;;  %v7062_v8 = vpop.f32.mrb[73].mxu1  ;;  %v4724_v62 = vmul.f32 %v7059_v6, %v7010_v26  ;;  %v2841_v26 = vmul.f32 %v7028_v52, %v7035_v47 }
 0xd38   :  { %v7064_v9 = vpop.f32.mrb[66].mxu0  ;;  %v7067_v11 = vpop.f32.mrb[74].mxu1 }
 0xd39   :  { %v7069_v12 = vpop.f32.mrb[67].mxu0  ;;  %v7072_v15 = vpop.f32.mrb[75].mxu1  ;;  %v4734_v31 = vsel %vm571_vm6, %v4724_v62, 0.0  ;;  %v5230_v62 = vld [vmem:[%s7595_s28 + $0x2] sm:$0x1] }
 0xd3a   :  { %2849 = vadd.xlane.f32.xlu0 %v2848_v13  ;;  %v2840_v13 = vmul.f32 %v7019_v44, %v7035_v47  ;;  %v2994_v44 = vmul.f32 %v7032_v55, %v7045_v48  ;;  %v2838_v55 = vmul.f32 %v7035_v47, %v7024_v49  ;;  %v5307_v49 = vld [vmem:[%s6614_s4 + $0x1] sm:$0x1]  ;;  %s7596_s4 = sld [smem:[#allocation27_spill]] }
 0xd3b   :  { %2852 = vadd.xlane.f32.xlu1 %v2851_v18 }
 0xd3c   :  { %v2860_v52 = vsel %vm571_vm6, %v2840_v13, 0.0  ;;  %v3016_v53 = vsel %vm571_vm6, %v2994_v44, 0.0  ;;  %v4811_v44 = vmul.f32 %v7052_v3, %v7083_v32 }
 0xd3e   :  { %3002 = vadd.xlane.f32.xlu0 %v3001_v22  ;;  %v7080_v30 = vpop.f32.mrb[68].mxu0  ;;  %v7085_v33 = vpop.f32.mrb[76].mxu1  ;;  %v2993_v22 = vmul.f32 %v7021_v45, %v7045_v48  ;;  %v4749_v45 = vsel %vm571_vm6, %v4729_v40, 0.0 }
 0xd3f   :  { %v7087_v35 = vpop.f32.mrb[69].mxu0  ;;  %3005 = vadd.xlane.f32.xlu1 %v3004_v24  ;;  %v7090_v36 = vpop.f32.mrb[77].mxu1  ;;  %v7097_v38 = vmul.f32 %v7085_v33, %v7083_v32 }
 0xd40   :  { %v7092_v37 = vpop.f32.mrb[70].mxu0  ;;  %v7099_v39 = vpop.f32.mrb[78].mxu1  ;;  %v3013_v43 = vsel %vm571_vm6, %v2993_v22, 0.0 }
 0xd41   :  { %v7103_v41 = vpop.f32.mrb[71].mxu0  ;;  %v7105_v42 = vpop.f32.mrb[79].mxu1  ;;  %v7113_v50 = vmul.f32 %v7099_v39, %v7083_v32 }
 0xd42   :  { %4738 = vadd.xlane.f32.xlu0 %v4737_v25  ;;  %v2863_v25 = vsel %vm571_vm6, %v2841_v26, 0.0 }
 0xd43   :  { %4741 = vadd.xlane.f32.xlu1 %v4740_v34  ;;  %v6157_v34 = vld [vmem:[%s7593_s1 + $0x10] sm:$0xff]  }
 0xd46   :  { %2843 = vadd.xlane.f32.xlu0 %v2842_v27  ;;  %v3438_v54 = vpop.f32.mrb[72].mxu0  ;;  %v4752_v27 = vsel %vm571_vm6, %v4730_v46, 0.0 }
 0xd47   :  { %v3444_v59 = vpack.c.bf16 %v3438_v54, %v3438_v54  ;;  %v5827_v60 = vpop.f32.mrb[73].mxu0  ;;  %2846 = vadd.xlane.f32.xlu1 %v2845_v57  ;;  %v2839_v54 = vmul.f32 %v7035_v47, %v7037_v56  ;;  %v2991_v57 = vmul.f32 %v7045_v48, %v7026_v51  ;;  %v4727_v56 = vmul.f32 %v7059_v6, %v7026_v51 }
 0xd48   :  { %v3441_v63 = vpop.f32.mrb[74].mxu0  ;;  %v2854_v60 = vsel %vm571_vm6, %v2838_v55, 0.0  ;;  %v4728_v48 = vmul.f32 %v7059_v6, %v7040_v58 }
 0xd49   :  { %v3540_v5 = vsel %vm322_vm1, %v3444_v59, 0  ;;  %v5828_v7 = vpop.f32.mrb[75].mxu0  ;;  %v2857_v47 = vsel %vm571_vm6, %v2839_v54, 0.0  ;;  %v4809_v54 = vmul.f32 %v7083_v32, %v7062_v8 }
 0xd4a   :  { %2996 = vadd.xlane.f32.xlu0 %v2995_v61  ;;  %5842 = vmatpush3.bf16.msra.mxu0 %v3540_v5  ;;  %v3007_v61 = vsel %vm571_vm6, %v2991_v57, 0.0  ;;  %v4743_v5 = vsel %vm571_vm6, %v4727_v56, 0.0  ;;  %v3280_v7 = vunpack.c.l.bf16 %v5230_v62  ;;  %v4746_v51 = vsel %vm571_vm6, %v4728_v48, 0.0 }
 0xd4b   :  { %2999 = vadd.xlane.f32.xlu1 %v2998_v0  ;;  %5853 = vmatprep.subr.bf16.mxu0 %v6461_v29  ;;  %v4757_v0 = vunpack.c.l.bf16 %v5307_v49 }
 0xd4c   :  { %v7195_v6 = vrot.slane %v3280_v7, %v6667_v14 }
 0xd4d   :  { %5844 = vmatmul.mubr.msk.bf16.vlgmr.msra.gmra.mrb[80].mxu0 %vm1383_vm0, %v6800_v17 }
 0xd4e   :  { %4732 = vadd.xlane.f32.xlu0 %v4731_v10  ;;  %v3488_v18 = vpop.f32.mrb[76].mxu0  ;;  %5855 = vmatprep.mubr.msk.bf16.mxu0 %vm6462_vm7, %v6461_v29  ;;  %v3288_v22 = vmul.f32 %v7067_v11, %v7195_v6  ;;  %v3285_v40 = vmul.f32 %v7195_v6, %v7062_v8  ;;  %v3291_v56 = vmul.f32 %v7085_v33, %v7195_v6 }
 0xd4f   :  { %v3494_v20 = vpack.c.bf16 %v3488_v18, %v3488_v18  ;;  %v5833_v21 = vpop.f32.mrb[77].mxu0  ;;  %4735 = vadd.xlane.f32.xlu1 %v4734_v31  ;;  %v7190_v31 = vrot.slane %v4757_v0, %v6667_v14 }
 0xd50   :  { %v3491_v23 = vpop.f32.mrb[78].mxu0  ;;  %v3287_v21 = vmul.f32 %v7052_v3, %v7195_v6 }
 0xd51   :  { %v3496_v17 = vsel %vm322_vm1, %v3494_v20, 0  ;;  %v5834_v24 = vpop.f32.mrb[79].mxu0  ;;  %v4764_v13 = vmul.f32 %v7050_v1, %v7190_v31  ;;  %v4765_v18 = vmul.f32 %v7064_v9, %v7190_v31  ;;  %v4763_v55 = vmul.f32 %v7190_v31, %v7069_v12 }
 0xd52   :  { %2861 = vadd.xlane.f32.xlu0 %v2860_v52  ;;  %5836 = vmatpush3.bf16.msra.mxu1 %v3496_v17  ;;  %v4812_v17 = vmul.f32 %v7067_v11, %v7083_v32  ;;  %v3302_v24 = vsel %vm571_vm6, %v3288_v22, 0.0  ;;  %v4823_v52 = vsel %vm571_vm6, %v4811_v44, 0.0  ;;  %v3286_v11 = vmul.f32 %v7195_v6, %v7072_v15 }
 0xd53   :  { %2864 = vadd.xlane.f32.xlu1 %v2863_v25  ;;  %5847 = vmatprep.subr.bf16.mxu1 %v6461_v29  ;;  %v4776_v23 = vsel %vm571_vm6, %v4764_v13, 0.0  ;;  %v4769_v49 = vmul.f32 %v7092_v37, %v7190_v31  ;;  %v4766_v33 = vmul.f32 %v7190_v31, %v7087_v35 }
 0xd54   :  { %v4826_v25 = vsel %vm571_vm6, %v4812_v17, 0.0 }
 0xd55   :  { %5838 = vmatmul.mubr.msk.bf16.vlgmr.msra.gmra.mrb[80].mxu1 %vm1383_vm0, %v6797_v16  ;;  %v5213_v16 = vld [vmem:[%s7595_s28 + $0x1] sm:$0x1] }
 0xd56   :  { %3014 = vadd.xlane.f32.xlu0 %v3013_v43  ;;  %5848 = vmatpush3.bf16.msra.mxu1 %v6157_v34  ;;  %v3127_v59 = vunpack.c.l.bf16 %v5213_v16  ;;  %v4810_v16 = vmul.f32 %v7083_v32, %v7072_v15  ;;  %v4768_v15 = vmul.f32 %v7080_v30, %v7190_v31 }
 0xd57   :  { %3017 = vadd.xlane.f32.xlu1 %v3016_v53  ;;  %5849 = vmatprep.mubr.msk.bf16.mxu1 %vm6462_vm7, %v6461_v29  ;;  %v3293_v53 = vsel %vm571_vm6, %v3285_v40, 0.0 }
 0xd58   :  { %5859 = vmatprep.subr.bf16.mxu1 %v6461_v29  ;;  %v7183_v63 = vrot.slane %v3127_v59, %v6667_v14  ;;  %v4817_v59 = vsel %vm571_vm6, %v4809_v54, 0.0  ;;  %v4788_v48 = vsel %vm571_vm6, %v4768_v15, 0.0 }
 0xd5a   :  { %4750 = vadd.xlane.f32.xlu0 %v4749_v45  ;;  %v3134_v10 = vmul.f32 %v7050_v1, %v7183_v63  ;;  %v3135_v58 = vmul.f32 %v7064_v9, %v7183_v63  ;;  %v4779_v1 = vsel %vm571_vm6, %v4765_v18, 0.0  ;;  %v3299_v9 = vsel %vm571_vm6, %v3287_v21, 0.0 }
 0xd5b   :  { %4753 = vadd.xlane.f32.xlu1 %v4752_v27  ;;  %v3132_v34 = vmul.f32 %v7183_v63, %v7054_v4  ;;  %v3133_v3 = vmul.f32 %v7183_v63, %v7069_v12  ;;  %v3296_v45 = vsel %vm571_vm6, %v3286_v11, 0.0  ;;  %v4762_v27 = vmul.f32 %v7190_v31, %v7054_v4 }
 0xd5c   :  { %v3146_v26 = vsel %vm571_vm6, %v3134_v10, 0.0  ;;  %v3149_v20 = vsel %vm571_vm6, %v3135_v58, 0.0  ;;  %v4820_v4 = vsel %vm571_vm6, %v4810_v16, 0.0  ;;  %v3138_v12 = vmul.f32 %v7080_v30, %v7183_v63 }
 0xd5d   :  { %5850 = vmatmul.mubr.msk.bf16.vlgmr.msra.gmra.mrb[84].mxu1 %vm571_vm6, %v6784_v2  ;;  %v3010_v2 = vsel %vm571_vm6, %v2992_v28, 0.0  ;;  %v3140_v43 = vsel %vm571_vm6, %v3132_v34, 0.0  ;;  %v3143_v46 = vsel %vm571_vm6, %v3133_v3, 0.0  ;;  %v4770_v57 = vsel %vm571_vm6, %v4762_v27, 0.0 }
 0xd5e   :  { %2855 = vadd.xlane.f32.xlu0 %v2854_v60  ;;  %5863 = vmatprep.mubr.msk.bf16.mxu1 %vm6462_vm7, %v6461_v29  ;;  %v4773_v28 = vsel %vm571_vm6, %v4763_v55, 0.0  ;;  %v3139_v8 = vmul.f32 %v7092_v37, %v7183_v63  ;;  %v3158_v60 = vsel %vm571_vm6, %v3138_v12, 0.0  ;;  %v4791_v30 = vsel %vm571_vm6, %v4769_v49, 0.0 }
 0xd5f   :  { %2858 = vadd.xlane.f32.xlu1 %v2857_v47  ;;  %v3136_v62 = vmul.f32 %v7183_v63, %v7087_v35  ;;  %v3137_v0 = vmul.f32 %v7183_v63, %v7103_v41  ;;  %v3290_v63 = vmul.f32 %v7195_v6, %v7105_v42  ;;  %v4782_v10 = vsel %vm571_vm6, %v4766_v33, 0.0 }
 0xd60   :  { %v3161_v47 = vsel %vm571_vm6, %v3139_v8, 0.0  ;;  %v4813_v58 = vmul.f32 %v7083_v32, %v7090_v36 }
 0xd61   :  { %v3155_v7 = vsel %vm571_vm6, %v3137_v0, 0.0  ;;  %v3308_v13 = vsel %vm571_vm6, %v3290_v63, 0.0 }
 0xd62   :  { %3008 = vadd.xlane.f32.xlu0 %v3007_v61  ;;  %v3292_v61 = vmul.f32 %v7099_v39, %v7195_v6  ;;  %v3152_v39 = vsel %vm571_vm6, %v3136_v62, 0.0 }
 0xd63   :  { %3011 = vadd.xlane.f32.xlu1 %v3010_v2  ;;  %v3311_v2 = vsel %vm571_vm6, %v3291_v56, 0.0 }
 0xd64   :  { %v3314_v37 = vsel %vm571_vm6, %v3292_v61, 0.0 }
 0xd66   :  { %4744 = vadd.xlane.f32.xlu0 %v4743_v5  ;;  %v4767_v5 = vmul.f32 %v7190_v31, %v7103_v41  ;;  %v4814_v31 = vmul.f32 %v7083_v32, %v7105_v42 }
 0xd67   :  { %4747 = vadd.xlane.f32.xlu1 %v4746_v51  ;;  %v3289_v51 = vmul.f32 %v7195_v6, %v7090_v36  ;;  %v4829_v6 = vsel %vm571_vm6, %v4813_v58, 0.0 }
 0xd68   :  { %v4785_v35 = vsel %vm571_vm6, %v4767_v5, 0.0 }
 0xd69   :  { %v3305_v41 = vsel %vm571_vm6, %v3289_v51, 0.0 }
 0xd6a   :  { %3147 = vadd.xlane.f32.xlu0 %v3146_v26  ;;  %v4832_v26 = vsel %vm571_vm6, %v4814_v31, 0.0 }
 0xd6b   :  { %3150 = vadd.xlane.f32.xlu1 %v3149_v20 }
 0xd6e   :  { %4777 = vadd.xlane.f32.xlu0 %v4776_v23 }
 0xd6f   :  { %4780 = vadd.xlane.f32.xlu1 %v4779_v1 }
 0xd72   :  { %3300 = vadd.xlane.f32.xlu0 %v3299_v9 }
 0xd73   :  { %3303 = vadd.xlane.f32.xlu1 %v3302_v24 }
 0xd76   :  { %4824 = vadd.xlane.f32.xlu0 %v4823_v52 }
 0xd77   :  { %4827 = vadd.xlane.f32.xlu1 %v4826_v25 }
 0xd7a   :  { %3141 = vadd.xlane.f32.xlu0 %v3140_v43 }
 0xd7b   :  { %3144 = vadd.xlane.f32.xlu1 %v3143_v46 }
 0xd7e   :  { %3294 = vadd.xlane.f32.xlu0 %v3293_v53 }
 0xd7f   :  { %3297 = vadd.xlane.f32.xlu1 %v3296_v45 }
 0xd82   :  { %4771 = vadd.xlane.f32.xlu0 %v4770_v57 }
 0xd83   :  { %4774 = vadd.xlane.f32.xlu1 %v4773_v28 }
 0xd86   :  { %4818 = vadd.xlane.f32.xlu0 %v4817_v59 }
 0xd87   :  { %4821 = vadd.xlane.f32.xlu1 %v4820_v4 }
 0xd8a   :  { %3159 = vadd.xlane.f32.xlu0 %v3158_v60 }
 0xd8b   :  { %3162 = vadd.xlane.f32.xlu1 %v3161_v47 }
 0xd8e   :  { %4789 = vadd.xlane.f32.xlu0 %v4788_v48 }
 0xd8f   :  { %4792 = vadd.xlane.f32.xlu1 %v4791_v30 }
 0xd92   :  { %3312 = vadd.xlane.f32.xlu0 %v3311_v2 }
 0xd93   :  { %3315 = vadd.xlane.f32.xlu1 %v3314_v37 }
 0xd96   :  { %3153 = vadd.xlane.f32.xlu0 %v3152_v39 }
 0xd97   :  { %3156 = vadd.xlane.f32.xlu1 %v3155_v7 }
 0xd9a   :  { %4783 = vadd.xlane.f32.xlu0 %v4782_v10 }
 0xd9b   :  { %4786 = vadd.xlane.f32.xlu1 %v4785_v35 }
 0xd9e   :  { %3306 = vadd.xlane.f32.xlu0 %v3305_v41 }
 0xd9f   :  { %3309 = vadd.xlane.f32.xlu1 %v3308_v13 }
 0xda2   :  { %4830 = vadd.xlane.f32.xlu0 %v4829_v6 }
 0xda3   :  { %4833 = vadd.xlane.f32.xlu1 %v4832_v26 }
 0xda7   :  { %v2552_v18 = vpop.xlane.xlu0 %2551 }
 0xda8   :  { %v2546_v20 = vpop.xlane.xlu1 %2545 }
 0xdab   :  { %v2697_v21 = vpop.xlane.xlu0 %2696 }
 0xdac   :  { %v2715_v36 = vadd.f32 %v2697_v21, %v2552_v18  ;;  %v2555_v22 = vpop.xlane.xlu1 %2554 }
 0xdaf   :  { %v2691_v23 = vpop.xlane.xlu0 %2690 }
 0xdb0   :  { %v7283_v1 = vadd.f32 %v2691_v23, %v2546_v20  ;;  %v2700_v44 = vpop.xlane.xlu1 %2699 }
 0xdb1   :  { %v2716_v32 = vadd.f32 %v2700_v44, %v2555_v22 }
 0xdb3   :  { %v2549_v42 = vpop.xlane.xlu0 %2548 }
 0xdb4   :  { %v2694_v9 = vpop.xlane.xlu1 %2693 }
 0xdb5   :  { %v7285_v17 = vadd.f32 %v2694_v9, %v2549_v42  ;;  %v7313_v42 = vld [vmem:[#allocation2] ss:$0 sm:$0xff] }
 0xdb7   :  { %v2564_v24 = vpop.xlane.xlu0 %2563 }
 0xdb8   :  { %v2567_v52 = vpop.xlane.xlu1 %2566 }
 0xdbb   :  { %v2709_v25 = vpop.xlane.xlu0 %2708 }
 0xdbc   :  { %v2719_v34 = vadd.f32 %v2709_v25, %v2564_v24  ;;  %v2712_v3 = vpop.xlane.xlu1 %2711 }
 0xdbd   :  { %v2720_v40 = vadd.f32 %v2712_v3, %v2567_v52 }
 0xdbf   :  { %v2558_v11 = vpop.xlane.xlu0 %2557 }
 0xdc0   :  { %v2561_v43 = vpop.xlane.xlu1 %2560 }
 0xdc3   :  { %v2703_v46 = vpop.xlane.xlu0 %2702 }
 0xdc4   :  { %v2717_v53 = vadd.f32 %v2703_v46, %v2558_v11  ;;  %v2706_v45 = vpop.xlane.xlu1 %2705 }
 0xdc5   :  { %v2718_v27 = vadd.f32 %v2706_v45, %v2561_v43 }
 0xdc7   :  { %v2850_v55 = vpop.xlane.xlu0 %2849 }
 0xdc8   :  { %v2853_v54 = vpop.xlane.xlu1 %2852  ;;  %v2868_v21 = vadd.f32 %v2850_v55, %v2715_v36 }
 0xdc9   :  { %v2869_v44 = vadd.f32 %v2853_v54, %v2716_v32 }
 0xdcb   :  { %v3003_v16 = vpop.xlane.xlu0 %3002 }
 0xdcc   :  { %v3006_v57 = vpop.xlane.xlu1 %3005 }
 0xdcf   :  { %v4739_v28 = vpop.xlane.xlu0 %4738 }
 0xdd0   :  { %v4742_v59 = vpop.xlane.xlu1 %4741 }
 0xdd3   :  { %v2844_v4 = vpop.xlane.xlu0 %2843 }
 0xdd4   :  { %v2847_v12 = vpop.xlane.xlu1 %2846 }
 0xdd7   :  { %v2997_v8 = vpop.xlane.xlu0 %2996 }
 0xdd8   :  { %v3000_v15 = vpop.xlane.xlu1 %2999 }
 0xddb   :  { %v4733_v60 = vpop.xlane.xlu0 %4732 }
 0xddc   :  { %v7287_v49 = vpop.xlane.xlu1 %4735 }
 0xddf   :  { %v2862_v47 = vpop.xlane.xlu0 %2861 }
 0xde0   :  { %v7289_v56 = vadd.f32 %v2862_v47, %v2719_v34  ;;  %v2865_v61 = vpop.xlane.xlu1 %2864  ;;  %v2867_v47 = vadd.f32 %v2847_v12, %v7285_v17 }
 0xde1   :  { %v7291_v48 = vadd.f32 %v2865_v61, %v2720_v40 }
 0xde3   :  { %v7293_v30 = vpop.xlane.xlu0 %3014 }
 0xde4   :  { %v7295_v2 = vpop.xlane.xlu1 %3017 }
 0xde7   :  { %v7297_v37 = vpop.xlane.xlu0 %4750 }
 0xde8   :  { %v7299_v62 = vpop.xlane.xlu1 %4753 }
 0xdeb   :  { %v2856_v0 = vpop.xlane.xlu0 %2855 }
 0xdec   :  { %v7301_v33 = vadd.f32 %v2856_v0, %v2717_v53  ;;  %v2859_v39 = vpop.xlane.xlu1 %2858 }
 0xded   :  { %v7303_v5 = vadd.f32 %v2859_v39, %v2718_v27 }
 0xdef   :  { %v7305_v7 = vpop.xlane.xlu0 %3008 }
 0xdf0   :  { %v7307_v51 = vpop.xlane.xlu1 %3011 }
 0xdf3   :  { %v7309_v63 = vpop.xlane.xlu0 %4744 }
 0xdf4   :  { %v7311_v10 = vpop.xlane.xlu1 %4747 }
 0xdf7   :  { %v3148_v35 = vpop.xlane.xlu0 %3147 }
 0xdf8   :  { %v3151_v58 = vpop.xlane.xlu1 %3150  ;;  %v3166_v26 = vadd.f32 %v3148_v35, %v3003_v16 }
 0xdf9   :  { %v3167_v18 = vadd.f32 %v3151_v58, %v3006_v57  ;;  %v2866_v57 = vadd.f32 %v2844_v4, %v7283_v1 }
 0xdfb   :  { %v4778_v41 = vpop.xlane.xlu0 %4777 }
 0xdfc   :  { %v4796_v31 = vadd.f32 %v4778_v41, %v4739_v28  ;;  %v4781_v13 = vpop.xlane.xlu1 %4780 }
 0xdfd   :  { %v4797_v6 = vadd.f32 %v4781_v13, %v4742_v59 }
 0xdff   :  { %v3301_v20 = vpop.xlane.xlu0 %3300 }
 0xe00   :  { %v3319_v22 = vadd.f32 %v3301_v20, %v3166_v26  ;;  %v3304_v23 = vpop.xlane.xlu1 %3303 }
 0xe01   :  { %v3320_v9 = vadd.f32 %v3304_v23, %v3167_v18 }
 0xe02   :  { %v3327_v24 = vadd.f32 %v3319_v22, %v2868_v21 }
 0xe03   :  { %v3328_v52 = vadd.f32 %v3320_v9, %v2869_v44  ;;  %v4825_v25 = vpop.xlane.xlu0 %4824 }
 0xe04   :  { %v3342_v34 = vadd.f32 %v7313_v42, %v3327_v24  ;;  %v7316_v3 = vadd.f32 %v4825_v25, %v4796_v31  ;;  %v4828_v40 = vpop.xlane.xlu1 %4827 }
 0xe05   :  { %v3343_v11 = vadd.f32 %v7313_v42, %v3328_v52  ;;  %v7319_v43 = vadd.f32 %v4828_v40, %v4797_v6 }
 0xe06   :  { %v3350_v46 = vsub.f32 0.0, %v3342_v34 }
 0xe07   :  { %v3351_v36 = vsub.f32 0.0, %v3343_v11  ;;  %v3142_v53 = vpop.xlane.xlu0 %3141 }
 0xe08   :  { %v3360_v45 = vmul.f32 1.442695, %v3350_v46  ;;  %v3145_v32 = vpop.xlane.xlu1 %3144  ;;  %v3164_v55 = vadd.f32 %v3142_v53, %v2997_v8 }
 0xe09   :  { %v3362_v27 = vmul.f32 1.442695, %v3351_v36  ;;  %v3165_v54 = vadd.f32 %v3145_v32, %v3000_v15 }
 0xe0a   :  { %6170 = vpow2.f32 %v3360_v45 }
 0xe0b   :  { %6172 = vpow2.f32 %v3362_v27  ;;  %v3295_v16 = vpop.xlane.xlu0 %3294 }
 0xe0c   :  { %v3317_v28 = vadd.f32 %v3295_v16, %v3164_v55  ;;  %v3298_v59 = vpop.xlane.xlu1 %3297 }
 0xe0d   :  { %v3318_v61 = vadd.f32 %v3298_v59, %v3165_v54 }
 0xe0e   :  { %v3325_v0 = vadd.f32 %v3317_v28, %v2866_v57 }
 0xe0f   :  { %v3326_v39 = vadd.f32 %v3318_v61, %v2867_v47  ;;  %v4772_v35 = vpop.xlane.xlu0 %4771 }
 0xe10   :  { %v3340_v58 = vadd.f32 %v7313_v42, %v3325_v0  ;;  %v4794_v41 = vadd.f32 %v4772_v35, %v4733_v60  ;;  %v4775_v31 = vpop.xlane.xlu1 %4774 }
 0xe11   :  { %v3341_v13 = vadd.f32 %v7313_v42, %v3326_v39  ;;  %v4795_v8 = vadd.f32 %v4775_v31, %v7287_v49 }
 0xe12   :  { %v3348_v15 = vsub.f32 0.0, %v3340_v58 }
 0xe13   :  { %v3349_v6 = vsub.f32 0.0, %v3341_v13  ;;  %v4819_v26 = vpop.xlane.xlu0 %4818 }
 0xe14   :  { %v6171_v1 = vpop.eup %6170  ;;  %v3356_v4 = vmul.f32 1.442695, %v3348_v15  ;;  %v7326_v18 = vadd.f32 %v4819_v26, %v4794_v41  ;;  %v4822_v17 = vpop.xlane.xlu1 %4821 }
 0xe15   :  { %v6173_v12 = vpop.eup %6172  ;;  %v3374_v20 = vadd.f32 1.0, %v6171_v1  ;;  %v3358_v21 = vmul.f32 1.442695, %v3349_v6  ;;  %v7328_v22 = vadd.f32 %v4822_v17, %v4795_v8 }
 0xe16   :  { %v3375_v23 = vadd.f32 1.0, %v6173_v12  ;;  %6174 = vpow2.f32 %v3356_v4 }
 0xe17   :  { %6176 = vrcp.f32 %v3374_v20  ;;  %v3160_v60 = vpop.xlane.xlu0 %3159 }
 0xe18   :  { %6178 = vrcp.f32 %v3375_v23  ;;  %v3163_v44 = vpop.xlane.xlu1 %3162  ;;  %v3170_v25 = vadd.f32 %v3160_v60, %v7293_v30 }
 0xe19   :  { %6180 = vpow2.f32 %v3358_v21  ;;  %v3171_v34 = vadd.f32 %v3163_v44, %v7295_v2 }
 0xe1b   :  { %v4790_v49 = vpop.xlane.xlu0 %4789 }
 0xe1c   :  { %v7331_v9 = vadd.f32 %v4790_v49, %v7297_v37  ;;  %v4793_v24 = vpop.xlane.xlu1 %4792 }
 0xe1d   :  { %v7334_v52 = vadd.f32 %v4793_v24, %v7299_v62 }
 0xe1f   :  { %v3313_v40 = vpop.xlane.xlu0 %3312 }
 0xe20   :  { %v6175_v11 = vpop.eup %6174  ;;  %v3323_v46 = vadd.f32 %v3313_v40, %v3170_v25  ;;  %v3316_v36 = vpop.xlane.xlu1 %3315 }
 0xe21   :  { %v3576_v53 = vpop.f32.mrb[80].mxu0  ;;  %v6177_v45 = vpop.eup %6176  ;;  %v3372_v32 = vadd.f32 1.0, %v6175_v11  ;;  %v3324_v37 = vadd.f32 %v3316_v36, %v3171_v34 }
 0xe22   :  { %v5845_v27 = vpop.f32.mrb[81].mxu0  ;;  %v6179_v55 = vpop.eup %6178  ;;  %4923 = vst.msk [vmem:[%s6619_s24 + $0x10] sm:$0xff] %vm4920_vm8, %v6177_v45  ;;  %v3331_v62 = vadd.f32 %v3323_v46, %v7289_v56 }
 0xe23   :  { %v3579_v54 = vpop.f32.mrb[82].mxu0  ;;  %v6181_v30 = vpop.eup %6180  ;;  %4924 = vst.msk [vmem:[%s6619_s24 + $0x18] sm:$0xff] %vm4920_vm8, %v6179_v55  ;;  %6182 = vrcp.f32 %v3372_v32  ;;  %v3332_v2 = vadd.f32 %v3324_v37, %v7291_v48  ;;  %v6234_v37 = vld [vmem:[%s7586_s13 + $0x10] sm:$0xff]  }
 0xe24   :  { %v3154_v16 = vpop.xlane.xlu0 %3153  ;;  %v5846_v57 = vpop.f32.mrb[83].mxu0  ;;  %v3373_v28 = vadd.f32 1.0, %v6181_v30  ;;  %v3346_v59 = vadd.f32 %v7313_v42, %v3331_v62 }
 0xe25   :  { %v3157_v47 = vpop.xlane.xlu1 %3156  ;;  %v3347_v61 = vadd.f32 %v7313_v42, %v3332_v2  ;;  %v3168_v6 = vadd.f32 %v3154_v16, %v7305_v7 }
 0xe26   :  { %6184 = vrcp.f32 %v3373_v28  ;;  %v3354_v0 = vsub.f32 0.0, %v3346_v59  ;;  %v3169_v1 = vadd.f32 %v3157_v47, %v7307_v51  ;;  %v6158_v28 = vld [vmem:[%s7596_s4] sm:$0xff]   ;;  %v6159_v59 = vld [vmem:[%s7596_s4 + $0x10] sm:$0xff]   ;;  %v6160_v47 = vld [vmem:[%s7596_s4 + $0x8] sm:$0xff]  }
 0xe27   :  { %v3355_v39 = vsub.f32 0.0, %v3347_v61  ;;  %5860 = vmatpush3.bf16.msra.mxu1 %v6158_v28  ;;  %v6161_v61 = vld [vmem:[%s7596_s4 + $0x18] sm:$0xff]  }
 0xe28   :  { %v4784_v35 = vpop.xlane.xlu0 %4783  ;;  %v3368_v56 = vmul.f32 1.442695, %v3354_v0  ;;  %v3532_v31 = vpop.f32.mrb[80].mxu1  ;;  %5861 = vmatprep.subr.bf16.mxu1 %v6461_v29 }
 0xe29   :  { %v7347_v58 = vadd.f32 %v4784_v35, %v7309_v63  ;;  %v4787_v41 = vpop.xlane.xlu1 %4786  ;;  %v3370_v13 = vmul.f32 1.442695, %v3355_v39  ;;  %v5839_v8 = vpop.f32.mrb[81].mxu1  ;;  %v7352_v15 = vadd.f32 %v3576_v53, %v3532_v31  ;;  %v5245_v39 = vld [vmem:[#allocation11] ss:$0 sm:$0xff] }
 0xe2a   :  { %v7350_v48 = vadd.f32 %v4787_v41, %v7311_v10  ;;  %6186 = vpow2.f32 %v3368_v56  ;;  %v3535_v26 = vpop.f32.mrb[82].mxu1 }
 0xe2b   :  { %6188 = vpow2.f32 %v3370_v13  ;;  %v5840_v4 = vpop.f32.mrb[83].mxu1  ;;  %v7356_v17 = vadd.f32 %v3579_v54, %v3535_v26  ;;  %5862 = vmatpush3.bf16.msra.mxu1 %v6160_v47 }
 0xe2c   :  { %v3307_v63 = vpop.xlane.xlu0 %3306 }
 0xe2d   :  { %v3321_v12 = vadd.f32 %v3307_v63, %v3168_v6  ;;  %v3310_v20 = vpop.xlane.xlu1 %3309  ;;  %v6183_v21 = vpop.eup %6182 }
 0xe2e   :  { %v3322_v10 = vadd.f32 %v3310_v20, %v3169_v1  ;;  %4921 = vst.msk [vmem:[%s6619_s24] sm:$0xff] %vm4920_vm8, %v6183_v21 }
 0xe2f   :  { %v3329_v23 = vadd.f32 %v3321_v12, %v7301_v33  ;;  %v6162_v12 = vld [vmem:[%s7596_s4 + $0x20] sm:$0xff]  }
 0xe30   :  { %v3330_v60 = vadd.f32 %v3322_v10, %v7303_v5  ;;  %v6185_v7 = vpop.eup %6184  ;;  %v3626_v49 = vpop.f32.mrb[84].mxu1 }
 0xe31   :  { %v3344_v44 = vadd.f32 %v7313_v42, %v3329_v23  ;;  %4922 = vst.msk [vmem:[%s6619_s24 + $0x8] sm:$0xff] %vm4920_vm8, %v6185_v7  ;;  %v3632_v24 = vpack.c.bf16 %v3626_v49, %v3626_v49  ;;  %v5851_v25 = vpop.f32.mrb[85].mxu1  ;;  %v6236_v49 = vld [vmem:[%s7591_s12] sm:$0xff]  }
 0xe32   :  { %v3345_v51 = vadd.f32 %v7313_v42, %v3330_v60  ;;  %v3629_v40 = vpop.f32.mrb[86].mxu1 }
 0xe33   :  { %v3352_v34 = vsub.f32 0.0, %v3344_v44  ;;  %v3634_v46 = vsel %vm322_vm1, %v3632_v24, 0  ;;  %v5852_v36 = vpop.f32.mrb[87].mxu1 }
 0xe34   :  { %v3353_v11 = vsub.f32 0.0, %v3345_v51  ;;  %v6187_v33 = vpop.eup %6186  ;;  %5854 = vmatpush3.bf16.msra.mxu0 %v3634_v46 }
 0xe35   :  { %v3364_v53 = vmul.f32 1.442695, %v3352_v34  ;;  %v6189_v5 = vpop.eup %6188  ;;  %v3378_v45 = vadd.f32 1.0, %v6187_v33  ;;  %5867 = vmatprep.subr.bf16.mxu0 %v6461_v29 }
 0xe36   :  { %v3366_v32 = vmul.f32 1.442695, %v3353_v11  ;;  %v3379_v42 = vadd.f32 1.0, %v6189_v5 }
 0xe37   :  { %6190 = vpow2.f32 %v3364_v53  ;;  %5856 = vmatmul.mubr.msk.bf16.vlgmr.msra.gmra.mrb[84].mxu0 %vm1383_vm0, %v6234_v37 }
 0xe38   :  { %6192 = vrcp.f32 %v3378_v45  ;;  %5871 = vmatprep.mubr.msk.bf16.mxu0 %vm6462_vm7, %v6461_v29  ;;  %5868 = vmatpush3.bf16.msra.mxu0 %v6159_v59 }
 0xe39   :  { %6194 = vrcp.f32 %v3379_v42  ;;  %5869 = vmatprep.subr.bf16.mxu0 %v6461_v29 }
 0xe3a   :  { %6196 = vpow2.f32 %v3366_v32  ;;  %v6238_v32 = vld [vmem:[%s7589_s8] sm:$0xff]  }
 0xe3c   :  { %5870 = vmatpush3.bf16.msra.mxu0 %v6161_v61 }
 0xe3d   :  { %5887 = vmatprep.subr.bf16.mxu0 %v6461_v29 }
 0xe41   :  { %v6191_v27 = vpop.eup %6190 }
 0xe42   :  { %v6193_v55 = vpop.eup %6192  ;;  %v3376_v62 = vadd.f32 1.0, %v6191_v27 }
 0xe43   :  { %v6195_v54 = vpop.eup %6194  ;;  %4927 = vst.msk [vmem:[%s6619_s24 + $0x30] sm:$0xff] %vm4920_vm8, %v6193_v55 }
 0xe44   :  { %v6197_v30 = vpop.eup %6196  ;;  %4928 = vst.msk [vmem:[%s6619_s24 + $0x38] sm:$0xff] %vm4920_vm8, %v6195_v54  ;;  %6198 = vrcp.f32 %v3376_v62 }
 0xe45   :  { %v3377_v2 = vadd.f32 1.0, %v6197_v30 }
 0xe47   :  { %6200 = vrcp.f32 %v3377_v2  ;;  %v6239_v2 = vld [vmem:[%s7589_s8 + $0x8] sm:$0xff]  }
 0xe4e   :  { %v6199_v16 = vpop.eup %6198 }
 0xe4f   :  { %4925 = vst.msk [vmem:[%s6619_s24 + $0x20] sm:$0xff] %vm4920_vm8, %v6199_v16  ;;  %v6240_v16 = vld [vmem:[%s7589_s8 + $0x20] sm:$0xff]  }
 0xe51   :  { %v6201_v57 = vpop.eup %6200 }
 0xe52   :  { %4926 = vst.msk [vmem:[%s6619_s24 + $0x28] sm:$0xff] %vm4920_vm8, %v6201_v57  ;;  %s7597_s24 = sld [smem:[#allocation28_spill]] }
 0xe58   :  { %v6164_v21 = vld [vmem:[%s7597_s24] sm:$0xff]   ;;  %v6165_v10 = vld [vmem:[%s7597_s24 + $0x8] sm:$0xff]   ;;  %v6166_v23 = vld [vmem:[%s7597_s24 + $0x10] sm:$0xff]  }
 0xe59   :  { %v6167_v60 = vld [vmem:[%s7597_s24 + $0x18] sm:$0xff]   ;;  %v6168_v7 = vld [vmem:[%s7597_s24 + $0x20] sm:$0xff]   ;;  %v6169_v44 = vld [vmem:[%s7597_s24 + $0x28] sm:$0xff]  }
 0xf0a   :  { %v3670_v0 = vpop.f32.mrb[84].mxu0 }
 0xf0b   :  { %v3677_v35 = vadd.f32 %v3670_v0, %v7352_v15  ;;  %v5857_v56 = vpop.f32.mrb[85].mxu0  ;;  %v6163_v15 = vld [vmem:[%s7596_s4 + $0x28] sm:$0xff]  }
 0xf0c   :  { %v3673_v41 = vpop.f32.mrb[86].mxu0 }
 0xf0d   :  { %v3686_v31 = vadd.f32 %v5245_v39, %v3677_v35  ;;  %v3678_v13 = vadd.f32 %v3673_v41, %v7356_v17  ;;  %v5858_v8 = vpop.f32.mrb[87].mxu0  ;;  %v6235_v17 = vld [vmem:[%s7589_s8 + $0x10] sm:$0xff]   ;;  %v6241_v35 = vld [vmem:[%s7589_s8 + $0x28] sm:$0xff]  }
 0xf0f   :  { %v3690_v6 = vmul.f32 0.01, %v3686_v31  ;;  %v3687_v26 = vadd.f32 %v5245_v39, %v3678_v13  ;;  %vm3688_vm1 = vcmp.gt.f32.partialorder %v3686_v31, 0.0 }
 0xf11   :  { %vm3689_vm9 = vcmp.gt.f32.partialorder %v3687_v26, 0.0  ;;  %v3691_v1 = vmul.f32 0.01, %v3687_v26  ;;  %v3692_v63 = vsel %vm3688_vm1, %v3686_v31, %v3690_v6  ;;  %v6242_v31 = vld [vmem:[%s7590_s6 + $0x10] sm:$0xff]  }
 0xf13   :  { %v3693_v4 = vsel %vm3689_vm9, %v3687_v26, %v3691_v1  ;;  %v6243_v26 = vld [vmem:[%s7590_s6 + $0x18] sm:$0xff]   ;;  %v6244_v1 = vld [vmem:[%s7590_s6] sm:$0xff]  }
 0xf14   :  { %v3694_v20 = vpack.c.bf16 %v3693_v4, %v3692_v63  ;;  %v6245_v4 = vld [vmem:[%s7590_s6 + $0x8] sm:$0xff]  }
 0xf16   :  { %5864 = vmatmul.mubr.msk.bf16.vlgmr.msra.gmra.mrb[88].mxu1 %vm949_vm12, %v3694_v20  ;;  %5872 = vmatmul.mubr.msk.bf16.vlgmr.msra.gmra.mrb[88].mxu0 %vm949_vm12, %v3694_v20 }
 0xf17   :  { %5888 = vmatpush3.bf16.msra.mxu0 %v6162_v12  ;;  %5891 = vmatprep.mubr.msk.bf16.mxu0 %vm6462_vm7, %v6461_v29  ;;  %v6246_v12 = vld [vmem:[%s7590_s6 + $0x20] sm:$0xff]  }
 0xf18   :  { %5889 = vmatprep.subr.bf16.mxu0 %v6461_v29  ;;  %5877 = vmatprep.mubr.msk.bf16.mxu1 %vm571_vm6, %v6235_v17  ;;  %v5292_v17 = vld [vmem:[#allocation14] ss:$0 sm:$0xff] }
 0xf1b   :  { %5890 = vmatpush3.bf16.msra.mxu0 %v6163_v15  ;;  %v6248_v15 = vld [vmem:[%s7591_s12 + $0x20] sm:$0xff]  }
 0xf1c   :  { %5901 = vmatprep.subr.bf16.mxu0 %v6461_v29 }
 0xf1e   :  { %5892 = vmatmul.mubr.msk.bf16.vlgmr.msra.gmra.mrb[92].mxu0 %vm949_vm12, %v3694_v20  ;;  %v6247_v20 = vld [vmem:[%s7590_s6 + $0x28] sm:$0xff]  }
 0xf1f   :  { %5902 = vmatpush3.bf16.msra.mxu0 %v6164_v21  ;;  %5905 = vmatprep.mubr.msk.bf16.mxu0 %vm6462_vm7, %v6461_v29 }
 0xf20   :  { %5903 = vmatprep.subr.bf16.mxu0 %v6461_v29 }
 0xf23   :  { %5904 = vmatpush3.bf16.msra.mxu0 %v6165_v10 }
 0xf24   :  { %5909 = vmatprep.subr.bf16.mxu0 %v6461_v29 }
 0xf26   :  { %5906 = vmatmul.mubr.msk.bf16.vlgmr.msra.gmra.mrb[96].mxu0 %vm949_vm12, %v6744_v19 }
 0xf27   :  { %5910 = vmatpush3.bf16.msra.mxu0 %v6166_v23  ;;  %5913 = vmatprep.mubr.msk.bf16.mxu0 %vm6462_vm7, %v6461_v29 }
 0xf28   :  { %5911 = vmatprep.subr.bf16.mxu0 %v6461_v29 }
 0xf2b   :  { %5912 = vmatpush3.bf16.msra.mxu0 %v6167_v60 }
 0xf2c   :  { %5929 = vmatprep.subr.bf16.mxu0 %v6461_v29 }
 0xf2e   :  { %5914 = vmatmul.mubr.msk.bf16.vlgmr.msra.gmra.mrb[100].mxu0 %vm949_vm12, %v6744_v19 }
 0xf2f   :  { %5930 = vmatpush3.bf16.msra.mxu0 %v6168_v7  ;;  %5933 = vmatprep.mubr.msk.bf16.mxu0 %vm6462_vm7, %v6461_v29 }
 0xf30   :  { %5931 = vmatprep.subr.bf16.mxu0 %v6461_v29 }
 0xf33   :  { %5932 = vmatpush3.bf16.msra.mxu0 %v6169_v44 }
 0xf36   :  { %5934 = vmatmul.mubr.msk.bf16.vlgmr.msra.gmra.mrb[104].mxu0 %vm949_vm12, %v6744_v19  ;;  %v6237_v19 = vld [vmem:[%s7589_s8 + $0x18] sm:$0xff]  }
 0xf37   :  { %5947 = vmatprep.mubr.msk.bf16.mxu0 %vm949_vm12, %v6236_v49 }
 0xfe9   :  { %v3748_v51 = vpop.f32.mrb[88].mxu1  ;;  %v3807_v24 = vpop.f32.mrb[88].mxu0 }
 0xfea   :  { %v5865_v25 = vpop.f32.mrb[89].mxu1  ;;  %v5873_v34 = vpop.f32.mrb[89].mxu0 }
 0xfeb   :  { %v3751_v40 = vpop.f32.mrb[90].mxu1  ;;  %v3810_v11 = vpop.f32.mrb[90].mxu0 }
 0xfec   :  { %v3755_v46 = vpack.c.bf16 %v3751_v40, %v3748_v51  ;;  %v3814_v36 = vpack.c.bf16 %v3810_v11, %v3807_v24  ;;  %v5866_v33 = vpop.f32.mrb[91].mxu1  ;;  %v5874_v53 = vpop.f32.mrb[91].mxu0 }
 0xfee   :  { %5875 = vmatprep.subr.bf16.mxu1 %v3814_v36 }
 0xfef   :  { %5876 = vmatpush3.bf16.msra.mxu1 %v3814_v36 }
 0xff0   :  { %5881 = vmatprep.subr.bf16.mxu1 %v3755_v46 }
 0xff1   :  { %v3964_v29 = vpop.f32.mrb[92].mxu0 }
 0xff2   :  { %5878 = vmatmul.mubr.msk.bf16.vlgmr.msra.gmra.mrb[92].mxu1 %vm571_vm6, %v6237_v19  ;;  %v5893_v5 = vpop.f32.mrb[93].mxu0  ;;  %v6249_v19 = vld [vmem:[%s7591_s12 + $0x8] sm:$0xff]  }
 0xff3   :  { %5882 = vmatpush3.bf16.msra.mxu1 %v3755_v46  ;;  %v3967_v45 = vpop.f32.mrb[94].mxu0  ;;  %5883 = vmatprep.mubr.msk.bf16.mxu1 %vm571_vm6, %v6238_v32  ;;  %v6250_v5 = vld [vmem:[%s7591_s12 + $0x28] sm:$0xff]   ;;  %v6252_v32 = vld [vmem:[%s7591_s12 + $0x30] sm:$0xff]  }
 0xff4   :  { %v3971_v42 = vpack.c.bf16 %v3967_v45, %v3964_v29  ;;  %v5894_v37 = vpop.f32.mrb[95].mxu0  ;;  %v6251_v45 = vld [vmem:[%s7591_s12 + $0x10] sm:$0xff]  }
 0xff5   :  { %v6254_v37 = vld [vmem:[%s7591_s12 + $0x38] sm:$0xff]  }
 0xff6   :  { %5895 = vmatprep.subr.bf16.mxu1 %v3971_v42 }
 0xff9   :  { %v4075_v27 = vpop.f32.mrb[96].mxu0 }
 0xffa   :  { %v5907_v55 = vpop.f32.mrb[97].mxu0 }
 0xffb   :  { %v4078_v62 = vpop.f32.mrb[98].mxu0  ;;  %v6256_v55 = vld [vmem:[%s7591_s12 + $0x48] sm:$0xff]  }
 0xffc   :  { %v4082_v54 = vpack.c.bf16 %v4078_v62, %v4075_v27  ;;  %v5908_v30 = vpop.f32.mrb[99].mxu0  ;;  %v6255_v27 = vld [vmem:[%s7591_s12 + $0x40] sm:$0xff]   ;;  %v6257_v62 = vld [vmem:[%s7591_s12 + $0x50] sm:$0xff]  }
 0xffd   :  { %v4455_v30 = vld [vmem:[%s7598_s2] sm:$0x1] }
 0xffe   :  { %5884 = vmatmul.mubr.msk.bf16.vlgmr.msra.gmra.mrb[92].mxu1 %vm571_vm6, %v6239_v2  ;;  %v4195_v6 = vsel %vm1061_vm13, %v4082_v54, 0  ;;  %v5301_v2 = vld [vmem:[%s7598_s2 + $0x1] sm:$0x1] }
 0xfff   :  { %5896 = vmatpush3.bf16.msra.mxu1 %v3971_v42  ;;  %5897 = vmatprep.mubr.msk.bf16.mxu1 %vm571_vm6, %v6240_v16  ;;  %v6253_v42 = vld [vmem:[%s7591_s12 + $0x18] sm:$0xff]   ;;  %v4456_v16 = vunpack.c.l.bf16 %v4455_v30 }
0x1001   :  { %v4134_v57 = vpop.f32.mrb[100].mxu0 }
0x1002   :  { %v5915_v28 = vpop.f32.mrb[101].mxu0 }
0x1003   :  { %v4137_v59 = vpop.f32.mrb[102].mxu0  ;;  %v4460_v28 = vrot.slane %v4456_v16, %v6667_v14 }
0x1004   :  { %v4141_v47 = vpack.c.bf16 %v4137_v59, %v4134_v57  ;;  %v5916_v61 = vpop.f32.mrb[103].mxu0  ;;  %v4560_v57 = vunpack.c.l.bf16 %v5301_v2 }
0x1006   :  { %6036 = vmatprep.subr.msk.bf16.mxu1 %vm1061_vm13, %v4141_v47  ;;  %v4143_v39 = vsel %vm1061_vm13, %v4141_v47, 0  ;;  %v7479_v59 = vrot.slane %v4560_v57, %v6667_v14 }
0x1009   :  { %v4297_v0 = vpop.f32.mrb[104].mxu0 }
0x100a   :  { %5898 = vmatmul.mubr.msk.bf16.vlgmr.msra.gmra.mrb[92].mxu1 %vm571_vm6, %v6241_v35  ;;  %v5935_v56 = vpop.f32.mrb[105].mxu0 }
0x100b   :  { %5918 = vmatpush3.bf16.msra.mxu1 %v4143_v39  ;;  %v4300_v41 = vpop.f32.mrb[106].mxu0  ;;  %5919 = vmatprep.mubr.msk.bf16.mxu1 %vm1057_vm14, %v6242_v31 }
0x100c   :  { %6037 = vmatprep.subr.msk.bf16.mxu1 %vm1061_vm13, %v4082_v54  ;;  %v4304_v13 = vpack.c.bf16 %v4300_v41, %v4297_v0  ;;  %v5936_v8 = vpop.f32.mrb[107].mxu0  ;;  %v6258_v54 = vld [vmem:[%s7591_s12 + $0x58] sm:$0xff]  }
0x100e   :  { %v4306_v63 = vsel %vm1061_vm13, %v4304_v13, 0 }
0x1016   :  { %5920 = vmatmul.mubr.msk.bf16.vlgmr.msra.gmra.mrb[92].mxu1 %vm1057_vm14, %v6243_v26 }
0x1017   :  { %5924 = vmatpush3.bf16.msra.mxu1 %v4195_v6  ;;  %5925 = vmatprep.mubr.msk.bf16.mxu1 %vm1057_vm14, %v6244_v1 }
0x1018   :  { %6038 = vmatprep.subr.msk.bf16.mxu1 %vm1061_vm13, %v4304_v13 }
0x1022   :  { %5926 = vmatmul.mubr.msk.bf16.vlgmr.msra.gmra.mrb[92].mxu1 %vm1057_vm14, %v6245_v4 }
0x1023   :  { %5938 = vmatpush3.bf16.msra.mxu1 %v4306_v63  ;;  %5939 = vmatprep.mubr.msk.bf16.mxu1 %vm1057_vm14, %v6246_v12 }
0x102e   :  { %5940 = vmatmul.mubr.msk.bf16.vlgmr.msra.gmra.mrb[92].mxu1 %vm1057_vm14, %v6247_v20 }
0x102f   :  { %5959 = vmatprep.mubr.msk.bf16.mxu1 %vm949_vm12, %v6248_v15 }
0x1101   :  { %v5941_v21 = vpop.f32.mrb[92].mxu1 }
0x1102   :  { %v4374_v10 = vadd.f32 %v5941_v21, %v5292_v17  ;;  %v4342_v23 = vpop.f32.mrb[93].mxu1 }
0x1103   :  { %v4372_v60 = vadd.f32 %v5292_v17, %v4342_v23  ;;  %v5942_v7 = vpop.f32.mrb[94].mxu1 }
0x1104   :  { %v4382_v44 = vmul.f32 0.01, %v4374_v10  ;;  %v4375_v49 = vadd.f32 %v5942_v7, %v5292_v17  ;;  %v4345_v51 = vpop.f32.mrb[95].mxu1  ;;  %vm4378_vm7 = vcmp.gt.f32.partialorder %v4374_v10, 0.0 }
0x1105   :  { %v4380_v24 = vmul.f32 0.01, %v4372_v60  ;;  %v4373_v25 = vadd.f32 %v5292_v17, %v4345_v51  ;;  %vm4376_vm13 = vcmp.gt.f32.partialorder %v4372_v60, 0.0 }
0x1106   :  { %vm4379_vm15 = vcmp.gt.f32.partialorder %v4375_v49, 0.0  ;;  %v4383_v34 = vmul.f32 0.01, %v4375_v49  ;;  %v4386_v11 = vsel %vm4378_vm7, %v4374_v10, %v4382_v44 }
0x1107   :  { %vm4377_vm0 = vcmp.gt.f32.partialorder %v4373_v25, 0.0  ;;  %v4381_v40 = vmul.f32 0.01, %v4373_v25  ;;  %v4384_v36 = vsel %vm4376_vm13, %v4372_v60, %v4380_v24 }
0x1108   :  { %v4387_v46 = vsel %vm4379_vm15, %v4375_v49, %v4383_v34 }
0x1109   :  { %v4389_v33 = vpack.c.bf16 %v4387_v46, %v4386_v11  ;;  %v4385_v53 = vsel %vm4377_vm0, %v4373_v25, %v4381_v40 }
0x110a   :  { %v4388_v29 = vpack.c.bf16 %v4385_v53, %v4384_v36 }
0x110c   :  { %5943 = vmatprep.subr.bf16.mxu0 %v4388_v29  ;;  %5955 = vmatprep.subr.bf16.mxu1 %v4388_v29 }
0x110d   :  { %5944 = vmatpush3.bf16.msra.mxu0 %v4388_v29  ;;  %5956 = vmatpush3.bf16.msra.mxu1 %v4388_v29 }
0x110e   :  { %5945 = vmatprep.subr.bf16.mxu0 %v4389_v33  ;;  %5957 = vmatprep.subr.bf16.mxu1 %v4389_v33 }
0x1111   :  { %5946 = vmatpush3.bf16.msra.mxu0 %v4389_v33  ;;  %5958 = vmatpush3.bf16.msra.mxu1 %v4389_v33 }
0x1112   :  { %5967 = vmatprep.subr.bf16.mxu0 %v4388_v29 }
0x1114   :  { %5948 = vmatmul.mubr.msk.bf16.vlgmr.msra.gmra.mrb[108].mxu0 %vm949_vm12, %v6249_v19  ;;  %5960 = vmatmul.mubr.msk.bf16.vlgmr.msra.gmra.mrb[96].mxu1 %vm949_vm12, %v6250_v5  ;;  %v5306_v5 = vld [vmem:[%s7598_s2 + $0x2] sm:$0x1] }
0x1115   :  { %5968 = vmatpush3.bf16.msra.mxu0 %v4388_v29  ;;  %5951 = vmatprep.mubr.msk.bf16.mxu0 %vm949_vm12, %v6251_v45 }
0x1116   :  { %5969 = vmatprep.subr.bf16.mxu0 %v4389_v33  ;;  %5963 = vmatprep.mubr.msk.bf16.mxu1 %vm949_vm12, %v6252_v32 }
0x1119   :  { %5970 = vmatpush3.bf16.msra.mxu0 %v4389_v33 }
0x111c   :  { %5952 = vmatmul.mubr.msk.bf16.gmra.mrb[112].mxu0 %vm949_vm12, %v6253_v42  ;;  %5964 = vmatmul.mubr.msk.bf16.gmra.mrb[100].mxu1 %vm949_vm12, %v6254_v37 }
0x111d   :  { %5971 = vmatprep.mubr.msk.bf16.mxu0 %vm949_vm12, %v6255_v27 }
0x1124   :  { %5972 = vmatmul.mubr.msk.bf16.vlgmr.msra.gmra.mrb[116].mxu0 %vm949_vm12, %v6256_v55  ;;  %v4672_v55 = vunpack.c.l.bf16 %v5306_v5 }
0x1125   :  { %5975 = vmatprep.mubr.msk.bf16.mxu0 %vm949_vm12, %v6257_v62 }
0x1126   :  { %v4676_v16 = vrot.slane %v4672_v55, %v6667_v14 }
0x112c   :  { %5976 = vmatmul.mubr.msk.bf16.gmra.mrb[120].mxu0 %vm949_vm12, %v6258_v54 }
0x11e7   :  { %v5949_v47 = vpop.f32.mrb[108].mxu0  ;;  %v5961_v61 = vpop.f32.mrb[96].mxu1 }
0x11e8   :  { %v4463_v0 = vmul.f32 %v5949_v47, %v4460_v28  ;;  %v4424_v39 = vpop.f32.mrb[109].mxu0  ;;  %v4567_v35 = vmul.f32 %v5961_v61, %v7479_v59  ;;  %v4527_v56 = vpop.f32.mrb[97].mxu1 }
0x11e9   :  { %v5950_v41 = vpop.f32.mrb[110].mxu0  ;;  %v5962_v31 = vpop.f32.mrb[98].mxu1  ;;  %v4461_v12 = vmul.f32 %v4460_v28, %v4424_v39  ;;  %v4565_v44 = vmul.f32 %v7479_v59, %v4527_v56 }
0x11ea   :  { %v4464_v13 = vmul.f32 %v5950_v41, %v4460_v28  ;;  %v4475_v8 = vsel %vm571_vm6, %v4463_v0, 0.0  ;;  %v4427_v6 = vpop.f32.mrb[111].mxu0  ;;  %v4530_v26 = vpop.f32.mrb[99].mxu1  ;;  %v4568_v1 = vmul.f32 %v5962_v31, %v7479_v59  ;;  %v4579_v4 = vsel %vm571_vm6, %v4567_v35, 0.0 }
0x11eb   :  { %4476 = vadd.xlane.f32.xlu0 %v4475_v8  ;;  %v4462_v17 = vmul.f32 %v4460_v28, %v4427_v6  ;;  %v4469_v49 = vsel %vm571_vm6, %v4461_v12, 0.0  ;;  %v4566_v25 = vmul.f32 %v7479_v59, %v4530_v26  ;;  %v4573_v11 = vsel %vm571_vm6, %v4565_v44, 0.0  ;;  %v4834_v44 = vpop.xlane.xlu1 %4833 }
0x11ec   :  { %v4478_v63 = vsel %vm571_vm6, %v4464_v13, 0.0  ;;  %v4582_v21 = vsel %vm571_vm6, %v4568_v1, 0.0 }
0x11ed   :  { %4479 = vadd.xlane.f32.xlu1 %v4478_v63  ;;  %v4472_v34 = vsel %vm571_vm6, %v4462_v17, 0.0  ;;  %v4576_v33 = vsel %vm571_vm6, %v4566_v25, 0.0 }
0x11ef   :  { %4580 = vadd.xlane.f32.xlu0 %v4579_v4  ;;  %v5953_v20 = vpop.f32.mrb[112].mxu0  ;;  %v5965_v15 = vpop.f32.mrb[100].mxu1 }
0x11f0   :  { %v4440_v10 = vpop.f32.mrb[113].mxu0  ;;  %v4543_v23 = vpop.f32.mrb[101].mxu1  ;;  %v4467_v40 = vmul.f32 %v5953_v20, %v4460_v28  ;;  %v4571_v53 = vmul.f32 %v5965_v15, %v7479_v59 }
0x11f1   :  { %4583 = vadd.xlane.f32.xlu1 %v4582_v21  ;;  %v5954_v60 = vpop.f32.mrb[114].mxu0  ;;  %v5966_v7 = vpop.f32.mrb[102].mxu1  ;;  %v4465_v62 = vmul.f32 %v4460_v28, %v4440_v10  ;;  %v4569_v61 = vmul.f32 %v7479_v59, %v4543_v23  ;;  %v4835_v23 = vsel %vm571_vm6, %v7097_v38, 0.0 }
0x11f2   :  { %v4443_v51 = vpop.f32.mrb[115].mxu0  ;;  %v4546_v24 = vpop.f32.mrb[103].mxu1  ;;  %v4468_v36 = vmul.f32 %v5954_v60, %v4460_v28  ;;  %v4487_v29 = vsel %vm571_vm6, %v4467_v40, 0.0  ;;  %v4572_v42 = vmul.f32 %v5966_v7, %v7479_v59  ;;  %v4591_v27 = vsel %vm571_vm6, %v4571_v53, 0.0 }
0x11f3   :  { %4470 = vadd.xlane.f32.xlu0 %v4469_v49  ;;  %v4466_v30 = vmul.f32 %v4460_v28, %v4443_v51  ;;  %v4481_v0 = vsel %vm571_vm6, %v4465_v62, 0.0  ;;  %v4570_v35 = vmul.f32 %v7479_v59, %v4546_v24  ;;  %v4585_v28 = vsel %vm571_vm6, %v4569_v61, 0.0  ;;  %v4831_v7 = vpop.xlane.xlu0 %4830 }
0x11f4   :  { %v4490_v37 = vsel %vm571_vm6, %v4468_v36, 0.0  ;;  %v4594_v2 = vsel %vm571_vm6, %v4572_v42, 0.0  ;;  %v4838_v60 = vsel %vm571_vm6, %v7113_v50, 0.0 }
0x11f5   :  { %4473 = vadd.xlane.f32.xlu1 %v4472_v34  ;;  %v4484_v56 = vsel %vm571_vm6, %v4466_v30, 0.0  ;;  %v4588_v14 = vsel %vm571_vm6, %v4570_v35, 0.0 }
0x11f7   :  { %4574 = vadd.xlane.f32.xlu0 %v4573_v11  ;;  %v5973_v46 = vpop.f32.mrb[116].mxu0 }
0x11f8   :  { %v4639_v19 = vpop.f32.mrb[117].mxu0  ;;  %v4679_v41 = vmul.f32 %v5973_v46, %v4676_v16 }
0x11f9   :  { %4577 = vadd.xlane.f32.xlu1 %v4576_v33  ;;  %v5974_v45 = vpop.f32.mrb[118].mxu0  ;;  %v4677_v8 = vmul.f32 %v4676_v16, %v4639_v19 }
0x11fa   :  { %v4642_v32 = vpop.f32.mrb[119].mxu0  ;;  %v4680_v31 = vmul.f32 %v5974_v45, %v4676_v16  ;;  %v4691_v13 = vsel %vm571_vm6, %v4679_v41, 0.0 }
0x11fb   :  { %4488 = vadd.xlane.f32.xlu0 %v4487_v29  ;;  %v4678_v6 = vmul.f32 %v4676_v16, %v4642_v32  ;;  %v4685_v59 = vsel %vm571_vm6, %v4677_v8, 0.0 }
0x11fc   :  { %v4694_v26 = vsel %vm571_vm6, %v4680_v31, 0.0 }
0x11fd   :  { %4491 = vadd.xlane.f32.xlu1 %v4490_v37  ;;  %v4688_v4 = vsel %vm571_vm6, %v4678_v6, 0.0 }
0x11ff   :  { %4592 = vadd.xlane.f32.xlu0 %v4591_v27  ;;  %v5977_v54 = vpop.f32.mrb[120].mxu0  ;;  %v7519_v27 = vld [vmem:[#allocation3] ss:$0 sm:$0xff] }
0x1200   :  { %v4655_v57 = vpop.f32.mrb[121].mxu0  ;;  %v4683_v1 = vmul.f32 %v5977_v54, %v4676_v16 }
0x1201   :  { %4595 = vadd.xlane.f32.xlu1 %v4594_v2  ;;  %v5978_v47 = vpop.f32.mrb[122].mxu0  ;;  %v4681_v20 = vmul.f32 %v4676_v16, %v4655_v57 }
0x1202   :  { %v4658_v39 = vpop.f32.mrb[123].mxu0  ;;  %v4684_v63 = vmul.f32 %v5978_v47, %v4676_v16  ;;  %v4703_v12 = vsel %vm571_vm6, %v4683_v1, 0.0 }
0x1203   :  { %4482 = vadd.xlane.f32.xlu0 %v4481_v0  ;;  %v4682_v15 = vmul.f32 %v4676_v16, %v4658_v39  ;;  %v4697_v21 = vsel %vm571_vm6, %v4681_v20, 0.0 }
0x1204   :  { %v4706_v17 = vsel %vm571_vm6, %v4684_v63, 0.0 }
0x1205   :  { %4485 = vadd.xlane.f32.xlu1 %v4484_v56  ;;  %v4700_v10 = vsel %vm571_vm6, %v4682_v15, 0.0  ;;  %v4846_v15 = vadd.f32 %v4834_v44, %v7350_v48 }
0x1207   :  { %4586 = vadd.xlane.f32.xlu0 %v4585_v28 }
0x1209   :  { %4589 = vadd.xlane.f32.xlu1 %v4588_v14 }
0x120b   :  { %4692 = vadd.xlane.f32.xlu0 %v4691_v13 }
0x120d   :  { %4695 = vadd.xlane.f32.xlu1 %v4694_v26 }
0x120f   :  { %4686 = vadd.xlane.f32.xlu0 %v4685_v59  ;;  %v4845_v59 = vadd.f32 %v4831_v7, %v7347_v58 }
0x1211   :  { %4689 = vadd.xlane.f32.xlu1 %v4688_v4 }
0x1213   :  { %4704 = vadd.xlane.f32.xlu0 %v4703_v12 }
0x1215   :  { %4707 = vadd.xlane.f32.xlu1 %v4706_v17 }
0x1217   :  { %4698 = vadd.xlane.f32.xlu0 %v4697_v21 }
0x1219   :  { %4701 = vadd.xlane.f32.xlu1 %v4700_v10 }
0x121b   :  { %4836 = vadd.xlane.f32.xlu0 %v4835_v23 }
0x121d   :  { %4839 = vadd.xlane.f32.xlu1 %v4838_v60 }
0x1278   :  { %v4477_v49 = vpop.xlane.xlu0 %4476 }
0x127a   :  { %v4480_v51 = vpop.xlane.xlu1 %4479 }
0x127c   :  { %v4581_v24 = vpop.xlane.xlu0 %4580 }
0x127d   :  { %v4599_v50 = vadd.f32 %v4581_v24, %v4477_v49 }
0x127e   :  { %v4584_v25 = vpop.xlane.xlu1 %4583 }
0x127f   :  { %v4600_v42 = vadd.f32 %v4584_v25, %v4480_v51 }
0x1280   :  { %v4471_v34 = vpop.xlane.xlu0 %4470 }
0x1282   :  { %v4474_v40 = vpop.xlane.xlu1 %4473 }
0x1284   :  { %v4575_v11 = vpop.xlane.xlu0 %4574 }
0x1285   :  { %v4597_v62 = vadd.f32 %v4575_v11, %v4471_v34 }
0x1286   :  { %v4578_v46 = vpop.xlane.xlu1 %4577 }
0x1287   :  { %v4598_v16 = vadd.f32 %v4578_v46, %v4474_v40 }
0x1288   :  { %v4489_v36 = vpop.xlane.xlu0 %4488 }
0x128a   :  { %v4492_v33 = vpop.xlane.xlu1 %4491 }
0x128c   :  { %v4593_v53 = vpop.xlane.xlu0 %4592 }
0x128d   :  { %v4603_v17 = vadd.f32 %v4593_v53, %v4489_v36 }
0x128e   :  { %v4596_v29 = vpop.xlane.xlu1 %4595 }
0x128f   :  { %v4604_v60 = vadd.f32 %v4596_v29, %v4492_v33 }
0x1290   :  { %v4483_v38 = vpop.xlane.xlu0 %4482 }
0x1292   :  { %v4486_v19 = vpop.xlane.xlu1 %4485 }
0x1294   :  { %v4587_v5 = vpop.xlane.xlu0 %4586 }
0x1295   :  { %v4601_v8 = vadd.f32 %v4587_v5, %v4483_v38 }
0x1296   :  { %v4590_v45 = vpop.xlane.xlu1 %4589 }
0x1297   :  { %v4602_v63 = vadd.f32 %v4590_v45, %v4486_v19 }
0x1298   :  { %v4693_v32 = vpop.xlane.xlu0 %4692 }
0x1299   :  { %v4711_v37 = vadd.f32 %v4693_v32, %v4599_v50 }
0x129a   :  { %v4696_v55 = vpop.xlane.xlu1 %4695 }
0x129b   :  { %v4851_v54 = vadd.f32 %v7316_v3, %v4711_v37  ;;  %v4712_v30 = vadd.f32 %v4696_v55, %v4600_v42 }
0x129c   :  { %v4687_v2 = vpop.xlane.xlu0 %4686 }
0x129d   :  { %v4866_v57 = vadd.f32 %v7519_v27, %v4851_v54  ;;  %v4852_v47 = vadd.f32 %v7319_v43, %v4712_v30  ;;  %v4709_v61 = vadd.f32 %v4687_v2, %v4597_v62 }
0x129e   :  { %v4690_v0 = vpop.xlane.xlu1 %4689 }
0x129f   :  { %v4874_v39 = vsub.f32 0.0, %v4866_v57  ;;  %v4867_v35 = vadd.f32 %v7519_v27, %v4852_v47  ;;  %v4849_v56 = vadd.f32 %v7326_v18, %v4709_v61  ;;  %v4710_v41 = vadd.f32 %v4690_v0, %v4598_v16 }
0x12a0   :  { %v4705_v28 = vpop.xlane.xlu0 %4704 }
0x12a1   :  { %v4884_v31 = vmul.f32 1.442695, %v4874_v39  ;;  %v4875_v14 = vsub.f32 0.0, %v4867_v35  ;;  %v4864_v3 = vadd.f32 %v7519_v27, %v4849_v56  ;;  %v4850_v13 = vadd.f32 %v7328_v22, %v4710_v41 }
0x12a2   :  { %v4708_v6 = vpop.xlane.xlu1 %4707  ;;  %v4715_v49 = vadd.f32 %v4705_v28, %v4603_v17 }
0x12a3   :  { %6202 = vpow2.f32 %v4884_v31  ;;  %v4886_v26 = vmul.f32 1.442695, %v4875_v14  ;;  %v4872_v43 = vsub.f32 0.0, %v4864_v3  ;;  %v4865_v1 = vadd.f32 %v7519_v27, %v4850_v13 }
0x12a4   :  { %v4699_v4 = vpop.xlane.xlu0 %4698  ;;  %v4716_v25 = vadd.f32 %v4708_v6, %v4604_v60 }
0x12a5   :  { %6204 = vpow2.f32 %v4886_v26  ;;  %v4880_v18 = vmul.f32 1.442695, %v4872_v43  ;;  %v4873_v12 = vsub.f32 0.0, %v4865_v1  ;;  %v4713_v20 = vadd.f32 %v4699_v4, %v4601_v8 }
0x12a6   :  { %v4702_v21 = vpop.xlane.xlu1 %4701 }
0x12a7   :  { %6206 = vpow2.f32 %v4880_v18  ;;  %v4882_v22 = vmul.f32 1.442695, %v4873_v12  ;;  %v4853_v10 = vadd.f32 %v4845_v59, %v4713_v20  ;;  %v4714_v23 = vadd.f32 %v4702_v21, %v4602_v63 }
0x12a8   :  { %v4837_v51 = vpop.xlane.xlu0 %4836 }
0x12a9   :  { %6208 = vpow2.f32 %v4882_v22  ;;  %v4868_v58 = vadd.f32 %v7519_v27, %v4853_v10  ;;  %v4854_v7 = vadd.f32 %v4846_v15, %v4714_v23  ;;  %v4847_v24 = vadd.f32 %v4837_v51, %v7331_v9 }
0x12aa   :  { %v4840_v34 = vpop.xlane.xlu1 %4839 }
0x12ab   :  { %v4876_v40 = vsub.f32 0.0, %v4868_v58  ;;  %v4869_v48 = vadd.f32 %v7519_v27, %v4854_v7  ;;  %v4855_v44 = vadd.f32 %v4847_v24, %v4715_v49  ;;  %v4848_v11 = vadd.f32 %v4840_v34, %v7334_v52 }
0x12ad   :  { %v6203_v46 = vpop.eup %6202  ;;  %v4888_v36 = vmul.f32 1.442695, %v4876_v40  ;;  %v4877_v53 = vsub.f32 0.0, %v4869_v48  ;;  %v4870_v33 = vadd.f32 %v7519_v27, %v4855_v44  ;;  %v4856_v29 = vadd.f32 %v4848_v11, %v4716_v25 }
0x12ae   :  { %v4898_v38 = vadd.f32 1.0, %v6203_v46 }
0x12af   :  { %v6205_v19 = vpop.eup %6204  ;;  %6210 = vpow2.f32 %v4888_v36  ;;  %v4890_v5 = vmul.f32 1.442695, %v4877_v53  ;;  %v4878_v45 = vsub.f32 0.0, %v4870_v33  ;;  %v4871_v9 = vadd.f32 %v7519_v27, %v4856_v29 }
0x12b0   :  { %6212 = vrcp.f32 %v4898_v38  ;;  %v4899_v50 = vadd.f32 1.0, %v6205_v19 }
0x12b1   :  { %v6207_v32 = vpop.eup %6206  ;;  %6214 = vpow2.f32 %v4890_v5  ;;  %v4892_v42 = vmul.f32 1.442695, %v4878_v45  ;;  %v4879_v52 = vsub.f32 0.0, %v4871_v9 }
0x12b2   :  { %6216 = vrcp.f32 %v4899_v50  ;;  %v4896_v37 = vadd.f32 1.0, %v6207_v32 }
0x12b3   :  { %v6209_v55 = vpop.eup %6208  ;;  %6218 = vpow2.f32 %v4892_v42  ;;  %v4894_v62 = vmul.f32 1.442695, %v4879_v52 }
0x12b4   :  { %6220 = vrcp.f32 %v4896_v37  ;;  %v4897_v54 = vadd.f32 1.0, %v6209_v55 }
0x12b5   :  { %6222 = vpow2.f32 %v4894_v62 }
0x12b6   :  { %6224 = vrcp.f32 %v4897_v54 }
0x12b9   :  { %v6211_v30 = vpop.eup %6210 }
0x12ba   :  { %v6213_v27 = vpop.eup %6212  ;;  %v4900_v2 = vadd.f32 1.0, %v6211_v30 }
0x12bb   :  { %v6215_v16 = vpop.eup %6214  ;;  %4931 = vst.msk [vmem:[%s6624_s3 + $0x10] sm:$0xff] %vm4920_vm8, %v6213_v27 }
0x12bc   :  { %v6217_v57 = vpop.eup %6216  ;;  %6226 = vrcp.f32 %v4900_v2  ;;  %v4901_v47 = vadd.f32 1.0, %v6215_v16 }
0x12bd   :  { %v6219_v61 = vpop.eup %6218  ;;  %4932 = vst.msk [vmem:[%s6624_s3 + $0x18] sm:$0xff] %vm4920_vm8, %v6217_v57 }
0x12be   :  { %v6221_v0 = vpop.eup %6220  ;;  %6228 = vrcp.f32 %v4901_v47  ;;  %v4902_v39 = vadd.f32 1.0, %v6219_v61 }
0x12bf   :  { %v6223_v35 = vpop.eup %6222  ;;  %4929 = vst.msk [vmem:[%s6624_s3] sm:$0xff] %vm4920_vm8, %v6221_v0 }
0x12c0   :  { %v6225_v56 = vpop.eup %6224  ;;  %6230 = vrcp.f32 %v4902_v39  ;;  %v4903_v41 = vadd.f32 1.0, %v6223_v35 }
0x12c1   :  { %4930 = vst.msk [vmem:[%s6624_s3 + $0x8] sm:$0xff] %vm4920_vm8, %v6225_v56 }
0x12c2   :  { %6232 = vrcp.f32 %v4903_v41 }
0x12c6   :  { %v6227_v28 = vpop.eup %6226 }
0x12c7   :  { %4933 = vst.msk [vmem:[%s6624_s3 + $0x20] sm:$0xff] %vm4920_vm8, %v6227_v28 }
0x12c8   :  { %v6229_v31 = vpop.eup %6228 }
0x12c9   :  { %4934 = vst.msk [vmem:[%s6624_s3 + $0x28] sm:$0xff] %vm4920_vm8, %v6229_v31 }
0x12ca   :  { %v6231_v14 = vpop.eup %6230 }
0x12cb   :  { %4935 = vst.msk [vmem:[%s6624_s3 + $0x30] sm:$0xff] %vm4920_vm8, %v6231_v14 }
0x12cc   :  { %v6233_v3 = vpop.eup %6232 }
0x12cd   :  { %4936 = vst.msk [vmem:[%s6624_s3 + $0x38] sm:$0xff] %vm4920_vm8, %v6233_v3 }
0x12ce   :  { %4945 = vsyncpa [#allocation5], 1 }
0x12cf   :  { %4946 = vsyncpa [#allocation7], 1 }
0x12d0   :  { %4947 = vsyncpa [#allocation10], 1 }
0x12d1   :  { %4948 = vsyncpa [#allocation13], 1 }

</bundles_post_ra>
